<compile_context>
chip_gen: v7x
topology: tpu7x:2x2x1
jax: 0.10.0
libtpu: 0.0.40
codegen_flags: <defaults>
</compile_context>

<pallas_src>
import numpy as np
import jax
import jax.numpy as jnp
from jax.experimental import pallas as pl
from jax.experimental.pallas import tpu as pltpu

EPS = 1e-5  # PyTorch BatchNorm2d default eps


def conv2d_size_out(size, kernel_size, stride):
    return (size - (kernel_size - 1) - 1) // stride + 1


# ---------------------------------------------------------------------------
# In-kernel helpers
# ---------------------------------------------------------------------------
def _bn_relu(z, gamma, beta):
    """z: (C, N) f32 pre-BN conv output.  Two-pass batch-stat BN + ReLU (f32)."""
    inv_n = 1.0 / z.shape[1]
    mean = jnp.sum(z, axis=1, keepdims=True) * inv_n
    d = z - mean
    var = jnp.sum(d * d, axis=1, keepdims=True) * inv_n
    scale = gamma * jax.lax.rsqrt(var + EPS)
    return jnp.maximum(d * scale + beta, 0.0)


def _conv_block(y_ref, sel_ref, w_ref, g_ref, b_ref, p_ref, y_next_ref,
                *, B, kk, C_in, C_out, Q_out):
    """One strided conv + BN + ReLU, fully in VMEM.

    y_ref:      (B*C_in, Q_in)      bf16 activation, rows ordered (b, c)
    sel_ref:    (Q_in, kk*Q_out)    bf16 0/1 gather matrix (batch independent)
    w_ref:      (C_out, kk*C_in)    bf16 weights, columns ordered (k, c)
    p_ref:      (kk*C_in, B*Q_out)  f32 im2col patch scratch, rows (k,c), cols (b,q)
    y_next_ref: (B*C_out, Q_out)    bf16 output activation, rows (b, c)
    """
    # 1) ONE wide gather GEMM (MXU): exact im2col of the bf16 activation.
    g_all = jnp.dot(y_ref[...], sel_ref[...],
                    preferred_element_type=jnp.float32)      # (B*C_in, kk*Q_out)
    # 2) Repack (b,c)x(k,q) -> (k,c)x(b,q): 2*kk static slice copies (VPU/vst).
    for k in range(kk):
        for b in range(B):
            p_ref[k * C_in:(k + 1) * C_in, b * Q_out:(b + 1) * Q_out] = (
                g_all[b * C_in:(b + 1) * C_in, k * Q_out:(k + 1) * Q_out])
    # 3) ONE big-K weight GEMM (K = kk*C_in); no bias (BN cancels it); one cast.
    z = jnp.dot(w_ref[...], p_ref[...].astype(jnp.bfloat16),
                preferred_element_type=jnp.float32)           # (C_out, B*Q_out)
    # 4) BN (batch stats) + ReLU, then repack columns (b,q) into per-image rows.
    a = _bn_relu(z, g_ref[...], b_ref[...])
    for b in range(B):
        y_next_ref[b * C_out:(b + 1) * C_out, :] = (
            a[:, b * Q_out:(b + 1) * Q_out].astype(jnp.bfloat16))


def _make_kernel(B, C1, C2, C3, Q1, Q2, Q3, kk):
    def kernel(p1_ref, w1_ref, g1_ref, b1_ref,
               s2_ref, w2_ref, g2_ref, b2_ref,
               s3_ref, w3_ref, g3_ref, b3_ref,
               wh_ref, bh_ref, out_ref,
               y1_ref, p2_ref, y2_ref, p3_ref, y3_ref, p4_ref):
        # ---- conv1 + bn1 + relu : one GEMM on host-built patches ----
        z1 = jnp.dot(w1_ref[...], p1_ref[...],
                     preferred_element_type=jnp.float32)      # (C1, B*Q1)
        a1 = _bn_relu(z1, g1_ref[...], b1_ref[...])
        for b in range(B):
            y1_ref[b * C1:(b + 1) * C1, :] = (
                a1[:, b * Q1:(b + 1) * Q1].astype(jnp.bfloat16))
        # ---- conv2 / conv3 : in-kernel im2col + single big-K GEMM each ----
        _conv_block(y1_ref, s2_ref, w2_ref, g2_ref, b2_ref, p2_ref, y2_ref,
                    B=B, kk=kk, C_in=C1, C_out=C2, Q_out=Q2)
        _conv_block(y2_ref, s3_ref, w3_ref, g3_ref, b3_ref, p3_ref, y3_ref,
                    B=B, kk=kk, C_in=C2, C_out=C3, Q_out=Q3)
        # ---- head Linear over the NCHW flatten: (out, Q3*C3) @ (Q3*C3, B) ----
        y3 = y3_ref[...]
        for q in range(Q3):
            for b in range(B):
                p4_ref[q * C3:(q + 1) * C3, b:b + 1] = y3[b * C3:(b + 1) * C3, q:q + 1]
        out = jnp.dot(wh_ref[...], p4_ref[...],
                      preferred_element_type=jnp.float32)      # (out, B)
        out_ref[...] = out + bh_ref[...]
    return kernel


# ---------------------------------------------------------------------------
# Host-side operand preparation (one-time per params; batch-independent)
# ---------------------------------------------------------------------------
def _sel_gather_matrix(hi, wi, ho, wo, k, stride):
    """0/1 gather matrix (Hi*Wi, k*k*Ho*Wo): column (ko, q) selects the input
    pixel feeding kernel offset ko of output pixel q.  Batch independent."""
    qo = ho * wo
    sel = np.zeros((hi * wi, k * k * qo), np.float32)
    for kh in range(k):
        for kw in range(k):
            ko = kh * k + kw
            for oh in range(ho):
                for ow in range(wo):
                    src = (stride * oh + kh) * wi + (stride * ow + kw)
                    sel[src, ko * qo + oh * wo + ow] = 1.0
    return jnp.asarray(sel, dtype=jnp.bfloat16)


def prepare_operands(params, input_shp, out_number):
    h, w, c_in = input_shp
    ho1, wo1 = conv2d_size_out(h, 5, 2), conv2d_size_out(w, 5, 2)
    ho2, wo2 = conv2d_size_out(ho1, 5, 2), conv2d_size_out(wo1, 5, 2)
    ho3, wo3 = conv2d_size_out(ho2, 5, 2), conv2d_size_out(wo2, 5, 2)
    q3 = ho3 * wo3

    k1 = c_in * 25
    k1p = ((k1 + 15) // 16) * 16          # pad contraction dim to bf16 sublane tile
    w1 = jnp.pad(params["conv1_w"].reshape(16, k1), ((0, 0), (0, k1p - k1)))

    return {
        "w1": w1.astype(jnp.bfloat16),
        "g1": params["bn1_g"].reshape(-1, 1).astype(jnp.float32),
        "b1": params["bn1_b"].reshape(-1, 1).astype(jnp.float32),
        "s2": _sel_gather_matrix(ho1, wo1, ho2, wo2, 5, 2),
        # weight columns ordered (k, c_in) to match the patch-scratch rows
        "w2": params["conv2_w"].transpose(0, 2, 3, 1).reshape(32, 25 * 16).astype(jnp.bfloat16),
        "g2": params["bn2_g"].reshape(-1, 1).astype(jnp.float32),
        "b2": params["bn2_b"].reshape(-1, 1).astype(jnp.float32),
        "s3": _sel_gather_matrix(ho2, wo2, ho3, wo3, 5, 2),
        "w3": params["conv3_w"].transpose(0, 2, 3, 1).reshape(32, 25 * 32).astype(jnp.bfloat16),
        "g3": params["bn3_g"].reshape(-1, 1).astype(jnp.float32),
        "b3": params["bn3_b"].reshape(-1, 1).astype(jnp.float32),
        # head columns reordered (q, c) to match the (Q3*C3, B) flatten scratch
        "wh": params["head_w"].reshape(out_number, 32, q3).transpose(0, 2, 1)
                              .reshape(out_number, q3 * 32).astype(jnp.bfloat16),
        "bh": params["head_b"].reshape(-1, 1).astype(jnp.float32),
    }


def build_conv1_patches(x_nhwc, k, s):
    """Transposed im2col of the raw network input: (C_in*k*k, B*Ho*Wo).
    Cheap XLA glue on the tiny input only; deeper layers do their im2col
    in-kernel, so no activation ever round-trips to HBM."""
    x = jnp.transpose(x_nhwc, (0, 3, 1, 2))          # permute(0,3,1,2): NHWC -> NCHW
    B, C, H, W = x.shape
    Ho = conv2d_size_out(H, k, s)
    Wo = conv2d_size_out(W, k, s)
    slabs = []
    for kh in range(k):
        for kw in range(k):
            slabs.append(x[:, :, kh:kh + Ho * s:s, kw:kw + Wo * s:s])
    p = jnp.stack(slabs, axis=0).reshape(k, k, B, C, Ho, Wo)
    p = p.transpose(3, 0, 1, 2, 4, 5).reshape(C * k * k, B * Ho * Wo)
    return p   # rows (ci, kh, kw) = torch weight.reshape order; cols (b, oh, ow)


# ---------------------------------------------------------------------------
# DQN2 forward (single fused Pallas kernel)
# ---------------------------------------------------------------------------
def dqn2_forward(x_nhwc, prep):
    B = x_nhwc.shape[0]
    out_number = prep["bh"].shape[0]
    kk = 25
    C1, C2, C3 = prep["w1"].shape[0], prep["w2"].shape[0], prep["w3"].shape[0]
    Q1 = prep["s2"].shape[0]
    Q2 = prep["s2"].shape[1] // kk
    Q3 = prep["s3"].shape[1] // kk

    p1 = build_conv1_patches(x_nhwc, 5, 2)
    k1p = prep["w1"].shape[1]
    p1 = jnp.pad(p1, ((0, k1p - p1.shape[0]), (0, 0))).astype(jnp.bfloat16)

    vmem = pl.BlockSpec(memory_space=pltpu.MemorySpace.VMEM)
    out_t = pl.pallas_call(
        _make_kernel(B, C1, C2, C3, Q1, Q2, Q3, kk),
        out_shape=jax.ShapeDtypeStruct((out_number, B), jnp.float32),
        in_specs=[vmem] * 14,
        out_specs=vmem,
        scratch_shapes=[
            pltpu.VMEM((B * C1, Q1), jnp.bfloat16),       # y1 activation
            pltpu.VMEM((kk * C1, B * Q2), jnp.float32),   # conv2 im2col patches
            pltpu.VMEM((B * C2, Q2), jnp.bfloat16),       # y2 activation
            pltpu.VMEM((kk * C2, B * Q3), jnp.float32),   # conv3 im2col patches
            pltpu.VMEM((B * C3, Q3), jnp.bfloat16),       # y3 activation
            pltpu.VMEM((Q3 * C3, B), jnp.bfloat16),       # head flatten
        ],
    )(p1, prep["w1"], prep["g1"], prep["b1"],
      prep["s2"], prep["w2"], prep["g2"], prep["b2"],
      prep["s3"], prep["w3"], prep["g3"], prep["b3"],
      prep["wh"], prep["bh"])
    return out_t.T                                     # (B, out_number)


# ---------------------------------------------------------------------------
# Pure-JAX reference mirroring the kernel's numerics contract
# (bf16 matmul operands, f32 accumulation, BN/ReLU math in f32).
# ---------------------------------------------------------------------------
def dqn2_reference(x_nhwc, params):
    x = jnp.transpose(x_nhwc, (0, 3, 1, 2))
    for i in (1, 2, 3):
        w = params[f"conv{i}_w"]
        y = jax.lax.conv_general_dilated(
            x.astype(jnp.bfloat16), w.astype(jnp.bfloat16),
            window_strides=(2, 2), padding="VALID",
            dimension_numbers=("NCHW", "OIHW", "NCHW"),
            preferred_element_type=jnp.float32)
        y = y + params[f"conv{i}_b"][None, :, None, None]   # cancelled by BN below
        mean = jnp.mean(y, axis=(0, 2, 3), keepdims=True)
        var = jnp.mean(jnp.square(y - mean), axis=(0, 2, 3), keepdims=True)
        y = (y - mean) * jax.lax.rsqrt(var + EPS)
        y = y * params[f"bn{i}_g"][None, :, None, None] + params[f"bn{i}_b"][None, :, None, None]
        x = jnp.maximum(y, 0.0)
    flat = x.reshape(x.shape[0], -1)                        # NCHW flatten == torch .view
    out = jnp.dot(flat.astype(jnp.bfloat16),
                  params["head_w"].T.astype(jnp.bfloat16),
                  preferred_element_type=jnp.float32)
    return out + params["head_b"]


# ---------------------------------------------------------------------------
def init_params(key, input_shp, out_number):
    h, w, c_in = input_shp
    chans = [(c_in, 16), (16, 32), (32, 32)]
    wo, ho = w, h
    for _ in range(3):
        wo = conv2d_size_out(wo, 5, 2)
        ho = conv2d_size_out(ho, 5, 2)
    flat_dim = wo * ho * 32

    params = {}
    keys = jax.random.split(key, 16)
    ki = iter(range(16))
    for i, (cin, cout) in enumerate(chans, start=1):
        params[f"conv{i}_w"] = 0.05 * jax.random.normal(
            keys[next(ki)], (cout, cin, 5, 5), jnp.float32)
        params[f"conv{i}_b"] = 0.05 * jax.random.normal(
            keys[next(ki)], (cout,), jnp.float32)
        params[f"bn{i}_g"] = 1.0 + 0.1 * jax.random.normal(
            keys[next(ki)], (cout,), jnp.float32)
        params[f"bn{i}_b"] = 0.1 * jax.random.normal(
            keys[next(ki)], (cout,), jnp.float32)
    params["head_w"] = 0.05 * jax.random.normal(
        keys[next(ki)], (out_number, flat_dim), jnp.float32)
    params["head_b"] = 0.05 * jax.random.normal(
        keys[next(ki)], (out_number,), jnp.float32)
    return params


if __name__ == "__main__":
    B = 2
    input_shp = (40, 40, 3)   # (h, w, c_in) -> conv stack ends at 2x2x32 = 128
    out_number = 6

    key = jax.random.PRNGKey(0)
    kx, kp = jax.random.split(key)
    x = jax.random.normal(kx, (B, *input_shp), jnp.float32)  # NHWC
    params = init_params(kp, input_shp, out_number)
    prep = prepare_operands(params, input_shp, out_number)   # batch-independent

    fwd = jax.jit(dqn2_forward)
    out = jax.block_until_ready(fwd(x, prep))
    ref = jax.block_until_ready(dqn2_reference(x, params))

    assert out.shape == (B, out_number), out.shape
    assert jnp.allclose(out, ref, rtol=1e-3, atol=1e-3), (
        float(jnp.max(jnp.abs(out - ref))))
    print("KERNEL_OK")
</pallas_src>

<mosaic_0001>
module attributes {stable_mosaic.version = 11 : i64} {
  func.func @kernel(%arg0: memref<80x648xbf16, #tpu.memory_space<vmem>>, %arg1: memref<16x80xbf16, #tpu.memory_space<vmem>>, %arg2: memref<16x1xf32, #tpu.memory_space<vmem>>, %arg3: memref<16x1xf32, #tpu.memory_space<vmem>>, %arg4: memref<324x1225xbf16, #tpu.memory_space<vmem>>, %arg5: memref<32x400xbf16, #tpu.memory_space<vmem>>, %arg6: memref<32x1xf32, #tpu.memory_space<vmem>>, %arg7: memref<32x1xf32, #tpu.memory_space<vmem>>, %arg8: memref<49x100xbf16, #tpu.memory_space<vmem>>, %arg9: memref<32x800xbf16, #tpu.memory_space<vmem>>, %arg10: memref<32x1xf32, #tpu.memory_space<vmem>>, %arg11: memref<32x1xf32, #tpu.memory_space<vmem>>, %arg12: memref<6x128xbf16, #tpu.memory_space<vmem>>, %arg13: memref<6x1xf32, #tpu.memory_space<vmem>>, %arg14: memref<6x2xf32, #tpu.memory_space<vmem>>, %arg15: memref<32x324xbf16, #tpu.memory_space<vmem>>, %arg16: memref<400x98xf32, #tpu.memory_space<vmem>>, %arg17: memref<64x49xbf16, #tpu.memory_space<vmem>>, %arg18: memref<800x8xf32, #tpu.memory_space<vmem>>, %arg19: memref<64x4xbf16, #tpu.memory_space<vmem>>, %arg20: memref<128x2xbf16, #tpu.memory_space<vmem>>) attributes {dimension_semantics = [], scalar_prefetch = 0 : i64, scratch_operands = 6 : i64, tpu.core_type = #tpu.core_type<tc>} {
    %c0 = arith.constant 0 : index
    %c0_0 = arith.constant 0 : index
    %0 = vector.load %arg1[%c0, %c0_0] : memref<16x80xbf16, #tpu.memory_space<vmem>>, vector<16x80xbf16>
    %c0_1 = arith.constant 0 : index
    %c0_2 = arith.constant 0 : index
    %1 = vector.load %arg0[%c0_1, %c0_2] : memref<80x648xbf16, #tpu.memory_space<vmem>>, vector<80x648xbf16>
    %cst = arith.constant dense<0.000000e+00> : vector<16x648xf32>
    %2 = tpu.matmul %0, %1, %cst {dimension_numbers = #tpu.dot_dimension_numbers<[1], [0], [0], [1], [0, 0, 1, 1], [], []>} : vector<16x80xbf16>, vector<80x648xbf16>, vector<16x648xf32> -> vector<16x648xf32>
    %c0_3 = arith.constant 0 : index
    %c0_4 = arith.constant 0 : index
    %3 = vector.load %arg2[%c0_3, %c0_4] : memref<16x1xf32, #tpu.memory_space<vmem>>, vector<16x1xf32>
    %c0_5 = arith.constant 0 : index
    %c0_6 = arith.constant 0 : index
    %4 = vector.load %arg3[%c0_5, %c0_6] : memref<16x1xf32, #tpu.memory_space<vmem>>, vector<16x1xf32>
    %cst_7 = arith.constant dense<0.000000e+00> : vector<16xf32>
    %5 = vector.multi_reduction <add>, %2, %cst_7 [1] : vector<16x648xf32> to vector<16xf32>
    %6 = vector.shape_cast %5 : vector<16xf32> to vector<16x1xf32>
    %cst_8 = arith.constant 0.00154320989 : f32
    %7 = vector.broadcast %cst_8 : f32 to vector<16x1xf32>
    %8 = arith.mulf %6, %7 : vector<16x1xf32>
    %9 = vector.broadcast %8 : vector<16x1xf32> to vector<16x648xf32>
    %10 = arith.subf %2, %9 : vector<16x648xf32>
    %11 = arith.mulf %10, %10 : vector<16x648xf32>
    %cst_9 = arith.constant dense<0.000000e+00> : vector<16xf32>
    %12 = vector.multi_reduction <add>, %11, %cst_9 [1] : vector<16x648xf32> to vector<16xf32>
    %13 = vector.shape_cast %12 : vector<16xf32> to vector<16x1xf32>
    %cst_10 = arith.constant 0.00154320989 : f32
    %14 = vector.broadcast %cst_10 : f32 to vector<16x1xf32>
    %15 = arith.mulf %13, %14 : vector<16x1xf32>
    %cst_11 = arith.constant 9.99999974E-6 : f32
    %16 = vector.broadcast %cst_11 : f32 to vector<16x1xf32>
    %17 = arith.addf %15, %16 : vector<16x1xf32>
    %18 = math.rsqrt %17 : vector<16x1xf32>
    %19 = arith.mulf %3, %18 : vector<16x1xf32>
    %20 = vector.broadcast %19 : vector<16x1xf32> to vector<16x648xf32>
    %21 = arith.mulf %10, %20 : vector<16x648xf32>
    %22 = vector.broadcast %4 : vector<16x1xf32> to vector<16x648xf32>
    %23 = arith.addf %21, %22 : vector<16x648xf32>
    %cst_12 = arith.constant 0.000000e+00 : f32
    %24 = vector.broadcast %cst_12 : f32 to vector<16x648xf32>
    %25 = arith.maximumf %23, %24 : vector<16x648xf32>
    %26 = vector.extract_strided_slice %25 {offsets = [0, 0], sizes = [16, 324], strides = [1, 1]} : vector<16x648xf32> to vector<16x324xf32>
    %27 = arith.truncf %26 : vector<16x324xf32> to vector<16x324xbf16>
    %c0_13 = arith.constant 0 : index
    %c0_14 = arith.constant 0 : index
    %28 = vector.load %arg15[%c0_13, %c0_14] : memref<32x324xbf16, #tpu.memory_space<vmem>>, vector<16x324xbf16>
    tpu.vector_store %arg15[%c0_13, %c0_14], %27 {strides = array<i32>} : memref<32x324xbf16, #tpu.memory_space<vmem>>, vector<16x324xbf16>,
    %29 = vector.extract_strided_slice %25 {offsets = [0, 324], sizes = [16, 324], strides = [1, 1]} : vector<16x648xf32> to vector<16x324xf32>
    %30 = arith.truncf %29 : vector<16x324xf32> to vector<16x324xbf16>
    %c16 = arith.constant 16 : index
    %c0_15 = arith.constant 0 : index
    %31 = vector.load %arg15[%c16, %c0_15] : memref<32x324xbf16, #tpu.memory_space<vmem>>, vector<16x324xbf16>
    tpu.vector_store %arg15[%c16, %c0_15], %30 {strides = array<i32>} : memref<32x324xbf16, #tpu.memory_space<vmem>>, vector<16x324xbf16>,
    %c0_16 = arith.constant 0 : index
    %c0_17 = arith.constant 0 : index
    %32 = vector.load %arg15[%c0_16, %c0_17] : memref<32x324xbf16, #tpu.memory_space<vmem>>, vector<32x324xbf16>
    %c0_18 = arith.constant 0 : index
    %c0_19 = arith.constant 0 : index
    %33 = vector.load %arg4[%c0_18, %c0_19] : memref<324x1225xbf16, #tpu.memory_space<vmem>>, vector<324x1225xbf16>
    %cst_20 = arith.constant dense<0.000000e+00> : vector<32x1225xf32>
    %34 = tpu.matmul %32, %33, %cst_20 {dimension_numbers = #tpu.dot_dimension_numbers<[1], [0], [0], [1], [0, 0, 1, 1], [], []>} : vector<32x324xbf16>, vector<324x1225xbf16>, vector<32x1225xf32> -> vector<32x1225xf32>
    %35 = vector.extract_strided_slice %34 {offsets = [0, 0], sizes = [16, 49], strides = [1, 1]} : vector<32x1225xf32> to vector<16x49xf32>
    %c0_21 = arith.constant 0 : index
    %c0_22 = arith.constant 0 : index
    %36 = vector.load %arg16[%c0_21, %c0_22] : memref<400x98xf32, #tpu.memory_space<vmem>>, vector<16x49xf32>
    tpu.vector_store %arg16[%c0_21, %c0_22], %35 {strides = array<i32>} : memref<400x98xf32, #tpu.memory_space<vmem>>, vector<16x49xf32>,
    %37 = vector.extract_strided_slice %34 {offsets = [16, 0], sizes = [16, 49], strides = [1, 1]} : vector<32x1225xf32> to vector<16x49xf32>
    %c0_23 = arith.constant 0 : index
    %c49 = arith.constant 49 : index
    %38 = vector.load %arg16[%c0_23, %c49] : memref<400x98xf32, #tpu.memory_space<vmem>>, vector<16x49xf32>
    tpu.vector_store %arg16[%c0_23, %c49], %37 {strides = array<i32>} : memref<400x98xf32, #tpu.memory_space<vmem>>, vector<16x49xf32>,
    %39 = vector.extract_strided_slice %34 {offsets = [0, 49], sizes = [16, 49], strides = [1, 1]} : vector<32x1225xf32> to vector<16x49xf32>
    %c16_24 = arith.constant 16 : index
    %c0_25 = arith.constant 0 : index
    %40 = vector.load %arg16[%c16_24, %c0_25] : memref<400x98xf32, #tpu.memory_space<vmem>>, vector<16x49xf32>
    tpu.vector_store %arg16[%c16_24, %c0_25], %39 {strides = array<i32>} : memref<400x98xf32, #tpu.memory_space<vmem>>, vector<16x49xf32>,
    %41 = vector.extract_strided_slice %34 {offsets = [16, 49], sizes = [16, 49], strides = [1, 1]} : vector<32x1225xf32> to vector<16x49xf32>
    %c16_26 = arith.constant 16 : index
    %c49_27 = arith.constant 49 : index
    %42 = vector.load %arg16[%c16_26, %c49_27] : memref<400x98xf32, #tpu.memory_space<vmem>>, vector<16x49xf32>
    tpu.vector_store %arg16[%c16_26, %c49_27], %41 {strides = array<i32>} : memref<400x98xf32, #tpu.memory_space<vmem>>, vector<16x49xf32>,
    %43 = vector.extract_strided_slice %34 {offsets = [0, 98], sizes = [16, 49], strides = [1, 1]} : vector<32x1225xf32> to vector<16x49xf32>
    %c32 = arith.constant 32 : index
    %c0_28 = arith.constant 0 : index
    %44 = vector.load %arg16[%c32, %c0_28] : memref<400x98xf32, #tpu.memory_space<vmem>>, vector<16x49xf32>
    tpu.vector_store %arg16[%c32, %c0_28], %43 {strides = array<i32>} : memref<400x98xf32, #tpu.memory_space<vmem>>, vector<16x49xf32>,
    %45 = vector.extract_strided_slice %34 {offsets = [16, 98], sizes = [16, 49], strides = [1, 1]} : vector<32x1225xf32> to vector<16x49xf32>
    %c32_29 = arith.constant 32 : index
    %c49_30 = arith.constant 49 : index
    %46 = vector.load %arg16[%c32_29, %c49_30] : memref<400x98xf32, #tpu.memory_space<vmem>>, vector<16x49xf32>
    tpu.vector_store %arg16[%c32_29, %c49_30], %45 {strides = array<i32>} : memref<400x98xf32, #tpu.memory_space<vmem>>, vector<16x49xf32>,
    %47 = vector.extract_strided_slice %34 {offsets = [0, 147], sizes = [16, 49], strides = [1, 1]} : vector<32x1225xf32> to vector<16x49xf32>
    %c48 = arith.constant 48 : index
    %c0_31 = arith.constant 0 : index
    %48 = vector.load %arg16[%c48, %c0_31] : memref<400x98xf32, #tpu.memory_space<vmem>>, vector<16x49xf32>
    tpu.vector_store %arg16[%c48, %c0_31], %47 {strides = array<i32>} : memref<400x98xf32, #tpu.memory_space<vmem>>, vector<16x49xf32>,
    %49 = vector.extract_strided_slice %34 {offsets = [16, 147], sizes = [16, 49], strides = [1, 1]} : vector<32x1225xf32> to vector<16x49xf32>
    %c48_32 = arith.constant 48 : index
    %c49_33 = arith.constant 49 : index
    %50 = vector.load %arg16[%c48_32, %c49_33] : memref<400x98xf32, #tpu.memory_space<vmem>>, vector<16x49xf32>
    tpu.vector_store %arg16[%c48_32, %c49_33], %49 {strides = array<i32>} : memref<400x98xf32, #tpu.memory_space<vmem>>, vector<16x49xf32>,
    %51 = vector.extract_strided_slice %34 {offsets = [0, 196], sizes = [16, 49], strides = [1, 1]} : vector<32x1225xf32> to vector<16x49xf32>
    %c64 = arith.constant 64 : index
    %c0_34 = arith.constant 0 : index
    %52 = vector.load %arg16[%c64, %c0_34] : memref<400x98xf32, #tpu.memory_space<vmem>>, vector<16x49xf32>
    tpu.vector_store %arg16[%c64, %c0_34], %51 {strides = array<i32>} : memref<400x98xf32, #tpu.memory_space<vmem>>, vector<16x49xf32>,
    %53 = vector.extract_strided_slice %34 {offsets = [16, 196], sizes = [16, 49], strides = [1, 1]} : vector<32x1225xf32> to vector<16x49xf32>
    %c64_35 = arith.constant 64 : index
    %c49_36 = arith.constant 49 : index
    %54 = vector.load %arg16[%c64_35, %c49_36] : memref<400x98xf32, #tpu.memory_space<vmem>>, vector<16x49xf32>
    tpu.vector_store %arg16[%c64_35, %c49_36], %53 {strides = array<i32>} : memref<400x98xf32, #tpu.memory_space<vmem>>, vector<16x49xf32>,
    %55 = vector.extract_strided_slice %34 {offsets = [0, 245], sizes = [16, 49], strides = [1, 1]} : vector<32x1225xf32> to vector<16x49xf32>
    %c80 = arith.constant 80 : index
    %c0_37 = arith.constant 0 : index
    %56 = vector.load %arg16[%c80, %c0_37] : memref<400x98xf32, #tpu.memory_space<vmem>>, vector<16x49xf32>
    tpu.vector_store %arg16[%c80, %c0_37], %55 {strides = array<i32>} : memref<400x98xf32, #tpu.memory_space<vmem>>, vector<16x49xf32>,
    %57 = vector.extract_strided_slice %34 {offsets = [16, 245], sizes = [16, 49], strides = [1, 1]} : vector<32x1225xf32> to vector<16x49xf32>
    %c80_38 = arith.constant 80 : index
    %c49_39 = arith.constant 49 : index
    %58 = vector.load %arg16[%c80_38, %c49_39] : memref<400x98xf32, #tpu.memory_space<vmem>>, vector<16x49xf32>
    tpu.vector_store %arg16[%c80_38, %c49_39], %57 {strides = array<i32>} : memref<400x98xf32, #tpu.memory_space<vmem>>, vector<16x49xf32>,
    %59 = vector.extract_strided_slice %34 {offsets = [0, 294], sizes = [16, 49], strides = [1, 1]} : vector<32x1225xf32> to vector<16x49xf32>
    %c96 = arith.constant 96 : index
    %c0_40 = arith.constant 0 : index
    %60 = vector.load %arg16[%c96, %c0_40] : memref<400x98xf32, #tpu.memory_space<vmem>>, vector<16x49xf32>
    tpu.vector_store %arg16[%c96, %c0_40], %59 {strides = array<i32>} : memref<400x98xf32, #tpu.memory_space<vmem>>, vector<16x49xf32>,
    %61 = vector.extract_strided_slice %34 {offsets = [16, 294], sizes = [16, 49], strides = [1, 1]} : vector<32x1225xf32> to vector<16x49xf32>
    %c96_41 = arith.constant 96 : index
    %c49_42 = arith.constant 49 : index
    %62 = vector.load %arg16[%c96_41, %c49_42] : memref<400x98xf32, #tpu.memory_space<vmem>>, vector<16x49xf32>
    tpu.vector_store %arg16[%c96_41, %c49_42], %61 {strides = array<i32>} : memref<400x98xf32, #tpu.memory_space<vmem>>, vector<16x49xf32>,
    %63 = vector.extract_strided_slice %34 {offsets = [0, 343], sizes = [16, 49], strides = [1, 1]} : vector<32x1225xf32> to vector<16x49xf32>
    %c112 = arith.constant 112 : index
    %c0_43 = arith.constant 0 : index
    %64 = vector.load %arg16[%c112, %c0_43] : memref<400x98xf32, #tpu.memory_space<vmem>>, vector<16x49xf32>
    tpu.vector_store %arg16[%c112, %c0_43], %63 {strides = array<i32>} : memref<400x98xf32, #tpu.memory_space<vmem>>, vector<16x49xf32>,
    %65 = vector.extract_strided_slice %34 {offsets = [16, 343], sizes = [16, 49], strides = [1, 1]} : vector<32x1225xf32> to vector<16x49xf32>
    %c112_44 = arith.constant 112 : index
    %c49_45 = arith.constant 49 : index
    %66 = vector.load %arg16[%c112_44, %c49_45] : memref<400x98xf32, #tpu.memory_space<vmem>>, vector<16x49xf32>
    tpu.vector_store %arg16[%c112_44, %c49_45], %65 {strides = array<i32>} : memref<400x98xf32, #tpu.memory_space<vmem>>, vector<16x49xf32>,
    %67 = vector.extract_strided_slice %34 {offsets = [0, 392], sizes = [16, 49], strides = [1, 1]} : vector<32x1225xf32> to vector<16x49xf32>
    %c128 = arith.constant 128 : index
    %c0_46 = arith.constant 0 : index
    %68 = vector.load %arg16[%c128, %c0_46] : memref<400x98xf32, #tpu.memory_space<vmem>>, vector<16x49xf32>
    tpu.vector_store %arg16[%c128, %c0_46], %67 {strides = array<i32>} : memref<400x98xf32, #tpu.memory_space<vmem>>, vector<16x49xf32>,
    %69 = vector.extract_strided_slice %34 {offsets = [16, 392], sizes = [16, 49], strides = [1, 1]} : vector<32x1225xf32> to vector<16x49xf32>
    %c128_47 = arith.constant 128 : index
    %c49_48 = arith.constant 49 : index
    %70 = vector.load %arg16[%c128_47, %c49_48] : memref<400x98xf32, #tpu.memory_space<vmem>>, vector<16x49xf32>
    tpu.vector_store %arg16[%c128_47, %c49_48], %69 {strides = array<i32>} : memref<400x98xf32, #tpu.memory_space<vmem>>, vector<16x49xf32>,
    %71 = vector.extract_strided_slice %34 {offsets = [0, 441], sizes = [16, 49], strides = [1, 1]} : vector<32x1225xf32> to vector<16x49xf32>
    %c144 = arith.constant 144 : index
    %c0_49 = arith.constant 0 : index
    %72 = vector.load %arg16[%c144, %c0_49] : memref<400x98xf32, #tpu.memory_space<vmem>>, vector<16x49xf32>
    tpu.vector_store %arg16[%c144, %c0_49], %71 {strides = array<i32>} : memref<400x98xf32, #tpu.memory_space<vmem>>, vector<16x49xf32>,
    %73 = vector.extract_strided_slice %34 {offsets = [16, 441], sizes = [16, 49], strides = [1, 1]} : vector<32x1225xf32> to vector<16x49xf32>
    %c144_50 = arith.constant 144 : index
    %c49_51 = arith.constant 49 : index
    %74 = vector.load %arg16[%c144_50, %c49_51] : memref<400x98xf32, #tpu.memory_space<vmem>>, vector<16x49xf32>
    tpu.vector_store %arg16[%c144_50, %c49_51], %73 {strides = array<i32>} : memref<400x98xf32, #tpu.memory_space<vmem>>, vector<16x49xf32>,
    %75 = vector.extract_strided_slice %34 {offsets = [0, 490], sizes = [16, 49], strides = [1, 1]} : vector<32x1225xf32> to vector<16x49xf32>
    %c160 = arith.constant 160 : index
    %c0_52 = arith.constant 0 : index
    %76 = vector.load %arg16[%c160, %c0_52] : memref<400x98xf32, #tpu.memory_space<vmem>>, vector<16x49xf32>
    tpu.vector_store %arg16[%c160, %c0_52], %75 {strides = array<i32>} : memref<400x98xf32, #tpu.memory_space<vmem>>, vector<16x49xf32>,
    %77 = vector.extract_strided_slice %34 {offsets = [16, 490], sizes = [16, 49], strides = [1, 1]} : vector<32x1225xf32> to vector<16x49xf32>
    %c160_53 = arith.constant 160 : index
    %c49_54 = arith.constant 49 : index
    %78 = vector.load %arg16[%c160_53, %c49_54] : memref<400x98xf32, #tpu.memory_space<vmem>>, vector<16x49xf32>
    tpu.vector_store %arg16[%c160_53, %c49_54], %77 {strides = array<i32>} : memref<400x98xf32, #tpu.memory_space<vmem>>, vector<16x49xf32>,
    %79 = vector.extract_strided_slice %34 {offsets = [0, 539], sizes = [16, 49], strides = [1, 1]} : vector<32x1225xf32> to vector<16x49xf32>
    %c176 = arith.constant 176 : index
    %c0_55 = arith.constant 0 : index
    %80 = vector.load %arg16[%c176, %c0_55] : memref<400x98xf32, #tpu.memory_space<vmem>>, vector<16x49xf32>
    tpu.vector_store %arg16[%c176, %c0_55], %79 {strides = array<i32>} : memref<400x98xf32, #tpu.memory_space<vmem>>, vector<16x49xf32>,
    %81 = vector.extract_strided_slice %34 {offsets = [16, 539], sizes = [16, 49], strides = [1, 1]} : vector<32x1225xf32> to vector<16x49xf32>
    %c176_56 = arith.constant 176 : index
    %c49_57 = arith.constant 49 : index
    %82 = vector.load %arg16[%c176_56, %c49_57] : memref<400x98xf32, #tpu.memory_space<vmem>>, vector<16x49xf32>
    tpu.vector_store %arg16[%c176_56, %c49_57], %81 {strides = array<i32>} : memref<400x98xf32, #tpu.memory_space<vmem>>, vector<16x49xf32>,
    %83 = vector.extract_strided_slice %34 {offsets = [0, 588], sizes = [16, 49], strides = [1, 1]} : vector<32x1225xf32> to vector<16x49xf32>
    %c192 = arith.constant 192 : index
    %c0_58 = arith.constant 0 : index
    %84 = vector.load %arg16[%c192, %c0_58] : memref<400x98xf32, #tpu.memory_space<vmem>>, vector<16x49xf32>
    tpu.vector_store %arg16[%c192, %c0_58], %83 {strides = array<i32>} : memref<400x98xf32, #tpu.memory_space<vmem>>, vector<16x49xf32>,
    %85 = vector.extract_strided_slice %34 {offsets = [16, 588], sizes = [16, 49], strides = [1, 1]} : vector<32x1225xf32> to vector<16x49xf32>
    %c192_59 = arith.constant 192 : index
    %c49_60 = arith.constant 49 : index
    %86 = vector.load %arg16[%c192_59, %c49_60] : memref<400x98xf32, #tpu.memory_space<vmem>>, vector<16x49xf32>
    tpu.vector_store %arg16[%c192_59, %c49_60], %85 {strides = array<i32>} : memref<400x98xf32, #tpu.memory_space<vmem>>, vector<16x49xf32>,
    %87 = vector.extract_strided_slice %34 {offsets = [0, 637], sizes = [16, 49], strides = [1, 1]} : vector<32x1225xf32> to vector<16x49xf32>
    %c208 = arith.constant 208 : index
    %c0_61 = arith.constant 0 : index
    %88 = vector.load %arg16[%c208, %c0_61] : memref<400x98xf32, #tpu.memory_space<vmem>>, vector<16x49xf32>
    tpu.vector_store %arg16[%c208, %c0_61], %87 {strides = array<i32>} : memref<400x98xf32, #tpu.memory_space<vmem>>, vector<16x49xf32>,
    %89 = vector.extract_strided_slice %34 {offsets = [16, 637], sizes = [16, 49], strides = [1, 1]} : vector<32x1225xf32> to vector<16x49xf32>
    %c208_62 = arith.constant 208 : index
    %c49_63 = arith.constant 49 : index
    %90 = vector.load %arg16[%c208_62, %c49_63] : memref<400x98xf32, #tpu.memory_space<vmem>>, vector<16x49xf32>
    tpu.vector_store %arg16[%c208_62, %c49_63], %89 {strides = array<i32>} : memref<400x98xf32, #tpu.memory_space<vmem>>, vector<16x49xf32>,
    %91 = vector.extract_strided_slice %34 {offsets = [0, 686], sizes = [16, 49], strides = [1, 1]} : vector<32x1225xf32> to vector<16x49xf32>
    %c224 = arith.constant 224 : index
    %c0_64 = arith.constant 0 : index
    %92 = vector.load %arg16[%c224, %c0_64] : memref<400x98xf32, #tpu.memory_space<vmem>>, vector<16x49xf32>
    tpu.vector_store %arg16[%c224, %c0_64], %91 {strides = array<i32>} : memref<400x98xf32, #tpu.memory_space<vmem>>, vector<16x49xf32>,
    %93 = vector.extract_strided_slice %34 {offsets = [16, 686], sizes = [16, 49], strides = [1, 1]} : vector<32x1225xf32> to vector<16x49xf32>
    %c224_65 = arith.constant 224 : index
    %c49_66 = arith.constant 49 : index
    %94 = vector.load %arg16[%c224_65, %c49_66] : memref<400x98xf32, #tpu.memory_space<vmem>>, vector<16x49xf32>
    tpu.vector_store %arg16[%c224_65, %c49_66], %93 {strides = array<i32>} : memref<400x98xf32, #tpu.memory_space<vmem>>, vector<16x49xf32>,
    %95 = vector.extract_strided_slice %34 {offsets = [0, 735], sizes = [16, 49], strides = [1, 1]} : vector<32x1225xf32> to vector<16x49xf32>
    %c240 = arith.constant 240 : index
    %c0_67 = arith.constant 0 : index
    %96 = vector.load %arg16[%c240, %c0_67] : memref<400x98xf32, #tpu.memory_space<vmem>>, vector<16x49xf32>
    tpu.vector_store %arg16[%c240, %c0_67], %95 {strides = array<i32>} : memref<400x98xf32, #tpu.memory_space<vmem>>, vector<16x49xf32>,
    %97 = vector.extract_strided_slice %34 {offsets = [16, 735], sizes = [16, 49], strides = [1, 1]} : vector<32x1225xf32> to vector<16x49xf32>
    %c240_68 = arith.constant 240 : index
    %c49_69 = arith.constant 49 : index
    %98 = vector.load %arg16[%c240_68, %c49_69] : memref<400x98xf32, #tpu.memory_space<vmem>>, vector<16x49xf32>
    tpu.vector_store %arg16[%c240_68, %c49_69], %97 {strides = array<i32>} : memref<400x98xf32, #tpu.memory_space<vmem>>, vector<16x49xf32>,
    %99 = vector.extract_strided_slice %34 {offsets = [0, 784], sizes = [16, 49], strides = [1, 1]} : vector<32x1225xf32> to vector<16x49xf32>
    %c256 = arith.constant 256 : index
    %c0_70 = arith.constant 0 : index
    %100 = vector.load %arg16[%c256, %c0_70] : memref<400x98xf32, #tpu.memory_space<vmem>>, vector<16x49xf32>
    tpu.vector_store %arg16[%c256, %c0_70], %99 {strides = array<i32>} : memref<400x98xf32, #tpu.memory_space<vmem>>, vector<16x49xf32>,
    %101 = vector.extract_strided_slice %34 {offsets = [16, 784], sizes = [16, 49], strides = [1, 1]} : vector<32x1225xf32> to vector<16x49xf32>
    %c256_71 = arith.constant 256 : index
    %c49_72 = arith.constant 49 : index
    %102 = vector.load %arg16[%c256_71, %c49_72] : memref<400x98xf32, #tpu.memory_space<vmem>>, vector<16x49xf32>
    tpu.vector_store %arg16[%c256_71, %c49_72], %101 {strides = array<i32>} : memref<400x98xf32, #tpu.memory_space<vmem>>, vector<16x49xf32>,
    %103 = vector.extract_strided_slice %34 {offsets = [0, 833], sizes = [16, 49], strides = [1, 1]} : vector<32x1225xf32> to vector<16x49xf32>
    %c272 = arith.constant 272 : index
    %c0_73 = arith.constant 0 : index
    %104 = vector.load %arg16[%c272, %c0_73] : memref<400x98xf32, #tpu.memory_space<vmem>>, vector<16x49xf32>
    tpu.vector_store %arg16[%c272, %c0_73], %103 {strides = array<i32>} : memref<400x98xf32, #tpu.memory_space<vmem>>, vector<16x49xf32>,
    %105 = vector.extract_strided_slice %34 {offsets = [16, 833], sizes = [16, 49], strides = [1, 1]} : vector<32x1225xf32> to vector<16x49xf32>
    %c272_74 = arith.constant 272 : index
    %c49_75 = arith.constant 49 : index
    %106 = vector.load %arg16[%c272_74, %c49_75] : memref<400x98xf32, #tpu.memory_space<vmem>>, vector<16x49xf32>
    tpu.vector_store %arg16[%c272_74, %c49_75], %105 {strides = array<i32>} : memref<400x98xf32, #tpu.memory_space<vmem>>, vector<16x49xf32>,
    %107 = vector.extract_strided_slice %34 {offsets = [0, 882], sizes = [16, 49], strides = [1, 1]} : vector<32x1225xf32> to vector<16x49xf32>
    %c288 = arith.constant 288 : index
    %c0_76 = arith.constant 0 : index
    %108 = vector.load %arg16[%c288, %c0_76] : memref<400x98xf32, #tpu.memory_space<vmem>>, vector<16x49xf32>
    tpu.vector_store %arg16[%c288, %c0_76], %107 {strides = array<i32>} : memref<400x98xf32, #tpu.memory_space<vmem>>, vector<16x49xf32>,
    %109 = vector.extract_strided_slice %34 {offsets = [16, 882], sizes = [16, 49], strides = [1, 1]} : vector<32x1225xf32> to vector<16x49xf32>
    %c288_77 = arith.constant 288 : index
    %c49_78 = arith.constant 49 : index
    %110 = vector.load %arg16[%c288_77, %c49_78] : memref<400x98xf32, #tpu.memory_space<vmem>>, vector<16x49xf32>
    tpu.vector_store %arg16[%c288_77, %c49_78], %109 {strides = array<i32>} : memref<400x98xf32, #tpu.memory_space<vmem>>, vector<16x49xf32>,
    %111 = vector.extract_strided_slice %34 {offsets = [0, 931], sizes = [16, 49], strides = [1, 1]} : vector<32x1225xf32> to vector<16x49xf32>
    %c304 = arith.constant 304 : index
    %c0_79 = arith.constant 0 : index
    %112 = vector.load %arg16[%c304, %c0_79] : memref<400x98xf32, #tpu.memory_space<vmem>>, vector<16x49xf32>
    tpu.vector_store %arg16[%c304, %c0_79], %111 {strides = array<i32>} : memref<400x98xf32, #tpu.memory_space<vmem>>, vector<16x49xf32>,
    %113 = vector.extract_strided_slice %34 {offsets = [16, 931], sizes = [16, 49], strides = [1, 1]} : vector<32x1225xf32> to vector<16x49xf32>
    %c304_80 = arith.constant 304 : index
    %c49_81 = arith.constant 49 : index
    %114 = vector.load %arg16[%c304_80, %c49_81] : memref<400x98xf32, #tpu.memory_space<vmem>>, vector<16x49xf32>
    tpu.vector_store %arg16[%c304_80, %c49_81], %113 {strides = array<i32>} : memref<400x98xf32, #tpu.memory_space<vmem>>, vector<16x49xf32>,
    %115 = vector.extract_strided_slice %34 {offsets = [0, 980], sizes = [16, 49], strides = [1, 1]} : vector<32x1225xf32> to vector<16x49xf32>
    %c320 = arith.constant 320 : index
    %c0_82 = arith.constant 0 : index
    %116 = vector.load %arg16[%c320, %c0_82] : memref<400x98xf32, #tpu.memory_space<vmem>>, vector<16x49xf32>
    tpu.vector_store %arg16[%c320, %c0_82], %115 {strides = array<i32>} : memref<400x98xf32, #tpu.memory_space<vmem>>, vector<16x49xf32>,
    %117 = vector.extract_strided_slice %34 {offsets = [16, 980], sizes = [16, 49], strides = [1, 1]} : vector<32x1225xf32> to vector<16x49xf32>
    %c320_83 = arith.constant 320 : index
    %c49_84 = arith.constant 49 : index
    %118 = vector.load %arg16[%c320_83, %c49_84] : memref<400x98xf32, #tpu.memory_space<vmem>>, vector<16x49xf32>
    tpu.vector_store %arg16[%c320_83, %c49_84], %117 {strides = array<i32>} : memref<400x98xf32, #tpu.memory_space<vmem>>, vector<16x49xf32>,
    %119 = vector.extract_strided_slice %34 {offsets = [0, 1029], sizes = [16, 49], strides = [1, 1]} : vector<32x1225xf32> to vector<16x49xf32>
    %c336 = arith.constant 336 : index
    %c0_85 = arith.constant 0 : index
    %120 = vector.load %arg16[%c336, %c0_85] : memref<400x98xf32, #tpu.memory_space<vmem>>, vector<16x49xf32>
    tpu.vector_store %arg16[%c336, %c0_85], %119 {strides = array<i32>} : memref<400x98xf32, #tpu.memory_space<vmem>>, vector<16x49xf32>,
    %121 = vector.extract_strided_slice %34 {offsets = [16, 1029], sizes = [16, 49], strides = [1, 1]} : vector<32x1225xf32> to vector<16x49xf32>
    %c336_86 = arith.constant 336 : index
    %c49_87 = arith.constant 49 : index
    %122 = vector.load %arg16[%c336_86, %c49_87] : memref<400x98xf32, #tpu.memory_space<vmem>>, vector<16x49xf32>
    tpu.vector_store %arg16[%c336_86, %c49_87], %121 {strides = array<i32>} : memref<400x98xf32, #tpu.memory_space<vmem>>, vector<16x49xf32>,
    %123 = vector.extract_strided_slice %34 {offsets = [0, 1078], sizes = [16, 49], strides = [1, 1]} : vector<32x1225xf32> to vector<16x49xf32>
    %c352 = arith.constant 352 : index
    %c0_88 = arith.constant 0 : index
    %124 = vector.load %arg16[%c352, %c0_88] : memref<400x98xf32, #tpu.memory_space<vmem>>, vector<16x49xf32>
    tpu.vector_store %arg16[%c352, %c0_88], %123 {strides = array<i32>} : memref<400x98xf32, #tpu.memory_space<vmem>>, vector<16x49xf32>,
    %125 = vector.extract_strided_slice %34 {offsets = [16, 1078], sizes = [16, 49], strides = [1, 1]} : vector<32x1225xf32> to vector<16x49xf32>
    %c352_89 = arith.constant 352 : index
    %c49_90 = arith.constant 49 : index
    %126 = vector.load %arg16[%c352_89, %c49_90] : memref<400x98xf32, #tpu.memory_space<vmem>>, vector<16x49xf32>
    tpu.vector_store %arg16[%c352_89, %c49_90], %125 {strides = array<i32>} : memref<400x98xf32, #tpu.memory_space<vmem>>, vector<16x49xf32>,
    %127 = vector.extract_strided_slice %34 {offsets = [0, 1127], sizes = [16, 49], strides = [1, 1]} : vector<32x1225xf32> to vector<16x49xf32>
    %c368 = arith.constant 368 : index
    %c0_91 = arith.constant 0 : index
    %128 = vector.load %arg16[%c368, %c0_91] : memref<400x98xf32, #tpu.memory_space<vmem>>, vector<16x49xf32>
    tpu.vector_store %arg16[%c368, %c0_91], %127 {strides = array<i32>} : memref<400x98xf32, #tpu.memory_space<vmem>>, vector<16x49xf32>,
    %129 = vector.extract_strided_slice %34 {offsets = [16, 1127], sizes = [16, 49], strides = [1, 1]} : vector<32x1225xf32> to vector<16x49xf32>
    %c368_92 = arith.constant 368 : index
    %c49_93 = arith.constant 49 : index
    %130 = vector.load %arg16[%c368_92, %c49_93] : memref<400x98xf32, #tpu.memory_space<vmem>>, vector<16x49xf32>
    tpu.vector_store %arg16[%c368_92, %c49_93], %129 {strides = array<i32>} : memref<400x98xf32, #tpu.memory_space<vmem>>, vector<16x49xf32>,
    %131 = vector.extract_strided_slice %34 {offsets = [0, 1176], sizes = [16, 49], strides = [1, 1]} : vector<32x1225xf32> to vector<16x49xf32>
    %c384 = arith.constant 384 : index
    %c0_94 = arith.constant 0 : index
    %132 = vector.load %arg16[%c384, %c0_94] : memref<400x98xf32, #tpu.memory_space<vmem>>, vector<16x49xf32>
    tpu.vector_store %arg16[%c384, %c0_94], %131 {strides = array<i32>} : memref<400x98xf32, #tpu.memory_space<vmem>>, vector<16x49xf32>,
    %133 = vector.extract_strided_slice %34 {offsets = [16, 1176], sizes = [16, 49], strides = [1, 1]} : vector<32x1225xf32> to vector<16x49xf32>
    %c384_95 = arith.constant 384 : index
    %c49_96 = arith.constant 49 : index
    %134 = vector.load %arg16[%c384_95, %c49_96] : memref<400x98xf32, #tpu.memory_space<vmem>>, vector<16x49xf32>
    tpu.vector_store %arg16[%c384_95, %c49_96], %133 {strides = array<i32>} : memref<400x98xf32, #tpu.memory_space<vmem>>, vector<16x49xf32>,
    %c0_97 = arith.constant 0 : index
    %c0_98 = arith.constant 0 : index
    %135 = vector.load %arg5[%c0_97, %c0_98] : memref<32x400xbf16, #tpu.memory_space<vmem>>, vector<32x400xbf16>
    %c0_99 = arith.constant 0 : index
    %c0_100 = arith.constant 0 : index
    %136 = vector.load %arg16[%c0_99, %c0_100] : memref<400x98xf32, #tpu.memory_space<vmem>>, vector<400x98xf32>
    %137 = arith.truncf %136 : vector<400x98xf32> to vector<400x98xbf16>
    %cst_101 = arith.constant dense<0.000000e+00> : vector<32x98xf32>
    %138 = tpu.matmul %135, %137, %cst_101 {dimension_numbers = #tpu.dot_dimension_numbers<[1], [0], [0], [1], [0, 0, 1, 1], [], []>} : vector<32x400xbf16>, vector<400x98xbf16>, vector<32x98xf32> -> vector<32x98xf32>
    %c0_102 = arith.constant 0 : index
    %c0_103 = arith.constant 0 : index
    %139 = vector.load %arg6[%c0_102, %c0_103] : memref<32x1xf32, #tpu.memory_space<vmem>>, vector<32x1xf32>
    %c0_104 = arith.constant 0 : index
    %c0_105 = arith.constant 0 : index
    %140 = vector.load %arg7[%c0_104, %c0_105] : memref<32x1xf32, #tpu.memory_space<vmem>>, vector<32x1xf32>
    %cst_106 = arith.constant dense<0.000000e+00> : vector<32xf32>
    %141 = vector.multi_reduction <add>, %138, %cst_106 [1] : vector<32x98xf32> to vector<32xf32>
    %142 = vector.shape_cast %141 : vector<32xf32> to vector<32x1xf32>
    %cst_107 = arith.constant 0.0102040814 : f32
    %143 = vector.broadcast %cst_107 : f32 to vector<32x1xf32>
    %144 = arith.mulf %142, %143 : vector<32x1xf32>
    %145 = vector.broadcast %144 : vector<32x1xf32> to vector<32x98xf32>
    %146 = arith.subf %138, %145 : vector<32x98xf32>
    %147 = arith.mulf %146, %146 : vector<32x98xf32>
    %cst_108 = arith.constant dense<0.000000e+00> : vector<32xf32>
    %148 = vector.multi_reduction <add>, %147, %cst_108 [1] : vector<32x98xf32> to vector<32xf32>
    %149 = vector.shape_cast %148 : vector<32xf32> to vector<32x1xf32>
    %cst_109 = arith.constant 0.0102040814 : f32
    %150 = vector.broadcast %cst_109 : f32 to vector<32x1xf32>
    %151 = arith.mulf %149, %150 : vector<32x1xf32>
    %cst_110 = arith.constant 9.99999974E-6 : f32
    %152 = vector.broadcast %cst_110 : f32 to vector<32x1xf32>
    %153 = arith.addf %151, %152 : vector<32x1xf32>
    %154 = math.rsqrt %153 : vector<32x1xf32>
    %155 = arith.mulf %139, %154 : vector<32x1xf32>
    %156 = vector.broadcast %155 : vector<32x1xf32> to vector<32x98xf32>
    %157 = arith.mulf %146, %156 : vector<32x98xf32>
    %158 = vector.broadcast %140 : vector<32x1xf32> to vector<32x98xf32>
    %159 = arith.addf %157, %158 : vector<32x98xf32>
    %cst_111 = arith.constant 0.000000e+00 : f32
    %160 = vector.broadcast %cst_111 : f32 to vector<32x98xf32>
    %161 = arith.maximumf %159, %160 : vector<32x98xf32>
    %162 = vector.extract_strided_slice %161 {offsets = [0, 0], sizes = [32, 49], strides = [1, 1]} : vector<32x98xf32> to vector<32x49xf32>
    %163 = arith.truncf %162 : vector<32x49xf32> to vector<32x49xbf16>
    %c0_112 = arith.constant 0 : index
    %c0_113 = arith.constant 0 : index
    %164 = vector.load %arg17[%c0_112, %c0_113] : memref<64x49xbf16, #tpu.memory_space<vmem>>, vector<32x49xbf16>
    tpu.vector_store %arg17[%c0_112, %c0_113], %163 {strides = array<i32>} : memref<64x49xbf16, #tpu.memory_space<vmem>>, vector<32x49xbf16>,
    %165 = vector.extract_strided_slice %161 {offsets = [0, 49], sizes = [32, 49], strides = [1, 1]} : vector<32x98xf32> to vector<32x49xf32>
    %166 = arith.truncf %165 : vector<32x49xf32> to vector<32x49xbf16>
    %c32_114 = arith.constant 32 : index
    %c0_115 = arith.constant 0 : index
    %167 = vector.load %arg17[%c32_114, %c0_115] : memref<64x49xbf16, #tpu.memory_space<vmem>>, vector<32x49xbf16>
    tpu.vector_store %arg17[%c32_114, %c0_115], %166 {strides = array<i32>} : memref<64x49xbf16, #tpu.memory_space<vmem>>, vector<32x49xbf16>,
    %c0_116 = arith.constant 0 : index
    %c0_117 = arith.constant 0 : index
    %168 = vector.load %arg17[%c0_116, %c0_117] : memref<64x49xbf16, #tpu.memory_space<vmem>>, vector<64x49xbf16>
    %c0_118 = arith.constant 0 : index
    %c0_119 = arith.constant 0 : index
    %169 = vector.load %arg8[%c0_118, %c0_119] : memref<49x100xbf16, #tpu.memory_space<vmem>>, vector<49x100xbf16>
    %cst_120 = arith.constant dense<0.000000e+00> : vector<64x100xf32>
    %170 = tpu.matmul %168, %169, %cst_120 {dimension_numbers = #tpu.dot_dimension_numbers<[1], [0], [0], [1], [0, 0, 1, 1], [], []>} : vector<64x49xbf16>, vector<49x100xbf16>, vector<64x100xf32> -> vector<64x100xf32>
    %171 = vector.extract_strided_slice %170 {offsets = [0, 0], sizes = [32, 4], strides = [1, 1]} : vector<64x100xf32> to vector<32x4xf32>
    %c0_121 = arith.constant 0 : index
    %c0_122 = arith.constant 0 : index
    %172 = vector.load %arg18[%c0_121, %c0_122] : memref<800x8xf32, #tpu.memory_space<vmem>>, vector<32x4xf32>
    tpu.vector_store %arg18[%c0_121, %c0_122], %171 {strides = array<i32>} : memref<800x8xf32, #tpu.memory_space<vmem>>, vector<32x4xf32>,
    %173 = vector.extract_strided_slice %170 {offsets = [32, 0], sizes = [32, 4], strides = [1, 1]} : vector<64x100xf32> to vector<32x4xf32>
    %c0_123 = arith.constant 0 : index
    %c4 = arith.constant 4 : index
    %174 = vector.load %arg18[%c0_123, %c4] : memref<800x8xf32, #tpu.memory_space<vmem>>, vector<32x4xf32>
    tpu.vector_store %arg18[%c0_123, %c4], %173 {strides = array<i32>} : memref<800x8xf32, #tpu.memory_space<vmem>>, vector<32x4xf32>,
    %175 = vector.extract_strided_slice %170 {offsets = [0, 4], sizes = [32, 4], strides = [1, 1]} : vector<64x100xf32> to vector<32x4xf32>
    %c32_124 = arith.constant 32 : index
    %c0_125 = arith.constant 0 : index
    %176 = vector.load %arg18[%c32_124, %c0_125] : memref<800x8xf32, #tpu.memory_space<vmem>>, vector<32x4xf32>
    tpu.vector_store %arg18[%c32_124, %c0_125], %175 {strides = array<i32>} : memref<800x8xf32, #tpu.memory_space<vmem>>, vector<32x4xf32>,
    %177 = vector.extract_strided_slice %170 {offsets = [32, 4], sizes = [32, 4], strides = [1, 1]} : vector<64x100xf32> to vector<32x4xf32>
    %c32_126 = arith.constant 32 : index
    %c4_127 = arith.constant 4 : index
    %178 = vector.load %arg18[%c32_126, %c4_127] : memref<800x8xf32, #tpu.memory_space<vmem>>, vector<32x4xf32>
    tpu.vector_store %arg18[%c32_126, %c4_127], %177 {strides = array<i32>} : memref<800x8xf32, #tpu.memory_space<vmem>>, vector<32x4xf32>,
    %179 = vector.extract_strided_slice %170 {offsets = [0, 8], sizes = [32, 4], strides = [1, 1]} : vector<64x100xf32> to vector<32x4xf32>
    %c64_128 = arith.constant 64 : index
    %c0_129 = arith.constant 0 : index
    %180 = vector.load %arg18[%c64_128, %c0_129] : memref<800x8xf32, #tpu.memory_space<vmem>>, vector<32x4xf32>
    tpu.vector_store %arg18[%c64_128, %c0_129], %179 {strides = array<i32>} : memref<800x8xf32, #tpu.memory_space<vmem>>, vector<32x4xf32>,
    %181 = vector.extract_strided_slice %170 {offsets = [32, 8], sizes = [32, 4], strides = [1, 1]} : vector<64x100xf32> to vector<32x4xf32>
    %c64_130 = arith.constant 64 : index
    %c4_131 = arith.constant 4 : index
    %182 = vector.load %arg18[%c64_130, %c4_131] : memref<800x8xf32, #tpu.memory_space<vmem>>, vector<32x4xf32>
    tpu.vector_store %arg18[%c64_130, %c4_131], %181 {strides = array<i32>} : memref<800x8xf32, #tpu.memory_space<vmem>>, vector<32x4xf32>,
    %183 = vector.extract_strided_slice %170 {offsets = [0, 12], sizes = [32, 4], strides = [1, 1]} : vector<64x100xf32> to vector<32x4xf32>
    %c96_132 = arith.constant 96 : index
    %c0_133 = arith.constant 0 : index
    %184 = vector.load %arg18[%c96_132, %c0_133] : memref<800x8xf32, #tpu.memory_space<vmem>>, vector<32x4xf32>
    tpu.vector_store %arg18[%c96_132, %c0_133], %183 {strides = array<i32>} : memref<800x8xf32, #tpu.memory_space<vmem>>, vector<32x4xf32>,
    %185 = vector.extract_strided_slice %170 {offsets = [32, 12], sizes = [32, 4], strides = [1, 1]} : vector<64x100xf32> to vector<32x4xf32>
    %c96_134 = arith.constant 96 : index
    %c4_135 = arith.constant 4 : index
    %186 = vector.load %arg18[%c96_134, %c4_135] : memref<800x8xf32, #tpu.memory_space<vmem>>, vector<32x4xf32>
    tpu.vector_store %arg18[%c96_134, %c4_135], %185 {strides = array<i32>} : memref<800x8xf32, #tpu.memory_space<vmem>>, vector<32x4xf32>,
    %187 = vector.extract_strided_slice %170 {offsets = [0, 16], sizes = [32, 4], strides = [1, 1]} : vector<64x100xf32> to vector<32x4xf32>
    %c128_136 = arith.constant 128 : index
    %c0_137 = arith.constant 0 : index
    %188 = vector.load %arg18[%c128_136, %c0_137] : memref<800x8xf32, #tpu.memory_space<vmem>>, vector<32x4xf32>
    tpu.vector_store %arg18[%c128_136, %c0_137], %187 {strides = array<i32>} : memref<800x8xf32, #tpu.memory_space<vmem>>, vector<32x4xf32>,
    %189 = vector.extract_strided_slice %170 {offsets = [32, 16], sizes = [32, 4], strides = [1, 1]} : vector<64x100xf32> to vector<32x4xf32>
    %c128_138 = arith.constant 128 : index
    %c4_139 = arith.constant 4 : index
    %190 = vector.load %arg18[%c128_138, %c4_139] : memref<800x8xf32, #tpu.memory_space<vmem>>, vector<32x4xf32>
    tpu.vector_store %arg18[%c128_138, %c4_139], %189 {strides = array<i32>} : memref<800x8xf32, #tpu.memory_space<vmem>>, vector<32x4xf32>,
    %191 = vector.extract_strided_slice %170 {offsets = [0, 20], sizes = [32, 4], strides = [1, 1]} : vector<64x100xf32> to vector<32x4xf32>
    %c160_140 = arith.constant 160 : index
    %c0_141 = arith.constant 0 : index
    %192 = vector.load %arg18[%c160_140, %c0_141] : memref<800x8xf32, #tpu.memory_space<vmem>>, vector<32x4xf32>
    tpu.vector_store %arg18[%c160_140, %c0_141], %191 {strides = array<i32>} : memref<800x8xf32, #tpu.memory_space<vmem>>, vector<32x4xf32>,
    %193 = vector.extract_strided_slice %170 {offsets = [32, 20], sizes = [32, 4], strides = [1, 1]} : vector<64x100xf32> to vector<32x4xf32>
    %c160_142 = arith.constant 160 : index
    %c4_143 = arith.constant 4 : index
    %194 = vector.load %arg18[%c160_142, %c4_143] : memref<800x8xf32, #tpu.memory_space<vmem>>, vector<32x4xf32>
    tpu.vector_store %arg18[%c160_142, %c4_143], %193 {strides = array<i32>} : memref<800x8xf32, #tpu.memory_space<vmem>>, vector<32x4xf32>,
    %195 = vector.extract_strided_slice %170 {offsets = [0, 24], sizes = [32, 4], strides = [1, 1]} : vector<64x100xf32> to vector<32x4xf32>
    %c192_144 = arith.constant 192 : index
    %c0_145 = arith.constant 0 : index
    %196 = vector.load %arg18[%c192_144, %c0_145] : memref<800x8xf32, #tpu.memory_space<vmem>>, vector<32x4xf32>
    tpu.vector_store %arg18[%c192_144, %c0_145], %195 {strides = array<i32>} : memref<800x8xf32, #tpu.memory_space<vmem>>, vector<32x4xf32>,
    %197 = vector.extract_strided_slice %170 {offsets = [32, 24], sizes = [32, 4], strides = [1, 1]} : vector<64x100xf32> to vector<32x4xf32>
    %c192_146 = arith.constant 192 : index
    %c4_147 = arith.constant 4 : index
    %198 = vector.load %arg18[%c192_146, %c4_147] : memref<800x8xf32, #tpu.memory_space<vmem>>, vector<32x4xf32>
    tpu.vector_store %arg18[%c192_146, %c4_147], %197 {strides = array<i32>} : memref<800x8xf32, #tpu.memory_space<vmem>>, vector<32x4xf32>,
    %199 = vector.extract_strided_slice %170 {offsets = [0, 28], sizes = [32, 4], strides = [1, 1]} : vector<64x100xf32> to vector<32x4xf32>
    %c224_148 = arith.constant 224 : index
    %c0_149 = arith.constant 0 : index
    %200 = vector.load %arg18[%c224_148, %c0_149] : memref<800x8xf32, #tpu.memory_space<vmem>>, vector<32x4xf32>
    tpu.vector_store %arg18[%c224_148, %c0_149], %199 {strides = array<i32>} : memref<800x8xf32, #tpu.memory_space<vmem>>, vector<32x4xf32>,
    %201 = vector.extract_strided_slice %170 {offsets = [32, 28], sizes = [32, 4], strides = [1, 1]} : vector<64x100xf32> to vector<32x4xf32>
    %c224_150 = arith.constant 224 : index
    %c4_151 = arith.constant 4 : index
    %202 = vector.load %arg18[%c224_150, %c4_151] : memref<800x8xf32, #tpu.memory_space<vmem>>, vector<32x4xf32>
    tpu.vector_store %arg18[%c224_150, %c4_151], %201 {strides = array<i32>} : memref<800x8xf32, #tpu.memory_space<vmem>>, vector<32x4xf32>,
    %203 = vector.extract_strided_slice %170 {offsets = [0, 32], sizes = [32, 4], strides = [1, 1]} : vector<64x100xf32> to vector<32x4xf32>
    %c256_152 = arith.constant 256 : index
    %c0_153 = arith.constant 0 : index
    %204 = vector.load %arg18[%c256_152, %c0_153] : memref<800x8xf32, #tpu.memory_space<vmem>>, vector<32x4xf32>
    tpu.vector_store %arg18[%c256_152, %c0_153], %203 {strides = array<i32>} : memref<800x8xf32, #tpu.memory_space<vmem>>, vector<32x4xf32>,
    %205 = vector.extract_strided_slice %170 {offsets = [32, 32], sizes = [32, 4], strides = [1, 1]} : vector<64x100xf32> to vector<32x4xf32>
    %c256_154 = arith.constant 256 : index
    %c4_155 = arith.constant 4 : index
    %206 = vector.load %arg18[%c256_154, %c4_155] : memref<800x8xf32, #tpu.memory_space<vmem>>, vector<32x4xf32>
    tpu.vector_store %arg18[%c256_154, %c4_155], %205 {strides = array<i32>} : memref<800x8xf32, #tpu.memory_space<vmem>>, vector<32x4xf32>,
    %207 = vector.extract_strided_slice %170 {offsets = [0, 36], sizes = [32, 4], strides = [1, 1]} : vector<64x100xf32> to vector<32x4xf32>
    %c288_156 = arith.constant 288 : index
    %c0_157 = arith.constant 0 : index
    %208 = vector.load %arg18[%c288_156, %c0_157] : memref<800x8xf32, #tpu.memory_space<vmem>>, vector<32x4xf32>
    tpu.vector_store %arg18[%c288_156, %c0_157], %207 {strides = array<i32>} : memref<800x8xf32, #tpu.memory_space<vmem>>, vector<32x4xf32>,
    %209 = vector.extract_strided_slice %170 {offsets = [32, 36], sizes = [32, 4], strides = [1, 1]} : vector<64x100xf32> to vector<32x4xf32>
    %c288_158 = arith.constant 288 : index
    %c4_159 = arith.constant 4 : index
    %210 = vector.load %arg18[%c288_158, %c4_159] : memref<800x8xf32, #tpu.memory_space<vmem>>, vector<32x4xf32>
    tpu.vector_store %arg18[%c288_158, %c4_159], %209 {strides = array<i32>} : memref<800x8xf32, #tpu.memory_space<vmem>>, vector<32x4xf32>,
    %211 = vector.extract_strided_slice %170 {offsets = [0, 40], sizes = [32, 4], strides = [1, 1]} : vector<64x100xf32> to vector<32x4xf32>
    %c320_160 = arith.constant 320 : index
    %c0_161 = arith.constant 0 : index
    %212 = vector.load %arg18[%c320_160, %c0_161] : memref<800x8xf32, #tpu.memory_space<vmem>>, vector<32x4xf32>
    tpu.vector_store %arg18[%c320_160, %c0_161], %211 {strides = array<i32>} : memref<800x8xf32, #tpu.memory_space<vmem>>, vector<32x4xf32>,
    %213 = vector.extract_strided_slice %170 {offsets = [32, 40], sizes = [32, 4], strides = [1, 1]} : vector<64x100xf32> to vector<32x4xf32>
    %c320_162 = arith.constant 320 : index
    %c4_163 = arith.constant 4 : index
    %214 = vector.load %arg18[%c320_162, %c4_163] : memref<800x8xf32, #tpu.memory_space<vmem>>, vector<32x4xf32>
    tpu.vector_store %arg18[%c320_162, %c4_163], %213 {strides = array<i32>} : memref<800x8xf32, #tpu.memory_space<vmem>>, vector<32x4xf32>,
    %215 = vector.extract_strided_slice %170 {offsets = [0, 44], sizes = [32, 4], strides = [1, 1]} : vector<64x100xf32> to vector<32x4xf32>
    %c352_164 = arith.constant 352 : index
    %c0_165 = arith.constant 0 : index
    %216 = vector.load %arg18[%c352_164, %c0_165] : memref<800x8xf32, #tpu.memory_space<vmem>>, vector<32x4xf32>
    tpu.vector_store %arg18[%c352_164, %c0_165], %215 {strides = array<i32>} : memref<800x8xf32, #tpu.memory_space<vmem>>, vector<32x4xf32>,
    %217 = vector.extract_strided_slice %170 {offsets = [32, 44], sizes = [32, 4], strides = [1, 1]} : vector<64x100xf32> to vector<32x4xf32>
    %c352_166 = arith.constant 352 : index
    %c4_167 = arith.constant 4 : index
    %218 = vector.load %arg18[%c352_166, %c4_167] : memref<800x8xf32, #tpu.memory_space<vmem>>, vector<32x4xf32>
    tpu.vector_store %arg18[%c352_166, %c4_167], %217 {strides = array<i32>} : memref<800x8xf32, #tpu.memory_space<vmem>>, vector<32x4xf32>,
    %219 = vector.extract_strided_slice %170 {offsets = [0, 48], sizes = [32, 4], strides = [1, 1]} : vector<64x100xf32> to vector<32x4xf32>
    %c384_168 = arith.constant 384 : index
    %c0_169 = arith.constant 0 : index
    %220 = vector.load %arg18[%c384_168, %c0_169] : memref<800x8xf32, #tpu.memory_space<vmem>>, vector<32x4xf32>
    tpu.vector_store %arg18[%c384_168, %c0_169], %219 {strides = array<i32>} : memref<800x8xf32, #tpu.memory_space<vmem>>, vector<32x4xf32>,
    %221 = vector.extract_strided_slice %170 {offsets = [32, 48], sizes = [32, 4], strides = [1, 1]} : vector<64x100xf32> to vector<32x4xf32>
    %c384_170 = arith.constant 384 : index
    %c4_171 = arith.constant 4 : index
    %222 = vector.load %arg18[%c384_170, %c4_171] : memref<800x8xf32, #tpu.memory_space<vmem>>, vector<32x4xf32>
    tpu.vector_store %arg18[%c384_170, %c4_171], %221 {strides = array<i32>} : memref<800x8xf32, #tpu.memory_space<vmem>>, vector<32x4xf32>,
    %223 = vector.extract_strided_slice %170 {offsets = [0, 52], sizes = [32, 4], strides = [1, 1]} : vector<64x100xf32> to vector<32x4xf32>
    %c416 = arith.constant 416 : index
    %c0_172 = arith.constant 0 : index
    %224 = vector.load %arg18[%c416, %c0_172] : memref<800x8xf32, #tpu.memory_space<vmem>>, vector<32x4xf32>
    tpu.vector_store %arg18[%c416, %c0_172], %223 {strides = array<i32>} : memref<800x8xf32, #tpu.memory_space<vmem>>, vector<32x4xf32>,
    %225 = vector.extract_strided_slice %170 {offsets = [32, 52], sizes = [32, 4], strides = [1, 1]} : vector<64x100xf32> to vector<32x4xf32>
    %c416_173 = arith.constant 416 : index
    %c4_174 = arith.constant 4 : index
    %226 = vector.load %arg18[%c416_173, %c4_174] : memref<800x8xf32, #tpu.memory_space<vmem>>, vector<32x4xf32>
    tpu.vector_store %arg18[%c416_173, %c4_174], %225 {strides = array<i32>} : memref<800x8xf32, #tpu.memory_space<vmem>>, vector<32x4xf32>,
    %227 = vector.extract_strided_slice %170 {offsets = [0, 56], sizes = [32, 4], strides = [1, 1]} : vector<64x100xf32> to vector<32x4xf32>
    %c448 = arith.constant 448 : index
    %c0_175 = arith.constant 0 : index
    %228 = vector.load %arg18[%c448, %c0_175] : memref<800x8xf32, #tpu.memory_space<vmem>>, vector<32x4xf32>
    tpu.vector_store %arg18[%c448, %c0_175], %227 {strides = array<i32>} : memref<800x8xf32, #tpu.memory_space<vmem>>, vector<32x4xf32>,
    %229 = vector.extract_strided_slice %170 {offsets = [32, 56], sizes = [32, 4], strides = [1, 1]} : vector<64x100xf32> to vector<32x4xf32>
    %c448_176 = arith.constant 448 : index
    %c4_177 = arith.constant 4 : index
    %230 = vector.load %arg18[%c448_176, %c4_177] : memref<800x8xf32, #tpu.memory_space<vmem>>, vector<32x4xf32>
    tpu.vector_store %arg18[%c448_176, %c4_177], %229 {strides = array<i32>} : memref<800x8xf32, #tpu.memory_space<vmem>>, vector<32x4xf32>,
    %231 = vector.extract_strided_slice %170 {offsets = [0, 60], sizes = [32, 4], strides = [1, 1]} : vector<64x100xf32> to vector<32x4xf32>
    %c480 = arith.constant 480 : index
    %c0_178 = arith.constant 0 : index
    %232 = vector.load %arg18[%c480, %c0_178] : memref<800x8xf32, #tpu.memory_space<vmem>>, vector<32x4xf32>
    tpu.vector_store %arg18[%c480, %c0_178], %231 {strides = array<i32>} : memref<800x8xf32, #tpu.memory_space<vmem>>, vector<32x4xf32>,
    %233 = vector.extract_strided_slice %170 {offsets = [32, 60], sizes = [32, 4], strides = [1, 1]} : vector<64x100xf32> to vector<32x4xf32>
    %c480_179 = arith.constant 480 : index
    %c4_180 = arith.constant 4 : index
    %234 = vector.load %arg18[%c480_179, %c4_180] : memref<800x8xf32, #tpu.memory_space<vmem>>, vector<32x4xf32>
    tpu.vector_store %arg18[%c480_179, %c4_180], %233 {strides = array<i32>} : memref<800x8xf32, #tpu.memory_space<vmem>>, vector<32x4xf32>,
    %235 = vector.extract_strided_slice %170 {offsets = [0, 64], sizes = [32, 4], strides = [1, 1]} : vector<64x100xf32> to vector<32x4xf32>
    %c512 = arith.constant 512 : index
    %c0_181 = arith.constant 0 : index
    %236 = vector.load %arg18[%c512, %c0_181] : memref<800x8xf32, #tpu.memory_space<vmem>>, vector<32x4xf32>
    tpu.vector_store %arg18[%c512, %c0_181], %235 {strides = array<i32>} : memref<800x8xf32, #tpu.memory_space<vmem>>, vector<32x4xf32>,
    %237 = vector.extract_strided_slice %170 {offsets = [32, 64], sizes = [32, 4], strides = [1, 1]} : vector<64x100xf32> to vector<32x4xf32>
    %c512_182 = arith.constant 512 : index
    %c4_183 = arith.constant 4 : index
    %238 = vector.load %arg18[%c512_182, %c4_183] : memref<800x8xf32, #tpu.memory_space<vmem>>, vector<32x4xf32>
    tpu.vector_store %arg18[%c512_182, %c4_183], %237 {strides = array<i32>} : memref<800x8xf32, #tpu.memory_space<vmem>>, vector<32x4xf32>,
    %239 = vector.extract_strided_slice %170 {offsets = [0, 68], sizes = [32, 4], strides = [1, 1]} : vector<64x100xf32> to vector<32x4xf32>
    %c544 = arith.constant 544 : index
    %c0_184 = arith.constant 0 : index
    %240 = vector.load %arg18[%c544, %c0_184] : memref<800x8xf32, #tpu.memory_space<vmem>>, vector<32x4xf32>
    tpu.vector_store %arg18[%c544, %c0_184], %239 {strides = array<i32>} : memref<800x8xf32, #tpu.memory_space<vmem>>, vector<32x4xf32>,
    %241 = vector.extract_strided_slice %170 {offsets = [32, 68], sizes = [32, 4], strides = [1, 1]} : vector<64x100xf32> to vector<32x4xf32>
    %c544_185 = arith.constant 544 : index
    %c4_186 = arith.constant 4 : index
    %242 = vector.load %arg18[%c544_185, %c4_186] : memref<800x8xf32, #tpu.memory_space<vmem>>, vector<32x4xf32>
    tpu.vector_store %arg18[%c544_185, %c4_186], %241 {strides = array<i32>} : memref<800x8xf32, #tpu.memory_space<vmem>>, vector<32x4xf32>,
    %243 = vector.extract_strided_slice %170 {offsets = [0, 72], sizes = [32, 4], strides = [1, 1]} : vector<64x100xf32> to vector<32x4xf32>
    %c576 = arith.constant 576 : index
    %c0_187 = arith.constant 0 : index
    %244 = vector.load %arg18[%c576, %c0_187] : memref<800x8xf32, #tpu.memory_space<vmem>>, vector<32x4xf32>
    tpu.vector_store %arg18[%c576, %c0_187], %243 {strides = array<i32>} : memref<800x8xf32, #tpu.memory_space<vmem>>, vector<32x4xf32>,
    %245 = vector.extract_strided_slice %170 {offsets = [32, 72], sizes = [32, 4], strides = [1, 1]} : vector<64x100xf32> to vector<32x4xf32>
    %c576_188 = arith.constant 576 : index
    %c4_189 = arith.constant 4 : index
    %246 = vector.load %arg18[%c576_188, %c4_189] : memref<800x8xf32, #tpu.memory_space<vmem>>, vector<32x4xf32>
    tpu.vector_store %arg18[%c576_188, %c4_189], %245 {strides = array<i32>} : memref<800x8xf32, #tpu.memory_space<vmem>>, vector<32x4xf32>,
    %247 = vector.extract_strided_slice %170 {offsets = [0, 76], sizes = [32, 4], strides = [1, 1]} : vector<64x100xf32> to vector<32x4xf32>
    %c608 = arith.constant 608 : index
    %c0_190 = arith.constant 0 : index
    %248 = vector.load %arg18[%c608, %c0_190] : memref<800x8xf32, #tpu.memory_space<vmem>>, vector<32x4xf32>
    tpu.vector_store %arg18[%c608, %c0_190], %247 {strides = array<i32>} : memref<800x8xf32, #tpu.memory_space<vmem>>, vector<32x4xf32>,
    %249 = vector.extract_strided_slice %170 {offsets = [32, 76], sizes = [32, 4], strides = [1, 1]} : vector<64x100xf32> to vector<32x4xf32>
    %c608_191 = arith.constant 608 : index
    %c4_192 = arith.constant 4 : index
    %250 = vector.load %arg18[%c608_191, %c4_192] : memref<800x8xf32, #tpu.memory_space<vmem>>, vector<32x4xf32>
    tpu.vector_store %arg18[%c608_191, %c4_192], %249 {strides = array<i32>} : memref<800x8xf32, #tpu.memory_space<vmem>>, vector<32x4xf32>,
    %251 = vector.extract_strided_slice %170 {offsets = [0, 80], sizes = [32, 4], strides = [1, 1]} : vector<64x100xf32> to vector<32x4xf32>
    %c640 = arith.constant 640 : index
    %c0_193 = arith.constant 0 : index
    %252 = vector.load %arg18[%c640, %c0_193] : memref<800x8xf32, #tpu.memory_space<vmem>>, vector<32x4xf32>
    tpu.vector_store %arg18[%c640, %c0_193], %251 {strides = array<i32>} : memref<800x8xf32, #tpu.memory_space<vmem>>, vector<32x4xf32>,
    %253 = vector.extract_strided_slice %170 {offsets = [32, 80], sizes = [32, 4], strides = [1, 1]} : vector<64x100xf32> to vector<32x4xf32>
    %c640_194 = arith.constant 640 : index
    %c4_195 = arith.constant 4 : index
    %254 = vector.load %arg18[%c640_194, %c4_195] : memref<800x8xf32, #tpu.memory_space<vmem>>, vector<32x4xf32>
    tpu.vector_store %arg18[%c640_194, %c4_195], %253 {strides = array<i32>} : memref<800x8xf32, #tpu.memory_space<vmem>>, vector<32x4xf32>,
    %255 = vector.extract_strided_slice %170 {offsets = [0, 84], sizes = [32, 4], strides = [1, 1]} : vector<64x100xf32> to vector<32x4xf32>
    %c672 = arith.constant 672 : index
    %c0_196 = arith.constant 0 : index
    %256 = vector.load %arg18[%c672, %c0_196] : memref<800x8xf32, #tpu.memory_space<vmem>>, vector<32x4xf32>
    tpu.vector_store %arg18[%c672, %c0_196], %255 {strides = array<i32>} : memref<800x8xf32, #tpu.memory_space<vmem>>, vector<32x4xf32>,
    %257 = vector.extract_strided_slice %170 {offsets = [32, 84], sizes = [32, 4], strides = [1, 1]} : vector<64x100xf32> to vector<32x4xf32>
    %c672_197 = arith.constant 672 : index
    %c4_198 = arith.constant 4 : index
    %258 = vector.load %arg18[%c672_197, %c4_198] : memref<800x8xf32, #tpu.memory_space<vmem>>, vector<32x4xf32>
    tpu.vector_store %arg18[%c672_197, %c4_198], %257 {strides = array<i32>} : memref<800x8xf32, #tpu.memory_space<vmem>>, vector<32x4xf32>,
    %259 = vector.extract_strided_slice %170 {offsets = [0, 88], sizes = [32, 4], strides = [1, 1]} : vector<64x100xf32> to vector<32x4xf32>
    %c704 = arith.constant 704 : index
    %c0_199 = arith.constant 0 : index
    %260 = vector.load %arg18[%c704, %c0_199] : memref<800x8xf32, #tpu.memory_space<vmem>>, vector<32x4xf32>
    tpu.vector_store %arg18[%c704, %c0_199], %259 {strides = array<i32>} : memref<800x8xf32, #tpu.memory_space<vmem>>, vector<32x4xf32>,
    %261 = vector.extract_strided_slice %170 {offsets = [32, 88], sizes = [32, 4], strides = [1, 1]} : vector<64x100xf32> to vector<32x4xf32>
    %c704_200 = arith.constant 704 : index
    %c4_201 = arith.constant 4 : index
    %262 = vector.load %arg18[%c704_200, %c4_201] : memref<800x8xf32, #tpu.memory_space<vmem>>, vector<32x4xf32>
    tpu.vector_store %arg18[%c704_200, %c4_201], %261 {strides = array<i32>} : memref<800x8xf32, #tpu.memory_space<vmem>>, vector<32x4xf32>,
    %263 = vector.extract_strided_slice %170 {offsets = [0, 92], sizes = [32, 4], strides = [1, 1]} : vector<64x100xf32> to vector<32x4xf32>
    %c736 = arith.constant 736 : index
    %c0_202 = arith.constant 0 : index
    %264 = vector.load %arg18[%c736, %c0_202] : memref<800x8xf32, #tpu.memory_space<vmem>>, vector<32x4xf32>
    tpu.vector_store %arg18[%c736, %c0_202], %263 {strides = array<i32>} : memref<800x8xf32, #tpu.memory_space<vmem>>, vector<32x4xf32>,
    %265 = vector.extract_strided_slice %170 {offsets = [32, 92], sizes = [32, 4], strides = [1, 1]} : vector<64x100xf32> to vector<32x4xf32>
    %c736_203 = arith.constant 736 : index
    %c4_204 = arith.constant 4 : index
    %266 = vector.load %arg18[%c736_203, %c4_204] : memref<800x8xf32, #tpu.memory_space<vmem>>, vector<32x4xf32>
    tpu.vector_store %arg18[%c736_203, %c4_204], %265 {strides = array<i32>} : memref<800x8xf32, #tpu.memory_space<vmem>>, vector<32x4xf32>,
    %267 = vector.extract_strided_slice %170 {offsets = [0, 96], sizes = [32, 4], strides = [1, 1]} : vector<64x100xf32> to vector<32x4xf32>
    %c768 = arith.constant 768 : index
    %c0_205 = arith.constant 0 : index
    %268 = vector.load %arg18[%c768, %c0_205] : memref<800x8xf32, #tpu.memory_space<vmem>>, vector<32x4xf32>
    tpu.vector_store %arg18[%c768, %c0_205], %267 {strides = array<i32>} : memref<800x8xf32, #tpu.memory_space<vmem>>, vector<32x4xf32>,
    %269 = vector.extract_strided_slice %170 {offsets = [32, 96], sizes = [32, 4], strides = [1, 1]} : vector<64x100xf32> to vector<32x4xf32>
    %c768_206 = arith.constant 768 : index
    %c4_207 = arith.constant 4 : index
    %270 = vector.load %arg18[%c768_206, %c4_207] : memref<800x8xf32, #tpu.memory_space<vmem>>, vector<32x4xf32>
    tpu.vector_store %arg18[%c768_206, %c4_207], %269 {strides = array<i32>} : memref<800x8xf32, #tpu.memory_space<vmem>>, vector<32x4xf32>,
    %c0_208 = arith.constant 0 : index
    %c0_209 = arith.constant 0 : index
    %271 = vector.load %arg9[%c0_208, %c0_209] : memref<32x800xbf16, #tpu.memory_space<vmem>>, vector<32x800xbf16>
    %c0_210 = arith.constant 0 : index
    %c0_211 = arith.constant 0 : index
    %272 = vector.load %arg18[%c0_210, %c0_211] : memref<800x8xf32, #tpu.memory_space<vmem>>, vector<800x8xf32>
    %273 = arith.truncf %272 : vector<800x8xf32> to vector<800x8xbf16>
    %cst_212 = arith.constant dense<0.000000e+00> : vector<32x8xf32>
    %274 = tpu.matmul %271, %273, %cst_212 {dimension_numbers = #tpu.dot_dimension_numbers<[1], [0], [0], [1], [0, 0, 1, 1], [], []>} : vector<32x800xbf16>, vector<800x8xbf16>, vector<32x8xf32> -> vector<32x8xf32>
    %c0_213 = arith.constant 0 : index
    %c0_214 = arith.constant 0 : index
    %275 = vector.load %arg10[%c0_213, %c0_214] : memref<32x1xf32, #tpu.memory_space<vmem>>, vector<32x1xf32>
    %c0_215 = arith.constant 0 : index
    %c0_216 = arith.constant 0 : index
    %276 = vector.load %arg11[%c0_215, %c0_216] : memref<32x1xf32, #tpu.memory_space<vmem>>, vector<32x1xf32>
    %cst_217 = arith.constant dense<0.000000e+00> : vector<32xf32>
    %277 = vector.multi_reduction <add>, %274, %cst_217 [1] : vector<32x8xf32> to vector<32xf32>
    %278 = vector.shape_cast %277 : vector<32xf32> to vector<32x1xf32>
    %cst_218 = arith.constant 1.250000e-01 : f32
    %279 = vector.broadcast %cst_218 : f32 to vector<32x1xf32>
    %280 = arith.mulf %278, %279 : vector<32x1xf32>
    %281 = vector.broadcast %280 : vector<32x1xf32> to vector<32x8xf32>
    %282 = arith.subf %274, %281 : vector<32x8xf32>
    %283 = arith.mulf %282, %282 : vector<32x8xf32>
    %cst_219 = arith.constant dense<0.000000e+00> : vector<32xf32>
    %284 = vector.multi_reduction <add>, %283, %cst_219 [1] : vector<32x8xf32> to vector<32xf32>
    %285 = vector.shape_cast %284 : vector<32xf32> to vector<32x1xf32>
    %cst_220 = arith.constant 1.250000e-01 : f32
    %286 = vector.broadcast %cst_220 : f32 to vector<32x1xf32>
    %287 = arith.mulf %285, %286 : vector<32x1xf32>
    %cst_221 = arith.constant 9.99999974E-6 : f32
    %288 = vector.broadcast %cst_221 : f32 to vector<32x1xf32>
    %289 = arith.addf %287, %288 : vector<32x1xf32>
    %290 = math.rsqrt %289 : vector<32x1xf32>
    %291 = arith.mulf %275, %290 : vector<32x1xf32>
    %292 = vector.broadcast %291 : vector<32x1xf32> to vector<32x8xf32>
    %293 = arith.mulf %282, %292 : vector<32x8xf32>
    %294 = vector.broadcast %276 : vector<32x1xf32> to vector<32x8xf32>
    %295 = arith.addf %293, %294 : vector<32x8xf32>
    %cst_222 = arith.constant 0.000000e+00 : f32
    %296 = vector.broadcast %cst_222 : f32 to vector<32x8xf32>
    %297 = arith.maximumf %295, %296 : vector<32x8xf32>
    %298 = vector.extract_strided_slice %297 {offsets = [0, 0], sizes = [32, 4], strides = [1, 1]} : vector<32x8xf32> to vector<32x4xf32>
    %299 = arith.truncf %298 : vector<32x4xf32> to vector<32x4xbf16>
    %c0_223 = arith.constant 0 : index
    %c0_224 = arith.constant 0 : index
    %300 = vector.load %arg19[%c0_223, %c0_224] : memref<64x4xbf16, #tpu.memory_space<vmem>>, vector<32x4xbf16>
    tpu.vector_store %arg19[%c0_223, %c0_224], %299 {strides = array<i32>} : memref<64x4xbf16, #tpu.memory_space<vmem>>, vector<32x4xbf16>,
    %301 = vector.extract_strided_slice %297 {offsets = [0, 4], sizes = [32, 4], strides = [1, 1]} : vector<32x8xf32> to vector<32x4xf32>
    %302 = arith.truncf %301 : vector<32x4xf32> to vector<32x4xbf16>
    %c32_225 = arith.constant 32 : index
    %c0_226 = arith.constant 0 : index
    %303 = vector.load %arg19[%c32_225, %c0_226] : memref<64x4xbf16, #tpu.memory_space<vmem>>, vector<32x4xbf16>
    tpu.vector_store %arg19[%c32_225, %c0_226], %302 {strides = array<i32>} : memref<64x4xbf16, #tpu.memory_space<vmem>>, vector<32x4xbf16>,
    %c0_227 = arith.constant 0 : index
    %c0_228 = arith.constant 0 : index
    %304 = vector.load %arg19[%c0_227, %c0_228] : memref<64x4xbf16, #tpu.memory_space<vmem>>, vector<64x4xbf16>
    %305 = vector.extract_strided_slice %304 {offsets = [0, 0], sizes = [32, 1], strides = [1, 1]} : vector<64x4xbf16> to vector<32x1xbf16>
    %c0_229 = arith.constant 0 : index
    %c0_230 = arith.constant 0 : index
    %306 = vector.load %arg20[%c0_229, %c0_230] : memref<128x2xbf16, #tpu.memory_space<vmem>>, vector<32x1xbf16>
    tpu.vector_store %arg20[%c0_229, %c0_230], %305 {strides = array<i32>} : memref<128x2xbf16, #tpu.memory_space<vmem>>, vector<32x1xbf16>,
    %307 = vector.extract_strided_slice %304 {offsets = [32, 0], sizes = [32, 1], strides = [1, 1]} : vector<64x4xbf16> to vector<32x1xbf16>
    %c0_231 = arith.constant 0 : index
    %c1 = arith.constant 1 : index
    %308 = vector.load %arg20[%c0_231, %c1] : memref<128x2xbf16, #tpu.memory_space<vmem>>, vector<32x1xbf16>
    tpu.vector_store %arg20[%c0_231, %c1], %307 {strides = array<i32>} : memref<128x2xbf16, #tpu.memory_space<vmem>>, vector<32x1xbf16>,
    %309 = vector.extract_strided_slice %304 {offsets = [0, 1], sizes = [32, 1], strides = [1, 1]} : vector<64x4xbf16> to vector<32x1xbf16>
    %c32_232 = arith.constant 32 : index
    %c0_233 = arith.constant 0 : index
    %310 = vector.load %arg20[%c32_232, %c0_233] : memref<128x2xbf16, #tpu.memory_space<vmem>>, vector<32x1xbf16>
    tpu.vector_store %arg20[%c32_232, %c0_233], %309 {strides = array<i32>} : memref<128x2xbf16, #tpu.memory_space<vmem>>, vector<32x1xbf16>,
    %311 = vector.extract_strided_slice %304 {offsets = [32, 1], sizes = [32, 1], strides = [1, 1]} : vector<64x4xbf16> to vector<32x1xbf16>
    %c32_234 = arith.constant 32 : index
    %c1_235 = arith.constant 1 : index
    %312 = vector.load %arg20[%c32_234, %c1_235] : memref<128x2xbf16, #tpu.memory_space<vmem>>, vector<32x1xbf16>
    tpu.vector_store %arg20[%c32_234, %c1_235], %311 {strides = array<i32>} : memref<128x2xbf16, #tpu.memory_space<vmem>>, vector<32x1xbf16>,
    %313 = vector.extract_strided_slice %304 {offsets = [0, 2], sizes = [32, 1], strides = [1, 1]} : vector<64x4xbf16> to vector<32x1xbf16>
    %c64_236 = arith.constant 64 : index
    %c0_237 = arith.constant 0 : index
    %314 = vector.load %arg20[%c64_236, %c0_237] : memref<128x2xbf16, #tpu.memory_space<vmem>>, vector<32x1xbf16>
    tpu.vector_store %arg20[%c64_236, %c0_237], %313 {strides = array<i32>} : memref<128x2xbf16, #tpu.memory_space<vmem>>, vector<32x1xbf16>,
    %315 = vector.extract_strided_slice %304 {offsets = [32, 2], sizes = [32, 1], strides = [1, 1]} : vector<64x4xbf16> to vector<32x1xbf16>
    %c64_238 = arith.constant 64 : index
    %c1_239 = arith.constant 1 : index
    %316 = vector.load %arg20[%c64_238, %c1_239] : memref<128x2xbf16, #tpu.memory_space<vmem>>, vector<32x1xbf16>
    tpu.vector_store %arg20[%c64_238, %c1_239], %315 {strides = array<i32>} : memref<128x2xbf16, #tpu.memory_space<vmem>>, vector<32x1xbf16>,
    %317 = vector.extract_strided_slice %304 {offsets = [0, 3], sizes = [32, 1], strides = [1, 1]} : vector<64x4xbf16> to vector<32x1xbf16>
    %c96_240 = arith.constant 96 : index
    %c0_241 = arith.constant 0 : index
    %318 = vector.load %arg20[%c96_240, %c0_241] : memref<128x2xbf16, #tpu.memory_space<vmem>>, vector<32x1xbf16>
    tpu.vector_store %arg20[%c96_240, %c0_241], %317 {strides = array<i32>} : memref<128x2xbf16, #tpu.memory_space<vmem>>, vector<32x1xbf16>,
    %319 = vector.extract_strided_slice %304 {offsets = [32, 3], sizes = [32, 1], strides = [1, 1]} : vector<64x4xbf16> to vector<32x1xbf16>
    %c96_242 = arith.constant 96 : index
    %c1_243 = arith.constant 1 : index
    %320 = vector.load %arg20[%c96_242, %c1_243] : memref<128x2xbf16, #tpu.memory_space<vmem>>, vector<32x1xbf16>
    tpu.vector_store %arg20[%c96_242, %c1_243], %319 {strides = array<i32>} : memref<128x2xbf16, #tpu.memory_space<vmem>>, vector<32x1xbf16>,
    %c0_244 = arith.constant 0 : index
    %c0_245 = arith.constant 0 : index
    %321 = vector.load %arg12[%c0_244, %c0_245] : memref<6x128xbf16, #tpu.memory_space<vmem>>, vector<6x128xbf16>
    %c0_246 = arith.constant 0 : index
    %c0_247 = arith.constant 0 : index
    %322 = vector.load %arg20[%c0_246, %c0_247] : memref<128x2xbf16, #tpu.memory_space<vmem>>, vector<128x2xbf16>
    %cst_248 = arith.constant dense<0.000000e+00> : vector<6x2xf32>
    %323 = tpu.matmul %321, %322, %cst_248 {dimension_numbers = #tpu.dot_dimension_numbers<[1], [0], [0], [1], [0, 0, 1, 1], [], []>} : vector<6x128xbf16>, vector<128x2xbf16>, vector<6x2xf32> -> vector<6x2xf32>
    %c0_249 = arith.constant 0 : index
    %c0_250 = arith.constant 0 : index
    %324 = vector.load %arg13[%c0_249, %c0_250] : memref<6x1xf32, #tpu.memory_space<vmem>>, vector<6x1xf32>
    %325 = vector.broadcast %324 : vector<6x1xf32> to vector<6x2xf32>
    %326 = arith.addf %323, %325 : vector<6x2xf32>
    %c0_251 = arith.constant 0 : index
    %c0_252 = arith.constant 0 : index
    %327 = vector.load %arg14[%c0_251, %c0_252] : memref<6x2xf32, #tpu.memory_space<vmem>>, vector<6x2xf32>
    tpu.vector_store %arg14[%c0_251, %c0_252], %326 {strides = array<i32>} : memref<6x2xf32, #tpu.memory_space<vmem>>, vector<6x2xf32>,
    return
  }
}

</mosaic_0001>

<bundles_post_ra>
// kernel: dqn2_forward.1
= control target key start
LH: loop header
LB: loop body
LE: loop exit
PB: predicated region body
PF: predicated region fallthrough
CT: control target
= control target key end

     0   :  { %v5802_v1 = vmov 0   ;;  %vm235_vm0 = vcmask 654336   ;;  %vm376_vm1 = vcmask 64512   ;;  %vm500_vm2 = vcmask 556032   ;;  %s5803_s25 = smov 60   ;;  %s5805_s29 = smov 79   ;;  %s8114_s0 = inlined_call_operand.vmem [shape: bf16[80,648], index: 0, kind: input, shape index: {}]   ;;  %s8115_s1 = inlined_call_operand.vmem [shape: bf16[16,80], index: 1, kind: input, shape index: {}]   ;;  %s8116_s3 = inlined_call_operand.vmem [shape: f32[16,1], index: 3, kind: input, shape index: {}]   ;;  %s8117_s4 = inlined_call_operand.vmem [shape: bf16[324,1225], index: 4, kind: input, shape index: {}]   ;;  %s8118_s2 = inlined_call_operand.vmem [shape: f32[16,1], index: 2, kind: input, shape index: {}]   ;;  %s8119_s5 = inlined_call_operand.vmem [shape: bf16[32,400], index: 5, kind: input, shape index: {}]   ;;  %s8120_s7 = inlined_call_operand.vmem [shape: f32[32,1], index: 7, kind: input, shape index: {}]   ;;  %s8121_s6 = inlined_call_operand.vmem [shape: f32[32,1], index: 6, kind: input, shape index: {}]   ;;  %s8122_s8 = inlined_call_operand.vmem [shape: bf16[49,100], index: 8, kind: input, shape index: {}]   ;;  %s8123_s9 = inlined_call_operand.vmem [shape: bf16[32,800], index: 9, kind: input, shape index: {}]   ;;  %s8124_s11 = inlined_call_operand.vmem [shape: f32[32,1], index: 11, kind: input, shape index: {}]   ;;  %s8125_s10 = inlined_call_operand.vmem [shape: f32[32,1], index: 10, kind: input, shape index: {}]   ;;  %s8126_s13 = inlined_call_operand.vmem [shape: f32[6,1], index: 13, kind: input, shape index: {}]   ;;  %s8127_s12 = inlined_call_operand.vmem [shape: bf16[6,128], index: 12, kind: input, shape index: {}]   ;;  %s8128_s14 = inlined_call_operand.vmem [shape: f32[6,2], index: 14, kind: output, shape index: {}]  }
   0x1   :  { %v5391_v0 = vld [vmem:[%s8114_s0 + $0x4] ss:$24 sps:$4 sm:$0xff]   ;;  %271 = vmatprep.mubr.bf16.mxu0 %v5802_v1  ;;  %314 = vmatprep.mubr.bf16.mxu1 %v5802_v1  ;;  %v5393_v2 = vld [vmem:[%s8114_s0] ss:$24 sps:$4 sm:$0xff]   ;;  %v5396_v4 = vld [vmem:[%s8114_s0 + $0x34] ss:$24 sps:$4 sm:$0xff]  }
   0x2   :  { %5390 = vset.pattern.permute.xlu1 %v5802_v1  ;;  %5389 = vset.pattern.permute.xlu0 %v5802_v1  ;;  %v5394_v3 = vld [vmem:[%s8114_s0 + $0xc] ss:$24 sps:$4 sm:$0xff]   ;;  %v5398_v5 = vld [vmem:[%s8114_s0 + $0x8] ss:$24 sps:$4 sm:$0xff]   ;;  %v5400_v7 = vld [vmem:[%s8114_s0 + $0x3c] ss:$24 sps:$4 sm:$0xff]  }
   0x3   :  { %239 = vmatprep.subr.bf16.mxu0 %v5391_v0  ;;  %v5399_v6 = vld [vmem:[%s8114_s0 + $0x30] ss:$24 sps:$4 sm:$0xff]   ;;  %282 = vmatprep.subr.bf16.mxu1 %v5394_v3  ;;  %v5402_v8 = vld [vmem:[%s8114_s0 + $0x64] ss:$24 sps:$4 sm:$0xff]   ;;  %v5405_v10 = vld [vmem:[%s8114_s0 + $0x60] ss:$24 sps:$4 sm:$0xff]  }
   0x4   :  { %240 = vmatpush1.bf16.msra.mxu0 %v5393_v2  ;;  %283 = vmatpush1.bf16.msra.mxu1 %v5398_v5  ;;  %v5404_v9 = vld [vmem:[%s8114_s0 + $0x38] ss:$24 sps:$4 sm:$0xff]   ;;  %v5406_v11 = vld [vmem:[%s8114_s0 + $0x6c] ss:$24 sps:$4 sm:$0xff]   ;;  %v5410_v13 = vld [vmem:[%s8114_s0 + $0x68] ss:$24 sps:$4 sm:$0xff]  }
   0x5   :  { %241 = vmatprep.subr.bf16.mxu0 %v5396_v4  ;;  %284 = vmatprep.subr.bf16.mxu1 %v5400_v7  ;;  %v5408_v12 = vld [vmem:[%s8114_s0 + $0x94] ss:$24 sps:$4 sm:$0xff]   ;;  %v5411_v15 = vld [vmem:[%s8114_s0 + $0x90] ss:$24 sps:$4 sm:$0xff]   ;;  %v5414_v16 = vld [vmem:[%s8114_s0 + $0xc4] ss:$24 sps:$4 sm:$0xff]  }
   0x6   :  { %v5412_v14 = vld [vmem:[%s8114_s0 + $0x9c] ss:$24 sps:$4 sm:$0xff]   ;;  %v5416_v17 = vld [vmem:[%s8114_s0 + $0x98] ss:$24 sps:$4 sm:$0xff]   ;;  %v5418_v18 = vld [vmem:[%s8114_s0 + $0xcc] ss:$24 sps:$4 sm:$0xff]  }
   0x7   :  { %v5417_v19 = vld [vmem:[%s8114_s0 + $0xc0] ss:$24 sps:$4 sm:$0xff]   ;;  %v5424_v20 = vld [vmem:[%s8114_s0 + $0x14] ss:$24 sps:$4 sm:$0xff]   ;;  %v5422_v23 = vld [vmem:[%s8114_s0 + $0x10] ss:$24 sps:$4 sm:$0xff]  }
   0x8   :  { %242 = vmatpush1.bf16.msra.mxu0 %v5399_v6  ;;  %285 = vmatpush1.bf16.msra.mxu1 %v5404_v9  ;;  %v5421_v21 = vld [vmem:[%s8114_s0 + $0xc8] ss:$24 sps:$4 sm:$0xff]   ;;  %v5427_v24 = vld [vmem:[%s8114_s0 + $0x44] ss:$24 sps:$4 sm:$0xff]   ;;  %v5430_v26 = vld [vmem:[%s8114_s0 + $0x74] ss:$24 sps:$4 sm:$0xff]  }
   0x9   :  { %243 = vmatprep.subr.bf16.mxu0 %v5402_v8  ;;  %286 = vmatprep.subr.bf16.mxu1 %v5406_v11  ;;  %v5420_v22 = vld [vmem:[%s8115_s1] sm:$0xff]   ;;  %v5428_v27 = vld [vmem:[%s8114_s0 + $0x70] ss:$24 sps:$4 sm:$0xff]   ;;  %v5436_v30 = vld [vmem:[%s8114_s0 + $0xd4] ss:$24 sps:$4 sm:$0xff]   ;;  %vm1769_vm3 = vcmask 1041408  }
   0xa   :  { %v5425_v25 = vld [vmem:[%s8114_s0 + $0x40] ss:$24 sps:$4 sm:$0xff]   ;;  %v5433_v28 = vld [vmem:[%s8114_s0 + $0xa4] ss:$24 sps:$4 sm:$0xff]   ;;  %v5434_v31 = vld [vmem:[%s8114_s0 + $0xd0] ss:$24 sps:$4 sm:$0xff]  }
   0xb   :  { %v5431_v29 = vld [vmem:[%s8114_s0 + $0xa0] ss:$24 sps:$4 sm:$0xff]   ;;  %vm517_vm4 = vcmask 490496   ;;  %vm2330_vm5 = vcmask 400384   ;;  %s5806_s30 = smov 30   ;;  %s5807_s1 = smov 90  }
   0xc   :  { %244 = vmatpush1.bf16.msra.mxu0 %v5405_v10  ;;  %287 = vmatpush1.bf16.msra.mxu1 %v5410_v13  ;;  %s5808_s15 = smov 41   ;;  %s5809_s16 = smov 120   ;;  %vm2341_vm6 = vcmask 802184   ;;  %vm2366_vm7 = vcmask 244736   ;;  %vm2482_vm8 = vcmask 334848   ;;  %vm2432_vm9 = vcmask 89088  }
   0xd   :  { %245 = vmatprep.subr.bf16.mxu0 %v5408_v12  ;;  %288 = vmatprep.subr.bf16.mxu1 %v5412_v14  ;;  %s5810_s17 = smov 71   ;;  %s5811_s18 = smov 22   ;;  %vm2383_vm10 = vcmask 646144   ;;  %vm2499_vm11 = vcmask 736256   ;;  %vm2548_vm12 = vcmask 179200   ;;  %vm2614_vm13 = vcmask 23552  }
   0xe   :  { %s5812_s19 = smov 109   ;;  %s5813_s20 = smov 49   ;;  %vm2730_vm14 = vcmask 113664   ;;  %vm2664_vm15 = vcmask 269312  }
   0xf   :  { %s5814_s21 = smov 33   ;;  %s5815_s22 = smov 3  }
  0x10   :  { %246 = vmatpush1.bf16.msra.mxu0 %v5411_v15  ;;  %289 = vmatpush1.bf16.msra.mxu1 %v5416_v17  ;;  %s5816_s23 = smov 14   ;;  %s5817_s24 = smov 101  }
  0x11   :  { %247 = vmatprep.subr.bf16.mxu0 %v5414_v16  ;;  %290 = vmatprep.subr.bf16.mxu1 %v5418_v18  ;;  %s5818_s0 = smov 52   ;;  %s5820_s26 = smov 63  }
  0x12   :  { %s5821_s27 = smov 82   ;;  %s5822_s28 = smov 93  }
  0x14   :  { %248 = vmatpush1.bf16.msra.mxu0 %v5417_v19  ;;  %291 = vmatpush1.bf16.msra.mxu1 %v5421_v21 }
  0x15   :  { %325 = vmatprep.subr.bf16.mxu0 %v5424_v20 }
  0x17   :  { %4859 = vmatmul.mubr.msk.bf16.vlgmr.msra.gmra.mrb[0].mxu0 %vm235_vm0, %v5420_v22  ;;  %4860 = vmatmul.mubr.msk.bf16.vlgmr.msra.gmra.mrb[0].mxu1 %vm235_vm0, %v5420_v22 }
  0x18   :  { %326 = vmatpush1.bf16.msra.mxu0 %v5422_v23  ;;  %357 = vmatprep.mubr.bf16.mxu0 %v5802_v1 }
  0x19   :  { %327 = vmatprep.subr.bf16.mxu0 %v5427_v24 }
  0x1c   :  { %328 = vmatpush1.bf16.msra.mxu0 %v5425_v25 }
  0x1d   :  { %329 = vmatprep.subr.bf16.mxu0 %v5430_v26 }
  0x20   :  { %330 = vmatpush1.bf16.msra.mxu0 %v5428_v27 }
  0x21   :  { %331 = vmatprep.subr.bf16.mxu0 %v5433_v28 }
  0x24   :  { %332 = vmatpush1.bf16.msra.mxu0 %v5431_v29 }
  0x25   :  { %333 = vmatprep.subr.bf16.mxu0 %v5436_v30 }
  0x28   :  { %334 = vmatpush1.bf16.msra.mxu0 %v5434_v31 }
  0x2b   :  { %4861 = vmatmul.mubr.msk.bf16.vlgmr.msra.gmra.mrb[4].mxu0 %vm235_vm0, %v5420_v22  ;;  %vm2565_vm0 = vcmask 580608  }
  0xea   :  { %v273_v32 = vpop.f32.mrb[0].mxu0  ;;  %v316_v36 = vpop.f32.mrb[0].mxu1 }
  0xeb   :  { %v275_v33 = vpop.f32.mrb[1].mxu0  ;;  %v318_v38 = vpop.f32.mrb[1].mxu1 }
  0xec   :  { %v372_v34 = vadd.f32 %v275_v33, %v273_v32  ;;  %v277_v35 = vpop.f32.mrb[2].mxu0  ;;  %v320_v41 = vpop.f32.mrb[2].mxu1 }
  0xed   :  { %v279_v37 = vpop.f32.mrb[3].mxu0  ;;  %v322_v42 = vpop.f32.mrb[3].mxu1 }
  0xee   :  { %v381_v39 = vadd.f32 %v279_v37, %v277_v35  ;;  %v373_v40 = vadd.f32 %v372_v34, %v316_v36  ;;  %v5437_v34 = vld [vmem:[%s8117_s4] ss:$40 sps:$4 sm:$0xff]  }
  0xf0   :  { %v374_v43 = vadd.f32 %v373_v40, %v318_v38  ;;  %v382_v44 = vadd.f32 %v381_v39, %v320_v41  ;;  %v5445_v39 = vld [vmem:[%s8117_s4 + $0x54] ss:$40 sps:$4 sm:$0xff]   ;;  %v5446_v40 = vld [vmem:[%s8117_s4 + $0x58] ss:$40 sps:$4 sm:$0xff]  }
  0xf2   :  { %v383_v45 = vadd.f32 %v382_v44, %v322_v42  ;;  %v5454_v44 = vld [vmem:[%s8117_s4 + $0xac] ss:$40 sps:$4 sm:$0xff]  }
  0xfe   :  { %v359_v46 = vpop.f32.mrb[4].mxu0 }
  0xff   :  { %v375_v47 = vadd.f32 %v374_v43, %v359_v46  ;;  %v361_v48 = vpop.f32.mrb[5].mxu0  ;;  %v5449_v43 = vld [vmem:[%s8117_s4 + $0xa0] ss:$40 sps:$4 sm:$0xff]  }
 0x100   :  { %v363_v49 = vpop.f32.mrb[6].mxu0  ;;  %v377_v50 = vsel %vm376_vm1, %v361_v48, 0.0 }
 0x101   :  { %v384_v51 = vadd.f32 %v383_v45, %v363_v49  ;;  %v365_v52 = vpop.f32.mrb[7].mxu0  ;;  %v378_v53 = vadd.f32 %v377_v50, %v375_v47  ;;  %v5452_v45 = vld [vmem:[%s8117_s4 + $0xa8] ss:$40 sps:$4 sm:$0xff]   ;;  %v5460_v47 = vld [vmem:[%s8117_s4 + $0xfc] ss:$40 sps:$4 sm:$0xff]  }
 0x102   :  { %v385_v54 = vsel %vm376_vm1, %v365_v52, 0.0  ;;  %v5463_v50 = vld [vmem:[%s8117_s4 + $0x144] ss:$40 sps:$4 sm:$0xff]  }
 0x103   :  { %379 = vadd.xlane.f32.xlu0 %v378_v53  ;;  %v386_v55 = vadd.f32 %v385_v54, %v384_v51  ;;  %v5466_v51 = vld [vmem:[%s8117_s4 + $0x14c] ss:$40 sps:$4 sm:$0xff]   ;;  %v5464_v53 = vld [vmem:[%s8117_s4 + $0x148] ss:$40 sps:$4 sm:$0xff]  }
 0x104   :  { %v5469_v54 = vld [vmem:[%s8117_s4 + $0x194] ss:$40 sps:$4 sm:$0xff]  }
 0x107   :  { %387 = vadd.xlane.f32.xlu0 %v386_v55  ;;  %v5472_v55 = vld [vmem:[%s8117_s4 + $0x19c] ss:$40 sps:$4 sm:$0xff]  }
 0x190   :  { %v380_v56 = vpop.xlane.xlu0 %379 }
 0x191   :  { %v389_v57 = vmul.f32 0.0015432099, %v380_v56  ;;  %v5467_v56 = vld [vmem:[%s8117_s4 + $0x190] ss:$40 sps:$4 sm:$0xff]  }
 0x193   :  { %v6031_v58 = vsub.f32 %v273_v32, %v389_v57  ;;  %v6033_v59 = vsub.f32 %v275_v33, %v389_v57  ;;  %v6035_v60 = vsub.f32 %v316_v36, %v389_v57  ;;  %v6037_v62 = vsub.f32 %v318_v38, %v389_v57  ;;  %v370_v33 = vld [vmem:[%s8116_s3] sm:$0xff]  ;;  %v5440_v36 = vld [vmem:[%s8117_s4 + $0x8] ss:$40 sps:$4 sm:$0xff]  }
 0x194   :  { %v388_v61 = vpop.xlane.xlu0 %387  ;;  %v6043_v3 = vsub.f32 %v359_v46, %v389_v57  ;;  %v6045_v4 = vsub.f32 %v361_v48, %v389_v57  ;;  %v5443_v38 = vld [vmem:[%s8117_s4 + $0x50] ss:$40 sps:$4 sm:$0xff]   ;;  %v5457_v46 = vld [vmem:[%s8117_s4 + $0xf4] ss:$40 sps:$4 sm:$0xff]  }
 0x195   :  { %v390_v63 = vmul.f32 0.0015432099, %v388_v61  ;;  %v403_v0 = vmul.f32 %v6031_v58, %v6031_v58  ;;  %v404_v2 = vmul.f32 %v6033_v59, %v6033_v59  ;;  %v405_v5 = vmul.f32 %v6035_v60, %v6035_v60  ;;  %v5455_v48 = vld [vmem:[%s8117_s4 + $0xf0] ss:$40 sps:$4 sm:$0xff]   ;;  %v5475_v61 = vld [vmem:[%s8117_s4 + $0x1e4] ss:$40 sps:$4 sm:$0xff]  }
 0x196   :  { %v406_v10 = vmul.f32 %v6037_v62, %v6037_v62  ;;  %v407_v15 = vmul.f32 %v6043_v3, %v6043_v3  ;;  %v408_v16 = vmul.f32 %v6045_v4, %v6045_v4  ;;  %v5470_v57 = vld [vmem:[%s8117_s4 + $0x198] ss:$40 sps:$4 sm:$0xff]  }
 0x197   :  { %v415_v6 = vadd.f32 %v404_v2, %v403_v0  ;;  %v6049_v7 = vsub.f32 %v277_v35, %v390_v63  ;;  %v6051_v8 = vsub.f32 %v279_v37, %v390_v63  ;;  %v6053_v9 = vsub.f32 %v320_v41, %v390_v63  ;;  %v5439_v35 = vld [vmem:[%s8117_s4 + $0x4] ss:$40 sps:$4 sm:$0xff]   ;;  %v5473_v0 = vld [vmem:[%s8117_s4 + $0x1e0] ss:$40 sps:$4 sm:$0xff]  }
 0x198   :  { %v6057_v12 = vsub.f32 %v322_v42, %v390_v63  ;;  %v6067_v17 = vsub.f32 %v365_v52, %v390_v63  ;;  %v6069_v19 = vsub.f32 %v363_v49, %v390_v63  ;;  %v419_v25 = vsel %vm376_vm1, %v408_v16, 0.0  ;;  %v5442_v37 = vld [vmem:[%s8117_s4 + $0xc] ss:$40 sps:$4 sm:$0xff]   ;;  %1800 = vmatprep.subr.bf16.mxu1 %v5439_v35  ;;  %v5448_v41 = vld [vmem:[%s8117_s4 + $0x5c] ss:$40 sps:$4 sm:$0xff]  }
 0x199   :  { %v416_v11 = vadd.f32 %v415_v6, %v405_v5  ;;  %v409_v13 = vmul.f32 %v6049_v7, %v6049_v7  ;;  %v410_v14 = vmul.f32 %v6051_v8, %v6051_v8  ;;  %v411_v20 = vmul.f32 %v6053_v9, %v6053_v9  ;;  %1906 = vmatprep.subr.bf16.mxu0 %v5442_v37  ;;  %v5451_v42 = vld [vmem:[%s8117_s4 + $0xa4] ss:$40 sps:$4 sm:$0xff]   ;;  %v5458_v49 = vld [vmem:[%s8117_s4 + $0xf8] ss:$40 sps:$4 sm:$0xff]   ;;  %v5476_v2 = vld [vmem:[%s8117_s4 + $0x1e8] ss:$40 sps:$4 sm:$0xff]  }
 0x19a   :  { %v412_v23 = vmul.f32 %v6057_v12, %v6057_v12  ;;  %v414_v26 = vmul.f32 %v6067_v17, %v6067_v17  ;;  %v413_v28 = vmul.f32 %v6069_v19, %v6069_v19  ;;  %1801 = vmatpush1.bf16.msra.mxu1 %v5437_v34  ;;  %1907 = vmatpush1.bf16.msra.mxu0 %v5440_v36  ;;  %v5461_v52 = vld [vmem:[%s8117_s4 + $0x140] ss:$40 sps:$4 sm:$0xff]   ;;  %v5478_v63 = vld [vmem:[%s8117_s4 + $0x1ec] ss:$40 sps:$4 sm:$0xff]   ;;  %v5484_v6 = vld [vmem:[%s8117_s4 + $0x23c] ss:$40 sps:$4 sm:$0xff]  }
 0x19b   :  { %v417_v18 = vadd.f32 %v416_v11, %v406_v10  ;;  %v423_v21 = vadd.f32 %v410_v14, %v409_v13  ;;  %1802 = vmatprep.subr.bf16.mxu1 %v5445_v39  ;;  %1908 = vmatprep.subr.bf16.mxu0 %v5448_v41  ;;  %v5481_v5 = vld [vmem:[%s8117_s4 + $0x234] ss:$40 sps:$4 sm:$0xff]   ;;  %v5479_v10 = vld [vmem:[%s8117_s4 + $0x230] ss:$40 sps:$4 sm:$0xff]   ;;  %v5487_v13 = vld [vmem:[%s8117_s4 + $0x284] ss:$40 sps:$4 sm:$0xff]  }
 0x19c   :  { %v427_v31 = vsel %vm376_vm1, %v414_v26, 0.0  ;;  %v5482_v11 = vld [vmem:[%s8117_s4 + $0x238] ss:$40 sps:$4 sm:$0xff]   ;;  %v5490_v14 = vld [vmem:[%s8117_s4 + $0x28c] ss:$40 sps:$4 sm:$0xff]  }
 0x19d   :  { %v418_v22 = vadd.f32 %v417_v18, %v407_v15  ;;  %v424_v24 = vadd.f32 %v423_v21, %v411_v20  ;;  %v5485_v15 = vld [vmem:[%s8117_s4 + $0x280] ss:$40 sps:$4 sm:$0xff]   ;;  %v5493_v18 = vld [vmem:[%s8117_s4 + $0x2d4] ss:$40 sps:$4 sm:$0xff]   ;;  %v5491_v21 = vld [vmem:[%s8117_s4 + $0x2d0] ss:$40 sps:$4 sm:$0xff]  }
 0x19e   :  { %1803 = vmatpush1.bf16.msra.mxu1 %v5443_v38  ;;  %1909 = vmatpush1.bf16.msra.mxu0 %v5446_v40  ;;  %v5488_v16 = vld [vmem:[%s8117_s4 + $0x288] ss:$40 sps:$4 sm:$0xff]   ;;  %v5496_v20 = vld [vmem:[%s8117_s4 + $0x2dc] ss:$40 sps:$4 sm:$0xff]   ;;  %v5506_v37 = vld [vmem:[%s8117_s4 + $0x378] ss:$40 sps:$4 sm:$0xff]  }
 0x19f   :  { %v420_v27 = vadd.f32 %v419_v25, %v418_v22  ;;  %v425_v29 = vadd.f32 %v424_v24, %v412_v23  ;;  %1804 = vmatprep.subr.bf16.mxu1 %v5451_v42  ;;  %1910 = vmatprep.subr.bf16.mxu0 %v5454_v44  ;;  %v5494_v22 = vld [vmem:[%s8117_s4 + $0x2d8] ss:$40 sps:$4 sm:$0xff]   ;;  %v5499_v23 = vld [vmem:[%s8117_s4 + $0x324] ss:$40 sps:$4 sm:$0xff]   ;;  %v5500_v26 = vld [vmem:[%s8117_s4 + $0x328] ss:$40 sps:$4 sm:$0xff]  }
 0x1a0   :  { %v5502_v24 = vld [vmem:[%s8117_s4 + $0x32c] ss:$40 sps:$4 sm:$0xff]   ;;  %v5497_v25 = vld [vmem:[%s8117_s4 + $0x320] ss:$40 sps:$4 sm:$0xff]   ;;  %v5508_v34 = vld [vmem:[%s8117_s4 + $0x37c] ss:$40 sps:$4 sm:$0xff]  }
 0x1a1   :  { %421 = vadd.xlane.f32.xlu1 %v420_v27  ;;  %v426_v30 = vadd.f32 %v425_v29, %v413_v28  ;;  %v368_v35 = vld [vmem:[%s8118_s2] sm:$0xff]  ;;  %v5503_v36 = vld [vmem:[%s8117_s4 + $0x370] ss:$40 sps:$4 sm:$0xff]   ;;  %v5514_v41 = vld [vmem:[%s8117_s4 + $0x3cc] ss:$40 sps:$4 sm:$0xff]  }
 0x1a2   :  { %1805 = vmatpush1.bf16.msra.mxu1 %v5449_v43  ;;  %1911 = vmatpush1.bf16.msra.mxu0 %v5452_v45  ;;  %v5511_v40 = vld [vmem:[%s8117_s4 + $0x3c4] ss:$40 sps:$4 sm:$0xff]   ;;  %v5509_v43 = vld [vmem:[%s8117_s4 + $0x3c0] ss:$40 sps:$4 sm:$0xff]  }
 0x1a3   :  { %v428_v32 = vadd.f32 %v427_v31, %v426_v30  ;;  %1806 = vmatprep.subr.bf16.mxu1 %v5457_v46  ;;  %1912 = vmatprep.subr.bf16.mxu0 %v5460_v47  ;;  %v369_v42 = vld [vmem:[%s8118_s2 + $0x8] sm:$0xff]  ;;  %v5517_v47 = vld [vmem:[%s8117_s4 + $0x414] ss:$40 sps:$4 sm:$0xff]   ;;  %s5823_s2 = smov 44  }
 0x1a4   :  { %v5512_v44 = vld [vmem:[%s8117_s4 + $0x3c8] ss:$40 sps:$4 sm:$0xff]  }
 0x1a5   :  { %429 = vadd.xlane.f32.xlu1 %v428_v32 }
 0x1a6   :  { %1807 = vmatpush1.bf16.msra.mxu1 %v5455_v48  ;;  %1913 = vmatpush1.bf16.msra.mxu0 %v5458_v49  ;;  %v5520_v48 = vld [vmem:[%s8117_s4 + $0x41c] ss:$40 sps:$4 sm:$0xff]   ;;  %v5515_v49 = vld [vmem:[%s8117_s4 + $0x410] ss:$40 sps:$4 sm:$0xff]  }
 0x1a7   :  { %1808 = vmatprep.subr.bf16.mxu1 %v5463_v50  ;;  %1914 = vmatprep.subr.bf16.mxu0 %v5466_v51  ;;  %v5518_v50 = vld [vmem:[%s8117_s4 + $0x418] ss:$40 sps:$4 sm:$0xff]   ;;  %v371_v51 = vld [vmem:[%s8116_s3 + $0x8] sm:$0xff]  ;;  %s5819_s3 = smov 112  }
 0x1aa   :  { %1809 = vmatpush1.bf16.msra.mxu1 %v5461_v52  ;;  %1915 = vmatpush1.bf16.msra.mxu0 %v5464_v53  ;;  %v5523_v52 = vld [vmem:[%s8117_s4 + $0x464] ss:$40 sps:$4 sm:$0xff]  }
 0x1ab   :  { %1810 = vmatprep.subr.bf16.mxu1 %v5469_v54  ;;  %1916 = vmatprep.subr.bf16.mxu0 %v5472_v55  ;;  %v5526_v53 = vld [vmem:[%s8117_s4 + $0x46c] ss:$40 sps:$4 sm:$0xff]   ;;  %v5521_v54 = vld [vmem:[%s8117_s4 + $0x460] ss:$40 sps:$4 sm:$0xff]  }
 0x1ac   :  { %v5524_v55 = vld [vmem:[%s8117_s4 + $0x468] ss:$40 sps:$4 sm:$0xff]  }
 0x1ae   :  { %1811 = vmatpush1.bf16.msra.mxu1 %v5467_v56  ;;  %1917 = vmatpush1.bf16.msra.mxu0 %v5470_v57  ;;  %v5529_v56 = vld [vmem:[%s8117_s4 + $0x4b4] ss:$40 sps:$4 sm:$0xff]  }
 0x1af   :  { %1812 = vmatprep.subr.bf16.mxu1 %v5475_v61  ;;  %1918 = vmatprep.subr.bf16.mxu0 %v5478_v63  ;;  %v5532_v57 = vld [vmem:[%s8117_s4 + $0x4bc] ss:$40 sps:$4 sm:$0xff]   ;;  %v5527_v61 = vld [vmem:[%s8117_s4 + $0x4b0] ss:$40 sps:$4 sm:$0xff]  }
 0x1b0   :  { %v5530_v63 = vld [vmem:[%s8117_s4 + $0x4b8] ss:$40 sps:$4 sm:$0xff]  }
 0x1b2   :  { %1813 = vmatpush1.bf16.msra.mxu1 %v5473_v0  ;;  %1919 = vmatpush1.bf16.msra.mxu0 %v5476_v2  ;;  %v5535_v2 = vld [vmem:[%s8117_s4 + $0x504] ss:$40 sps:$4 sm:$0xff]  }
 0x1b3   :  { %1814 = vmatprep.subr.bf16.mxu1 %v5481_v5  ;;  %1920 = vmatprep.subr.bf16.mxu0 %v5484_v6  ;;  %v5538_v5 = vld [vmem:[%s8117_s4 + $0x50c] ss:$40 sps:$4 sm:$0xff]  }
 0x1b6   :  { %463 = vperm.xlu1 %5390, %v370_v33   ;;  %1815 = vmatpush1.bf16.msra.mxu1 %v5479_v10  ;;  %v5505_v33 = vld [vmem:[%s8117_s4 + $0x374] ss:$40 sps:$4 sm:$0xff]  }
 0x1b7   :  { %1921 = vmatpush1.bf16.msra.mxu0 %v5482_v11  ;;  %1816 = vmatprep.subr.bf16.mxu1 %v5487_v13 }
 0x1b8   :  { %1922 = vmatprep.subr.bf16.mxu0 %v5490_v14 }
 0x1ba   :  { %1817 = vmatpush1.bf16.msra.mxu1 %v5485_v15 }
 0x1bb   :  { %1923 = vmatpush1.bf16.msra.mxu0 %v5488_v16  ;;  %1818 = vmatprep.subr.bf16.mxu1 %v5493_v18 }
 0x1bc   :  { %1924 = vmatprep.subr.bf16.mxu0 %v5496_v20 }
 0x1be   :  { %1819 = vmatpush1.bf16.msra.mxu1 %v5491_v21 }
 0x1bf   :  { %1925 = vmatpush1.bf16.msra.mxu0 %v5494_v22  ;;  %1820 = vmatprep.subr.bf16.mxu1 %v5499_v23 }
 0x1c0   :  { %1926 = vmatprep.subr.bf16.mxu0 %v5502_v24 }
 0x1c2   :  { %1821 = vmatpush1.bf16.msra.mxu1 %v5497_v25 }
 0x1c3   :  { %1927 = vmatpush1.bf16.msra.mxu0 %v5500_v26  ;;  %1822 = vmatprep.subr.bf16.mxu1 %v5505_v33 }
 0x1c4   :  { %1928 = vmatprep.subr.bf16.mxu0 %v5508_v34 }
 0x1c6   :  { %1823 = vmatpush1.bf16.msra.mxu1 %v5503_v36 }
 0x1c7   :  { %1929 = vmatpush1.bf16.msra.mxu0 %v5506_v37  ;;  %1824 = vmatprep.subr.bf16.mxu1 %v5511_v40  ;;  %v5533_v37 = vld [vmem:[%s8117_s4 + $0x500] ss:$40 sps:$4 sm:$0xff]   ;;  %v5541_v40 = vld [vmem:[%s8117_s4 + $0x554] ss:$40 sps:$4 sm:$0xff]  }
 0x1c8   :  { %1930 = vmatprep.subr.bf16.mxu0 %v5514_v41 }
 0x1ca   :  { %1825 = vmatpush1.bf16.msra.mxu1 %v5509_v43 }
 0x1cb   :  { %1931 = vmatpush1.bf16.msra.mxu0 %v5512_v44  ;;  %1826 = vmatprep.subr.bf16.mxu1 %v5517_v47  ;;  %v5544_v44 = vld [vmem:[%s8117_s4 + $0x55c] ss:$40 sps:$4 sm:$0xff]  }
 0x1cc   :  { %1932 = vmatprep.subr.bf16.mxu0 %v5520_v48  ;;  %v5547_v47 = vld [vmem:[%s8117_s4 + $0x5a4] ss:$40 sps:$4 sm:$0xff]  }
 0x1ce   :  { %1827 = vmatpush1.bf16.msra.mxu1 %v5515_v49  ;;  %v5550_v49 = vld [vmem:[%s8117_s4 + $0x5ac] ss:$40 sps:$4 sm:$0xff]  }
 0x1cf   :  { %1933 = vmatpush1.bf16.msra.mxu0 %v5518_v50  ;;  %1828 = vmatprep.subr.bf16.mxu1 %v5523_v52  ;;  %v5548_v52 = vld [vmem:[%s8117_s4 + $0x5a8] ss:$40 sps:$4 sm:$0xff]  }
 0x1d0   :  { %1934 = vmatprep.subr.bf16.mxu0 %v5526_v53  ;;  %v5553_v53 = vld [vmem:[%s8117_s4 + $0x5f4] ss:$40 sps:$4 sm:$0xff]  }
 0x1d2   :  { %1829 = vmatpush1.bf16.msra.mxu1 %v5521_v54 }
 0x1d3   :  { %1935 = vmatpush1.bf16.msra.mxu0 %v5524_v55  ;;  %1830 = vmatprep.subr.bf16.mxu1 %v5529_v56  ;;  %v5556_v55 = vld [vmem:[%s8117_s4 + $0x5fc] ss:$40 sps:$4 sm:$0xff]  }
 0x1d4   :  { %1936 = vmatprep.subr.bf16.mxu0 %v5532_v57  ;;  %v733_v56 = vld [vmem:[%s8117_s4 + $0x640] sm:$0x33]  ;;  %v734_v57 = vld [vmem:[%s8117_s4 + $0x648] sm:$0x33] }
 0x1d6   :  { %1831 = vmatpush1.bf16.msra.mxu1 %v5527_v61 }
 0x1d7   :  { %1937 = vmatpush1.bf16.msra.mxu0 %v5530_v63  ;;  %1853 = vmatprep.subr.bf16.mxu1 %v5535_v2  ;;  %v5551_v63 = vld [vmem:[%s8117_s4 + $0x5f0] ss:$40 sps:$4 sm:$0xff]   ;;  %v5063_v2 = vcombine.high %v733_v56, %v733_v56 }
 0x1d8   :  { %1959 = vmatprep.subr.bf16.mxu0 %v5538_v5  ;;  %v5062_v5 = vcombine.low %v733_v56, %v733_v56  ;;  %v5626_v56 = vld [vmem:[%s8117_s4 + $0x33c] ss:$40 sps:$4 sm:$0xff]  }
 0x22e   :  { %v422_v27 = vpop.xlane.xlu1 %421 }
 0x22f   :  { %v431_v28 = vmul.f32 0.0015432099, %v422_v27 }
 0x231   :  { %v433_v29 = vadd.f32 1e-05, %v431_v28 }
 0x232   :  { %v430_v30 = vpop.xlane.xlu1 %429 }
 0x233   :  { %5782 = vrsqrt.f32 %v433_v29  ;;  %v432_v31 = vmul.f32 0.0015432099, %v430_v30 }
 0x235   :  { %v434_v32 = vadd.f32 1e-05, %v432_v31 }
 0x236   :  { %v6285_v0 = vpop.permute.xlu1 %463 }
 0x237   :  { %5784 = vrsqrt.f32 %v434_v32 }
 0x23d   :  { %v5783_v38 = vpop.eup %5782 }
 0x23e   :  { %v437_v39 = vmul.f32 %v5783_v38, %v368_v35 }
 0x240   :  { %441 = vperm.xlu0 %5389, %v437_v39   ;;  %v5536_v39 = vld [vmem:[%s8117_s4 + $0x508] ss:$40 sps:$4 sm:$0xff]  }
 0x241   :  { %v5785_v45 = vpop.eup %5784 }
 0x242   :  { %v438_v46 = vmul.f32 %v5785_v45, %v369_v42 }
 0x244   :  { %446 = vperm.xlu1 %5390, %v438_v46  }
 0x248   :  { %468 = vperm.xlu1 %5390, %v371_v51   ;;  %v5545_v51 = vld [vmem:[%s8117_s4 + $0x5a0] ss:$40 sps:$4 sm:$0xff]  }
 0x2bf   :  { %v442_v6 = vpop.permute.xlu0 %441 }
 0x2c0   :  { %v449_v10 = vmul.f32 %v442_v6, %v6031_v58  ;;  %v450_v11 = vmul.f32 %v442_v6, %v6033_v59  ;;  %v452_v13 = vmul.f32 %v442_v6, %v6037_v62  ;;  %v451_v15 = vmul.f32 %v442_v6, %v6035_v60 }
 0x2c1   :  { %v453_v21 = vmul.f32 %v442_v6, %v6043_v3  ;;  %v454_v42 = vmul.f32 %v442_v6, %v6045_v4  ;;  %v5539_v4 = vld [vmem:[%s8117_s4 + $0x550] ss:$40 sps:$4 sm:$0xff]   ;;  %v5065_v6 = vcombine.high %v734_v57, %v734_v57 }
 0x2c2   :  { %v471_v16 = vadd.f32 %v6285_v0, %v449_v10  ;;  %v472_v18 = vadd.f32 %v6285_v0, %v450_v11  ;;  %v474_v20 = vadd.f32 %v6285_v0, %v452_v13  ;;  %v473_v60 = vadd.f32 %v6285_v0, %v451_v15  ;;  %v5563_v13 = vld [vmem:[%s8117_s4 + $0x14] ss:$40 sps:$4 sm:$0xff]  }
 0x2c3   :  { %v447_v14 = vpop.permute.xlu1 %446  ;;  %v475_v3 = vadd.f32 %v6285_v0, %v453_v21  ;;  %v476_v48 = vadd.f32 %v6285_v0, %v454_v42  ;;  %v5554_v0 = vld [vmem:[%s8117_s4 + $0x5f8] ss:$40 sps:$4 sm:$0xff]   ;;  %v5064_v10 = vcombine.low %v734_v57, %v734_v57  ;;  %v1771_v11 = vsel %vm1769_vm3, %v5062_v5, 0  ;;  %v5566_v15 = vld [vmem:[%s8117_s4 + $0x1c] ss:$40 sps:$4 sm:$0xff]  }
 0x2c4   :  { %v455_v22 = vmul.f32 %v447_v14, %v6049_v7  ;;  %v456_v23 = vmul.f32 %v447_v14, %v6051_v8  ;;  %v458_v58 = vmul.f32 %v447_v14, %v6057_v12  ;;  %v459_v59 = vmul.f32 %v447_v14, %v6069_v19  ;;  %v5602_v42 = vld [vmem:[%s8117_s4 + $0x1fc] ss:$40 sps:$4 sm:$0xff]   ;;  %v5621_v57 = vld [vmem:[%s8117_s4 + $0x330] ss:$40 sps:$4 sm:$0xff]  }
 0x2c5   :  { %v457_v24 = vmul.f32 %v447_v14, %v6053_v9  ;;  %v483_v29 = vmax.f32 %v471_v16, 0.0  ;;  %v484_v30 = vmax.f32 %v472_v18, 0.0  ;;  %v486_v32 = vmax.f32 %v474_v20, 0.0  ;;  %v5630_v5 = vld [vmem:[%s8117_s4 + $0x388] ss:$40 sps:$4 sm:$0xff]  }
 0x2c6   :  { %v485_v33 = vmax.f32 %v473_v60, 0.0  ;;  %v487_v41 = vmax.f32 %v475_v3, 0.0  ;;  %v460_v43 = vmul.f32 %v447_v14, %v6067_v17  ;;  %v5542_v17 = vld [vmem:[%s8117_s4 + $0x558] ss:$40 sps:$4 sm:$0xff]   ;;  %v488_v54 = vmax.f32 %v476_v48, 0.0 }
 0x2c7   :  { %v469_v62 = vpop.permute.xlu1 %468  ;;  %v1777_v14 = vsel %vm1769_vm3, %v5064_v10, 0  ;;  %v5572_v60 = vld [vmem:[%s8117_s4 + $0x6c] ss:$40 sps:$4 sm:$0xff]   ;;  %v5576_v3 = vld [vmem:[%s8117_s4 + $0xb8] ss:$40 sps:$4 sm:$0xff]  }
 0x2c8   :  { %v477_v25 = vadd.f32 %v469_v62, %v455_v22  ;;  %v478_v26 = vadd.f32 %v469_v62, %v456_v23  ;;  %v480_v27 = vadd.f32 %v469_v62, %v458_v58  ;;  %v481_v28 = vadd.f32 %v469_v62, %v459_v59  ;;  %v5561_v59 = vld [vmem:[%s8117_s4 + $0x10] ss:$40 sps:$4 sm:$0xff]   ;;  %v5614_v48 = vld [vmem:[%s8117_s4 + $0x29c] ss:$40 sps:$4 sm:$0xff]  }
 0x2c9   :  { %v479_v7 = vadd.f32 %v469_v62, %v457_v24  ;;  %v482_v46 = vadd.f32 %v469_v62, %v460_v43  ;;  %v5564_v62 = vld [vmem:[%s8117_s4 + $0x18] ss:$40 sps:$4 sm:$0xff]   ;;  %v5569_v24 = vld [vmem:[%s8117_s4 + $0x64] ss:$40 sps:$4 sm:$0xff]  }
 0x2ca   :  { %v489_v31 = vmax.f32 %v477_v25, 0.0  ;;  %v490_v8 = vmax.f32 %v478_v26, 0.0  ;;  %v492_v12 = vmax.f32 %v480_v27, 0.0  ;;  %v493_v36 = vmax.f32 %v481_v28, 0.0  ;;  %v5567_v26 = vld [vmem:[%s8117_s4 + $0x60] ss:$40 sps:$4 sm:$0xff]  }
 0x2cb   :  { %v491_v19 = vmax.f32 %v479_v7, 0.0  ;;  %v494_v50 = vmax.f32 %v482_v46, 0.0  ;;  %v5570_v27 = vld [vmem:[%s8117_s4 + $0x68] ss:$40 sps:$4 sm:$0xff]   ;;  %v5575_v28 = vld [vmem:[%s8117_s4 + $0xb4] ss:$40 sps:$4 sm:$0xff]  }
 0x2cc   :  { %v6308_v34 = vpack.c.bf16 %v489_v31, %v483_v29  ;;  %v6310_v9 = vpack.c.bf16 %v490_v8, %v484_v30  ;;  %v502_v35 = vpack.c.bf16 %v492_v12, %v486_v32  ;;  %v503_v45 = vpack.c.bf16 %v493_v36, %v487_v41  ;;  %v5578_v29 = vld [vmem:[%s8117_s4 + $0xbc] ss:$40 sps:$4 sm:$0xff]   ;;  %v5573_v30 = vld [vmem:[%s8117_s4 + $0xb0] ss:$40 sps:$4 sm:$0xff]   ;;  %v5584_v8 = vld [vmem:[%s8117_s4 + $0x10c] ss:$40 sps:$4 sm:$0xff]  }
 0x2cd   :  { %v497_v38 = vpack.c.bf16 %v491_v19, %v485_v33  ;;  %v504_v61 = vpack.c.bf16 %v494_v50, %v488_v54  ;;  %v5581_v31 = vld [vmem:[%s8117_s4 + $0x104] ss:$40 sps:$4 sm:$0xff]   ;;  %v5579_v32 = vld [vmem:[%s8117_s4 + $0x100] ss:$40 sps:$4 sm:$0xff]   ;;  %v5587_v33 = vld [vmem:[%s8117_s4 + $0x154] ss:$40 sps:$4 sm:$0xff]  }
 0x2ce   :  { %511 = vrot.lane.b32.xlu1 %v502_v35, %s5803_s25  ;;  %1832 = vmatprep.mubr.bf16.mxu1 %v6310_v9  ;;  %v5582_v12 = vld [vmem:[%s8117_s4 + $0x108] ss:$40 sps:$4 sm:$0xff]   ;;  %v5590_v19 = vld [vmem:[%s8117_s4 + $0x15c] ss:$40 sps:$4 sm:$0xff]   ;;  %v5588_v36 = vld [vmem:[%s8117_s4 + $0x158] ss:$40 sps:$4 sm:$0xff]  }
 0x2cf   :  { %501 = vst.msk [vmem:[#allocation2 + $0x10] sm:$0xff] %vm500_vm2, %v497_v38  ;;  %1938 = vmatprep.mubr.bf16.mxu0 %v6310_v9  ;;  %1833 = vmatmul.mubr.bf16.vlgmr.msra.gmra.mrb[4].mxu1 %v6308_v34  ;;  %v5585_v35 = vld [vmem:[%s8117_s4 + $0x150] ss:$40 sps:$4 sm:$0xff]   ;;  %v5599_v41 = vld [vmem:[%s8117_s4 + $0x1f4] ss:$40 sps:$4 sm:$0xff]  }
 0x2d0   :  { %1939 = vmatmul.mubr.bf16.vlgmr.msra.gmra.mrb[8].mxu0 %v6308_v34  ;;  %1854 = vmatpush1.bf16.msra.mxu1 %v5533_v37  ;;  %v5593_v37 = vld [vmem:[%s8117_s4 + $0x1a4] ss:$40 sps:$4 sm:$0xff]   ;;  %v5597_v43 = vld [vmem:[%s8117_s4 + $0x1f0] ss:$40 sps:$4 sm:$0xff]  }
 0x2d1   :  { %1960 = vmatpush1.bf16.msra.mxu0 %v5536_v39  ;;  %1855 = vmatprep.subr.bf16.mxu1 %v5541_v40  ;;  %v5591_v39 = vld [vmem:[%s8117_s4 + $0x1a0] ss:$40 sps:$4 sm:$0xff]   ;;  %v5608_v46 = vld [vmem:[%s8117_s4 + $0x24c] ss:$40 sps:$4 sm:$0xff]   ;;  %v5638_v10 = vld [vmem:[%s8117_s4 + $0x3dc] ss:$40 sps:$4 sm:$0xff]  }
 0x2d2   :  { %513 = vrot.lane.b32.xlu1 %v503_v45, %s5803_s25  ;;  %1961 = vmatprep.subr.bf16.mxu0 %v5544_v44  ;;  %v5594_v40 = vld [vmem:[%s8117_s4 + $0x1a8] ss:$40 sps:$4 sm:$0xff]   ;;  %v5600_v44 = vld [vmem:[%s8117_s4 + $0x1f8] ss:$40 sps:$4 sm:$0xff]   ;;  %v5605_v45 = vld [vmem:[%s8117_s4 + $0x244] ss:$40 sps:$4 sm:$0xff]  }
 0x2d3   :  { %v5612_v50 = vld [vmem:[%s8117_s4 + $0x298] ss:$40 sps:$4 sm:$0xff]   ;;  %v5618_v54 = vld [vmem:[%s8117_s4 + $0x2e8] ss:$40 sps:$4 sm:$0xff]  }
 0x2d4   :  { %1856 = vmatpush1.bf16.msra.mxu1 %v5539_v4  ;;  %v5603_v4 = vld [vmem:[%s8117_s4 + $0x240] ss:$40 sps:$4 sm:$0xff]  }
 0x2d5   :  { %1962 = vmatpush1.bf16.msra.mxu0 %v5542_v17  ;;  %1857 = vmatprep.subr.bf16.mxu1 %v5547_v47  ;;  %v5606_v17 = vld [vmem:[%s8117_s4 + $0x248] ss:$40 sps:$4 sm:$0xff]   ;;  %v5611_v47 = vld [vmem:[%s8117_s4 + $0x294] ss:$40 sps:$4 sm:$0xff]  }
 0x2d6   :  { %509 = vrot.lane.b32.xlu1 %v497_v38, %s5803_s25  ;;  %1963 = vmatprep.subr.bf16.mxu0 %v5550_v49  ;;  %v6408_v25 = vld [vmem:[#allocation2 + $0x10] sm:$0xff] }
 0x2d7   :  { %v5596_v38 = vld [vmem:[%s8117_s4 + $0x1ac] ss:$40 sps:$4 sm:$0xff]   ;;  %v5609_v49 = vld [vmem:[%s8117_s4 + $0x290] ss:$40 sps:$4 sm:$0xff]  }
 0x2d8   :  { %1858 = vmatpush1.bf16.msra.mxu1 %v5545_v51  ;;  %v5617_v51 = vld [vmem:[%s8117_s4 + $0x2e4] ss:$40 sps:$4 sm:$0xff]  }
 0x2d9   :  { %1964 = vmatpush1.bf16.msra.mxu0 %v5548_v52  ;;  %1859 = vmatprep.subr.bf16.mxu1 %v5553_v53  ;;  %v5620_v52 = vld [vmem:[%s8117_s4 + $0x2ec] ss:$40 sps:$4 sm:$0xff]   ;;  %v5615_v53 = vld [vmem:[%s8117_s4 + $0x2e0] ss:$40 sps:$4 sm:$0xff]  }
 0x2da   :  { %515 = vrot.lane.b32.xlu1 %v504_v61, %s5803_s25  ;;  %1965 = vmatprep.subr.bf16.mxu0 %v5556_v55  ;;  %v5623_v55 = vld [vmem:[%s8117_s4 + $0x334] ss:$40 sps:$4 sm:$0xff]   ;;  %v5624_v61 = vld [vmem:[%s8117_s4 + $0x338] ss:$40 sps:$4 sm:$0xff]  }
 0x2dc   :  { %1860 = vmatpush1.bf16.msra.mxu1 %v5551_v63  ;;  %v5629_v63 = vld [vmem:[%s8117_s4 + $0x384] ss:$40 sps:$4 sm:$0xff]  }
 0x2dd   :  { %1966 = vmatpush1.bf16.msra.mxu0 %v5554_v0  ;;  %5072 = vmatprep.subr.msk.bf16.mxu1 %vm1769_vm3, %v5063_v2  ;;  %v5632_v0 = vld [vmem:[%s8117_s4 + $0x38c] ss:$40 sps:$4 sm:$0xff]   ;;  %v5627_v2 = vld [vmem:[%s8117_s4 + $0x380] ss:$40 sps:$4 sm:$0xff]  }
 0x2de   :  { %5075 = vmatprep.subr.msk.bf16.mxu0 %vm1769_vm3, %v5065_v6  ;;  %v5635_v6 = vld [vmem:[%s8117_s4 + $0x3d4] ss:$40 sps:$4 sm:$0xff]  }
 0x2e0   :  { %1862 = vmatpush1.bf16.msra.mxu1 %v1771_v11  ;;  %v5633_v11 = vld [vmem:[%s8117_s4 + $0x3d0] ss:$40 sps:$4 sm:$0xff]  }
 0x2e1   :  { %1968 = vmatpush1.bf16.msra.mxu0 %v1777_v14  ;;  %2012 = vmatprep.subr.bf16.mxu1 %v5563_v13  ;;  %v5636_v13 = vld [vmem:[%s8117_s4 + $0x3d8] ss:$40 sps:$4 sm:$0xff]   ;;  %v5641_v14 = vld [vmem:[%s8117_s4 + $0x424] ss:$40 sps:$4 sm:$0xff]  }
 0x2e2   :  { %2118 = vmatprep.subr.bf16.mxu0 %v5566_v15  ;;  %v5644_v15 = vld [vmem:[%s8117_s4 + $0x42c] ss:$40 sps:$4 sm:$0xff]  }
 0x340   :  { %v512_v16 = vpop.permute.xlu1 %511 }
 0x344   :  { %v514_v18 = vpop.permute.xlu1 %513 }
 0x345   :  { %v6383_v20 = vsel %vm517_vm4, %v512_v16, %v514_v18 }
 0x346   :  { %1842 = vmatprep.mubr.bf16.mxu1 %v6383_v20  ;;  %1948 = vmatprep.mubr.bf16.mxu0 %v6383_v20 }
 0x348   :  { %v510_v21 = vpop.permute.xlu1 %509 }
 0x349   :  { %v6388_v22 = vsel %vm517_vm4, %v510_v21, %v512_v16  ;;  %v5639_v16 = vld [vmem:[%s8117_s4 + $0x420] ss:$40 sps:$4 sm:$0xff]   ;;  %v5647_v21 = vld [vmem:[%s8117_s4 + $0x474] ss:$40 sps:$4 sm:$0xff]  }
 0x34a   :  { %1843 = vmatmul.mubr.bf16.gmra.mrb[8].mxu1 %v6388_v22  ;;  %1949 = vmatmul.mubr.bf16.gmra.mrb[12].mxu0 %v6388_v22 }
 0x34b   :  { %1885 = vmatprep.mubr.bf16.mxu1 %v5802_v1  ;;  %1991 = vmatprep.mubr.bf16.mxu0 %v5802_v1 }
 0x34c   :  { %v516_v23 = vpop.permute.xlu1 %515 }
 0x34d   :  { %v520_v58 = vsel %vm517_vm4, %v514_v18, %v516_v23  ;;  %v5642_v18 = vld [vmem:[%s8117_s4 + $0x428] ss:$40 sps:$4 sm:$0xff]   ;;  %v5650_v23 = vld [vmem:[%s8117_s4 + $0x47c] ss:$40 sps:$4 sm:$0xff]  }
 0x34e   :  { %526 = vst.msk [vmem:[#allocation2 + $0x28] sm:$0xff] %vm500_vm2, %v520_v58  ;;  %v5645_v58 = vld [vmem:[%s8117_s4 + $0x470] ss:$40 sps:$4 sm:$0xff]  }
 0x352   :  { %5073 = vmatmul.mubr.msk.bf16.vlgmr.msra.gmra.mrb[4].mxu1 %vm500_vm2, %v6408_v25  ;;  %5076 = vmatmul.mubr.msk.bf16.vlgmr.msra.gmra.mrb[8].mxu0 %vm500_vm2, %v6408_v25 }
 0x353   :  { %2013 = vmatpush1.bf16.msra.mxu1 %v5561_v59  ;;  %2119 = vmatpush1.bf16.msra.mxu0 %v5564_v62  ;;  %v5648_v59 = vld [vmem:[%s8117_s4 + $0x478] ss:$40 sps:$4 sm:$0xff]   ;;  %v5653_v62 = vld [vmem:[%s8117_s4 + $0x4c4] ss:$40 sps:$4 sm:$0xff]  }
 0x354   :  { %2014 = vmatprep.subr.bf16.mxu1 %v5569_v24  ;;  %2120 = vmatprep.subr.bf16.mxu0 %v5572_v60  ;;  %v5656_v24 = vld [vmem:[%s8117_s4 + $0x4cc] ss:$40 sps:$4 sm:$0xff]   ;;  %v5651_v60 = vld [vmem:[%s8117_s4 + $0x4c0] ss:$40 sps:$4 sm:$0xff]  }
 0x355   :  { %1895 = vmatprep.mubr.bf16.mxu1 %v5802_v1  ;;  %2001 = vmatprep.mubr.bf16.mxu0 %v5802_v1  ;;  %v6434_v7 = vld [vmem:[#allocation2 + $0x28] sm:$0xff] }
 0x357   :  { %2015 = vmatpush1.bf16.msra.mxu1 %v5567_v26  ;;  %2121 = vmatpush1.bf16.msra.mxu0 %v5570_v27  ;;  %v5654_v26 = vld [vmem:[%s8117_s4 + $0x4c8] ss:$40 sps:$4 sm:$0xff]   ;;  %v5659_v27 = vld [vmem:[%s8117_s4 + $0x514] ss:$40 sps:$4 sm:$0xff]  }
 0x358   :  { %2016 = vmatprep.subr.bf16.mxu1 %v5575_v28  ;;  %2122 = vmatprep.subr.bf16.mxu0 %v5578_v29  ;;  %v5662_v28 = vld [vmem:[%s8117_s4 + $0x51c] ss:$40 sps:$4 sm:$0xff]   ;;  %v5657_v29 = vld [vmem:[%s8117_s4 + $0x510] ss:$40 sps:$4 sm:$0xff]  }
 0x35a   :  { %5074 = vmatmul.mubr.msk.bf16.gmra.mrb[8].mxu1 %vm500_vm2, %v6434_v7  ;;  %5077 = vmatmul.mubr.msk.bf16.gmra.mrb[12].mxu0 %vm500_vm2, %v6434_v7 }
 0x35b   :  { %2017 = vmatpush1.bf16.msra.mxu1 %v5573_v30  ;;  %2123 = vmatpush1.bf16.msra.mxu0 %v5576_v3  ;;  %v5660_v30 = vld [vmem:[%s8117_s4 + $0x518] ss:$40 sps:$4 sm:$0xff]   ;;  %v5665_v3 = vld [vmem:[%s8117_s4 + $0x564] ss:$40 sps:$4 sm:$0xff]  }
 0x35c   :  { %2044 = vmatprep.mubr.bf16.mxu1 %v6310_v9  ;;  %2150 = vmatprep.mubr.bf16.mxu0 %v6310_v9 }
 0x35d   :  { %2018 = vmatprep.subr.bf16.mxu1 %v5581_v31  ;;  %2124 = vmatprep.subr.bf16.mxu0 %v5584_v8  ;;  %v5668_v31 = vld [vmem:[%s8117_s4 + $0x56c] ss:$40 sps:$4 sm:$0xff]   ;;  %v5663_v8 = vld [vmem:[%s8117_s4 + $0x560] ss:$40 sps:$4 sm:$0xff]  }
 0x35f   :  { %2019 = vmatpush1.bf16.msra.mxu1 %v5579_v32  ;;  %2125 = vmatpush1.bf16.msra.mxu0 %v5582_v12  ;;  %v5666_v32 = vld [vmem:[%s8117_s4 + $0x568] ss:$40 sps:$4 sm:$0xff]   ;;  %v5671_v12 = vld [vmem:[%s8117_s4 + $0x5b4] ss:$40 sps:$4 sm:$0xff]  }
 0x360   :  { %2020 = vmatprep.subr.bf16.mxu1 %v5587_v33  ;;  %2126 = vmatprep.subr.bf16.mxu0 %v5590_v19  ;;  %v5674_v33 = vld [vmem:[%s8117_s4 + $0x5bc] ss:$40 sps:$4 sm:$0xff]   ;;  %v5669_v19 = vld [vmem:[%s8117_s4 + $0x5b0] ss:$40 sps:$4 sm:$0xff]  }
 0x363   :  { %2021 = vmatpush1.bf16.msra.mxu1 %v5585_v35  ;;  %2127 = vmatpush1.bf16.msra.mxu0 %v5588_v36  ;;  %v5672_v35 = vld [vmem:[%s8117_s4 + $0x5b8] ss:$40 sps:$4 sm:$0xff]   ;;  %v5677_v36 = vld [vmem:[%s8117_s4 + $0x604] ss:$40 sps:$4 sm:$0xff]  }
 0x364   :  { %2022 = vmatprep.subr.bf16.mxu1 %v5593_v37  ;;  %2128 = vmatprep.subr.bf16.mxu0 %v5596_v38  ;;  %v5680_v37 = vld [vmem:[%s8117_s4 + $0x60c] ss:$40 sps:$4 sm:$0xff]  }
 0x365   :  { %v735_v38 = vld [vmem:[%s8117_s4 + $0x650] sm:$0x33] }
 0x367   :  { %2023 = vmatpush1.bf16.msra.mxu1 %v5591_v39  ;;  %2129 = vmatpush1.bf16.msra.mxu0 %v5594_v40  ;;  %v736_v39 = vld [vmem:[%s8117_s4 + $0x658] sm:$0x33]  ;;  %v5675_v40 = vld [vmem:[%s8117_s4 + $0x600] ss:$40 sps:$4 sm:$0xff]  }
 0x368   :  { %2024 = vmatprep.subr.bf16.mxu1 %v5599_v41  ;;  %2130 = vmatprep.subr.bf16.mxu0 %v5602_v42  ;;  %v5678_v41 = vld [vmem:[%s8117_s4 + $0x608] ss:$40 sps:$4 sm:$0xff]   ;;  %v5067_v42 = vcombine.high %v735_v38, %v735_v38 }
 0x36b   :  { %2025 = vmatpush1.bf16.msra.mxu1 %v5597_v43  ;;  %2131 = vmatpush1.bf16.msra.mxu0 %v5600_v44  ;;  %v5066_v43 = vcombine.low %v735_v38, %v735_v38  ;;  %v5069_v44 = vcombine.high %v736_v39, %v736_v39 }
 0x36c   :  { %2026 = vmatprep.subr.bf16.mxu1 %v5605_v45  ;;  %2132 = vmatprep.subr.bf16.mxu0 %v5608_v46  ;;  %v5068_v45 = vcombine.low %v736_v39, %v736_v39 }
 0x36d   :  { %v1783_v46 = vsel %vm1769_vm3, %v5066_v43, 0 }
 0x36f   :  { %2027 = vmatpush1.bf16.msra.mxu1 %v5603_v4  ;;  %2133 = vmatpush1.bf16.msra.mxu0 %v5606_v17  ;;  %v5687_v4 = vld [vmem:[%s8117_s4 + $0x24] ss:$40 sps:$4 sm:$0xff]   ;;  %v1789_v17 = vsel %vm1769_vm3, %v5068_v45, 0 }
 0x370   :  { %2028 = vmatprep.subr.bf16.mxu1 %v5611_v47  ;;  %2134 = vmatprep.subr.bf16.mxu0 %v5614_v48  ;;  %v5685_v47 = vld [vmem:[%s8117_s4 + $0x20] ss:$40 sps:$4 sm:$0xff]   ;;  %v5690_v48 = vld [vmem:[%s8117_s4 + $0x74] ss:$40 sps:$4 sm:$0xff]  }
 0x373   :  { %2029 = vmatpush1.bf16.msra.mxu1 %v5609_v49  ;;  %2135 = vmatpush1.bf16.msra.mxu0 %v5612_v50  ;;  %v5688_v49 = vld [vmem:[%s8117_s4 + $0x70] ss:$40 sps:$4 sm:$0xff]   ;;  %v5693_v50 = vld [vmem:[%s8117_s4 + $0xc4] ss:$40 sps:$4 sm:$0xff]  }
 0x374   :  { %2030 = vmatprep.subr.bf16.mxu1 %v5617_v51  ;;  %2136 = vmatprep.subr.bf16.mxu0 %v5620_v52  ;;  %v5691_v51 = vld [vmem:[%s8117_s4 + $0xc0] ss:$40 sps:$4 sm:$0xff]   ;;  %v5696_v52 = vld [vmem:[%s8117_s4 + $0x114] ss:$40 sps:$4 sm:$0xff]  }
 0x377   :  { %2031 = vmatpush1.bf16.msra.mxu1 %v5615_v53  ;;  %2137 = vmatpush1.bf16.msra.mxu0 %v5618_v54  ;;  %v5694_v53 = vld [vmem:[%s8117_s4 + $0x110] ss:$40 sps:$4 sm:$0xff]   ;;  %v5699_v54 = vld [vmem:[%s8117_s4 + $0x164] ss:$40 sps:$4 sm:$0xff]  }
 0x378   :  { %2032 = vmatprep.subr.bf16.mxu1 %v5623_v55  ;;  %2138 = vmatprep.subr.bf16.mxu0 %v5626_v56  ;;  %v5697_v55 = vld [vmem:[%s8117_s4 + $0x160] ss:$40 sps:$4 sm:$0xff]   ;;  %v5702_v56 = vld [vmem:[%s8117_s4 + $0x1b4] ss:$40 sps:$4 sm:$0xff]  }
 0x37b   :  { %2033 = vmatpush1.bf16.msra.mxu1 %v5621_v57  ;;  %2139 = vmatpush1.bf16.msra.mxu0 %v5624_v61  ;;  %v5705_v57 = vld [vmem:[%s8117_s4 + $0x204] ss:$40 sps:$4 sm:$0xff]   ;;  %v5703_v61 = vld [vmem:[%s8117_s4 + $0x200] ss:$40 sps:$4 sm:$0xff]  }
 0x37c   :  { %2034 = vmatprep.subr.bf16.mxu1 %v5629_v63  ;;  %2140 = vmatprep.subr.bf16.mxu0 %v5632_v0  ;;  %v5708_v63 = vld [vmem:[%s8117_s4 + $0x254] ss:$40 sps:$4 sm:$0xff]   ;;  %v5706_v0 = vld [vmem:[%s8117_s4 + $0x250] ss:$40 sps:$4 sm:$0xff]  }
 0x37f   :  { %2035 = vmatpush1.bf16.msra.mxu1 %v5627_v2  ;;  %2141 = vmatpush1.bf16.msra.mxu0 %v5630_v5  ;;  %v5711_v2 = vld [vmem:[%s8117_s4 + $0x2a4] ss:$40 sps:$4 sm:$0xff]   ;;  %v5709_v5 = vld [vmem:[%s8117_s4 + $0x2a0] ss:$40 sps:$4 sm:$0xff]  }
 0x380   :  { %2036 = vmatprep.subr.bf16.mxu1 %v5635_v6  ;;  %2142 = vmatprep.subr.bf16.mxu0 %v5638_v10  ;;  %v5714_v6 = vld [vmem:[%s8117_s4 + $0x2f4] ss:$40 sps:$4 sm:$0xff]   ;;  %v5712_v10 = vld [vmem:[%s8117_s4 + $0x2f0] ss:$40 sps:$4 sm:$0xff]  }
 0x383   :  { %2037 = vmatpush1.bf16.msra.mxu1 %v5633_v11  ;;  %2143 = vmatpush1.bf16.msra.mxu0 %v5636_v13  ;;  %v5717_v11 = vld [vmem:[%s8117_s4 + $0x344] ss:$40 sps:$4 sm:$0xff]   ;;  %v5715_v13 = vld [vmem:[%s8117_s4 + $0x340] ss:$40 sps:$4 sm:$0xff]  }
 0x384   :  { %2038 = vmatprep.subr.bf16.mxu1 %v5641_v14  ;;  %2144 = vmatprep.subr.bf16.mxu0 %v5644_v15  ;;  %v5720_v14 = vld [vmem:[%s8117_s4 + $0x394] ss:$40 sps:$4 sm:$0xff]   ;;  %v5718_v15 = vld [vmem:[%s8117_s4 + $0x390] ss:$40 sps:$4 sm:$0xff]  }
 0x387   :  { %2039 = vmatpush1.bf16.msra.mxu1 %v5639_v16  ;;  %2145 = vmatpush1.bf16.msra.mxu0 %v5642_v18  ;;  %v5723_v16 = vld [vmem:[%s8117_s4 + $0x3e4] ss:$40 sps:$4 sm:$0xff]   ;;  %v5721_v18 = vld [vmem:[%s8117_s4 + $0x3e0] ss:$40 sps:$4 sm:$0xff]  }
 0x388   :  { %2040 = vmatprep.subr.bf16.mxu1 %v5647_v21  ;;  %2146 = vmatprep.subr.bf16.mxu0 %v5650_v23  ;;  %v5726_v21 = vld [vmem:[%s8117_s4 + $0x434] ss:$40 sps:$4 sm:$0xff]   ;;  %v5724_v23 = vld [vmem:[%s8117_s4 + $0x430] ss:$40 sps:$4 sm:$0xff]  }
 0x38b   :  { %2041 = vmatpush1.bf16.msra.mxu1 %v5645_v58  ;;  %2147 = vmatpush1.bf16.msra.mxu0 %v5648_v59  ;;  %v5729_v58 = vld [vmem:[%s8117_s4 + $0x484] ss:$40 sps:$4 sm:$0xff]   ;;  %v5727_v59 = vld [vmem:[%s8117_s4 + $0x480] ss:$40 sps:$4 sm:$0xff]  }
 0x38c   :  { %2042 = vmatprep.subr.bf16.mxu1 %v5653_v62  ;;  %2148 = vmatprep.subr.bf16.mxu0 %v5656_v24  ;;  %v5732_v62 = vld [vmem:[%s8117_s4 + $0x4d4] ss:$40 sps:$4 sm:$0xff]   ;;  %v5730_v24 = vld [vmem:[%s8117_s4 + $0x4d0] ss:$40 sps:$4 sm:$0xff]  }
 0x38f   :  { %2043 = vmatpush1.bf16.msra.mxu1 %v5651_v60  ;;  %2149 = vmatpush1.bf16.msra.mxu0 %v5654_v26  ;;  %v5735_v60 = vld [vmem:[%s8117_s4 + $0x524] ss:$40 sps:$4 sm:$0xff]   ;;  %v5733_v26 = vld [vmem:[%s8117_s4 + $0x520] ss:$40 sps:$4 sm:$0xff]  }
 0x390   :  { %2065 = vmatprep.subr.bf16.mxu1 %v5659_v27  ;;  %2171 = vmatprep.subr.bf16.mxu0 %v5662_v28  ;;  %v5738_v27 = vld [vmem:[%s8117_s4 + $0x574] ss:$40 sps:$4 sm:$0xff]   ;;  %v5736_v28 = vld [vmem:[%s8117_s4 + $0x570] ss:$40 sps:$4 sm:$0xff]  }
 0x392   :  { %2045 = vmatmul.mubr.bf16.vlgmr.msra.gmra.mrb[12].mxu1 %v6308_v34  ;;  %2151 = vmatmul.mubr.bf16.vlgmr.msra.gmra.mrb[16].mxu0 %v6308_v34 }
 0x393   :  { %2054 = vmatprep.mubr.bf16.mxu1 %v6383_v20  ;;  %2066 = vmatpush1.bf16.msra.mxu1 %v5657_v29  ;;  %v5741_v29 = vld [vmem:[%s8117_s4 + $0x5c4] ss:$40 sps:$4 sm:$0xff]  }
 0x394   :  { %2160 = vmatprep.mubr.bf16.mxu0 %v6383_v20  ;;  %2172 = vmatpush1.bf16.msra.mxu0 %v5660_v30  ;;  %v5739_v30 = vld [vmem:[%s8117_s4 + $0x5c0] ss:$40 sps:$4 sm:$0xff]  }
 0x395   :  { %2067 = vmatprep.subr.bf16.mxu1 %v5665_v3  ;;  %2173 = vmatprep.subr.bf16.mxu0 %v5668_v31  ;;  %v5742_v3 = vld [vmem:[%s8117_s4 + $0x610] ss:$40 sps:$4 sm:$0xff]  }
 0x397   :  { %2068 = vmatpush1.bf16.msra.mxu1 %v5663_v8 }
 0x398   :  { %2174 = vmatpush1.bf16.msra.mxu0 %v5666_v32  ;;  %2069 = vmatprep.subr.bf16.mxu1 %v5671_v12 }
 0x399   :  { %2175 = vmatprep.subr.bf16.mxu0 %v5674_v33 }
 0x39a   :  { %2055 = vmatmul.mubr.bf16.gmra.mrb[16].mxu1 %v6388_v22  ;;  %2161 = vmatmul.mubr.bf16.gmra.mrb[20].mxu0 %v6388_v22 }
 0x39b   :  { %2070 = vmatpush1.bf16.msra.mxu1 %v5669_v19  ;;  %2097 = vmatprep.mubr.bf16.mxu1 %v5802_v1 }
 0x39c   :  { %2176 = vmatpush1.bf16.msra.mxu0 %v5672_v35  ;;  %2071 = vmatprep.subr.bf16.mxu1 %v5677_v36 }
 0x39d   :  { %2177 = vmatprep.subr.bf16.mxu0 %v5680_v37  ;;  %2203 = vmatprep.mubr.bf16.mxu0 %v5802_v1 }
 0x39f   :  { %2072 = vmatpush1.bf16.msra.mxu1 %v5675_v40 }
 0x3a0   :  { %2178 = vmatpush1.bf16.msra.mxu0 %v5678_v41  ;;  %5078 = vmatprep.subr.msk.bf16.mxu1 %vm1769_vm3, %v5067_v42 }
 0x3a1   :  { %5081 = vmatprep.subr.msk.bf16.mxu0 %vm1769_vm3, %v5069_v44 }
 0x3a3   :  { %2074 = vmatpush1.bf16.msra.mxu1 %v1783_v46 }
 0x3a4   :  { %2180 = vmatpush1.bf16.msra.mxu0 %v1789_v17  ;;  %2224 = vmatprep.subr.bf16.mxu1 %v5687_v4 }
 0x3a6   :  { %5079 = vmatmul.mubr.msk.bf16.vlgmr.msra.gmra.mrb[12].mxu1 %vm500_vm2, %v6408_v25 }
 0x3a7   :  { %5082 = vmatmul.mubr.msk.bf16.vlgmr.msra.gmra.mrb[16].mxu0 %vm500_vm2, %v6408_v25  ;;  %2225 = vmatpush1.bf16.msra.mxu1 %v5685_v47 }
 0x3a8   :  { %2226 = vmatprep.subr.bf16.mxu1 %v5690_v48  ;;  %2107 = vmatprep.mubr.bf16.mxu1 %v5802_v1 }
 0x3a9   :  { %2213 = vmatprep.mubr.bf16.mxu0 %v5802_v1 }
 0x3ab   :  { %2227 = vmatpush1.bf16.msra.mxu1 %v5688_v49 }
 0x3ac   :  { %2228 = vmatprep.subr.bf16.mxu1 %v5693_v50 }
 0x3ae   :  { %5080 = vmatmul.mubr.msk.bf16.gmra.mrb[16].mxu1 %vm500_vm2, %v6434_v7 }
 0x3af   :  { %5083 = vmatmul.mubr.msk.bf16.gmra.mrb[20].mxu0 %vm500_vm2, %v6434_v7  ;;  %2229 = vmatpush1.bf16.msra.mxu1 %v5691_v51 }
 0x3b0   :  { %2256 = vmatprep.mubr.bf16.mxu1 %v6310_v9  ;;  %2230 = vmatprep.subr.bf16.mxu1 %v5696_v52  ;;  %v5700_v9 = vld [vmem:[%s8117_s4 + $0x1b0] ss:$40 sps:$4 sm:$0xff]  }
 0x3b3   :  { %2231 = vmatpush1.bf16.msra.mxu1 %v5694_v53 }
 0x3b4   :  { %2232 = vmatprep.subr.bf16.mxu1 %v5699_v54 }
 0x3b7   :  { %2233 = vmatpush1.bf16.msra.mxu1 %v5697_v55 }
 0x3b8   :  { %2234 = vmatprep.subr.bf16.mxu1 %v5702_v56 }
 0x3bb   :  { %2235 = vmatpush1.bf16.msra.mxu1 %v5700_v9 }
 0x3bc   :  { %2236 = vmatprep.subr.bf16.mxu1 %v5705_v57 }
 0x3bf   :  { %2237 = vmatpush1.bf16.msra.mxu1 %v5703_v61 }
 0x3c0   :  { %2238 = vmatprep.subr.bf16.mxu1 %v5708_v63 }
 0x3c3   :  { %2239 = vmatpush1.bf16.msra.mxu1 %v5706_v0 }
 0x3c4   :  { %2240 = vmatprep.subr.bf16.mxu1 %v5711_v2 }
 0x3c7   :  { %2241 = vmatpush1.bf16.msra.mxu1 %v5709_v5 }
 0x3c8   :  { %2242 = vmatprep.subr.bf16.mxu1 %v5714_v6 }
 0x3cb   :  { %2243 = vmatpush1.bf16.msra.mxu1 %v5712_v10 }
 0x3cc   :  { %2244 = vmatprep.subr.bf16.mxu1 %v5717_v11 }
 0x3cf   :  { %2245 = vmatpush1.bf16.msra.mxu1 %v5715_v13 }
 0x3d0   :  { %2246 = vmatprep.subr.bf16.mxu1 %v5720_v14 }
 0x3d3   :  { %2247 = vmatpush1.bf16.msra.mxu1 %v5718_v15 }
 0x3d4   :  { %2248 = vmatprep.subr.bf16.mxu1 %v5723_v16 }
 0x3d7   :  { %2249 = vmatpush1.bf16.msra.mxu1 %v5721_v18 }
 0x3d8   :  { %2250 = vmatprep.subr.bf16.mxu1 %v5726_v21 }
 0x3db   :  { %2251 = vmatpush1.bf16.msra.mxu1 %v5724_v23 }
 0x3dc   :  { %2252 = vmatprep.subr.bf16.mxu1 %v5729_v58 }
 0x3df   :  { %2253 = vmatpush1.bf16.msra.mxu1 %v5727_v59 }
 0x3e0   :  { %2254 = vmatprep.subr.bf16.mxu1 %v5732_v62 }
 0x3e3   :  { %2255 = vmatpush1.bf16.msra.mxu1 %v5730_v24 }
 0x3e4   :  { %2277 = vmatprep.subr.bf16.mxu1 %v5735_v60 }
 0x3e6   :  { %2257 = vmatmul.mubr.bf16.vlgmr.msra.gmra.mrb[20].mxu1 %v6308_v34  ;;  %v5744_v34 = vld [vmem:[%s8117_s4 + $0x614] ss:$40 sps:$4 sm:$0xff]  }
 0x3e7   :  { %2266 = vmatprep.mubr.bf16.mxu1 %v6383_v20  ;;  %2278 = vmatpush1.bf16.msra.mxu1 %v5733_v26  ;;  %v737_v20 = vld [vmem:[%s8117_s4 + $0x660] sm:$0x33]  ;;  %s5804_s4 = smov 11  }
 0x3e8   :  { %2279 = vmatprep.subr.bf16.mxu1 %v5738_v27  ;;  %v5071_v31 = vcombine.high %v737_v20, %v737_v20  ;;  %v5070_v8 = vcombine.low %v737_v20, %v737_v20 }
 0x3ea   :  { %v1795_v32 = vsel %vm1769_vm3, %v5070_v8, 0 }
 0x3eb   :  { %2280 = vmatpush1.bf16.msra.mxu1 %v5736_v28 }
 0x3ec   :  { %2281 = vmatprep.subr.bf16.mxu1 %v5741_v29 }
 0x3ee   :  { %2267 = vmatmul.mubr.bf16.gmra.mrb[24].mxu1 %v6388_v22 }
 0x3ef   :  { %2282 = vmatpush1.bf16.msra.mxu1 %v5739_v30  ;;  %2309 = vmatprep.mubr.bf16.mxu1 %v5802_v1 }
 0x3f0   :  { %2283 = vmatprep.subr.bf16.mxu1 %v5744_v34 }
 0x3f3   :  { %2284 = vmatpush1.bf16.msra.mxu1 %v5742_v3 }
 0x3f4   :  { %5084 = vmatprep.subr.msk.bf16.mxu1 %vm1769_vm3, %v5071_v31  ;;  %vm2747_vm3 = vcmask 515072  }
 0x3f7   :  { %2286 = vmatpush1.bf16.msra.mxu1 %v1795_v32 }
 0x3fa   :  { %5085 = vmatmul.mubr.msk.bf16.vlgmr.msra.gmra.mrb[20].mxu1 %vm500_vm2, %v6408_v25 }
 0x3fb   :  { %2319 = vmatprep.mubr.bf16.mxu1 %v5802_v1 }
 0x402   :  { %5086 = vmatmul.mubr.msk.bf16.gmra.mrb[24].mxu1 %vm500_vm2, %v6434_v7  ;;  %vm2631_vm2 = vcmask 424960  }
 0x425   :  { %v1887_v22 = vpop.f32.mrb[4].mxu1  ;;  %v1993_v12 = vpop.f32.mrb[8].mxu0 }
 0x426   :  { %2331 = vst.msk [vmem:[#allocation3] sm:$0xff] %vm2330_vm5, %v1887_v22  ;;  %2426 = vrot.lane.b32.xlu0 %v1993_v12, %s5804_s4  ;;  %v1995_v33 = vpop.f32.mrb[9].mxu0  ;;  %2346 = vrot.lane.b32.xlu1 %v1887_v22, %s5805_s29  ;;  %v1889_v19 = vpop.f32.mrb[5].mxu1 }
 0x427   :  { %v1891_v35 = vpop.f32.mrb[6].mxu1  ;;  %v1997_v25 = vpop.f32.mrb[10].mxu0 }
 0x428   :  { %2332 = vst.msk [vmem:[#allocation3 + $0x8] sm:$0xff] %vm2330_vm5, %v1891_v35  ;;  %v1893_v36 = vpop.f32.mrb[7].mxu1  ;;  %v1999_v37 = vpop.f32.mrb[11].mxu0 }
 0x42a   :  { %2358 = vrot.lane.b32.xlu1 %v1887_v22, %s5806_s30  ;;  %2360 = vrot.lane.b32.xlu0 %v1889_v19, %s5806_s30 }
 0x42d   :  { %v6815_v7 = vpop.f32.mrb[8].mxu1  ;;  %v2003_v38 = vpop.f32.mrb[12].mxu0 }
 0x42e   :  { %v2005_v39 = vpop.f32.mrb[13].mxu0  ;;  %2456 = vrot.lane.b32.xlu1 %v1993_v12, %s5807_s1  ;;  %2476 = vrot.lane.b32.xlu0 %v1995_v33, %s5808_s15  ;;  %v1899_v40 = vpop.f32.mrb[9].mxu1 }
 0x42f   :  { %v6819_v41 = vpop.f32.mrb[10].mxu1  ;;  %v6821_v42 = vpop.f32.mrb[14].mxu0 }
 0x430   :  { %v6823_v43 = vpop.f32.mrb[11].mxu1  ;;  %v6825_v44 = vpop.f32.mrb[15].mxu0 }
 0x432   :  { %2474 = vrot.lane.b32.xlu1 %v1993_v12, %s5808_s15  ;;  %2348 = vrot.lane.b32.xlu0 %v1891_v35, %s5805_s29 }
 0x436   :  { %2506 = vrot.lane.b32.xlu1 %v1995_v33, %s5809_s16  ;;  %2430 = vrot.lane.b32.xlu0 %v1997_v25, %s5804_s4 }
 0x43a   :  { %2522 = vrot.lane.b32.xlu1 %v1995_v33, %s5810_s17  ;;  %2458 = vrot.lane.b32.xlu0 %v1997_v25, %s5807_s1 }
 0x43e   :  { %2540 = vrot.lane.b32.xlu1 %v1995_v33, %s5811_s18  ;;  %2508 = vrot.lane.b32.xlu0 %v1999_v37, %s5809_s16 }
 0x442   :  { %2390 = vrot.lane.b32.xlu1 %v1889_v19, %s5812_s19  ;;  %2524 = vrot.lane.b32.xlu0 %v1999_v37, %s5810_s17 }
 0x446   :  { %2406 = vrot.lane.b32.xlu1 %v1889_v19, %s5803_s25  ;;  %2364 = vrot.lane.b32.xlu0 %v1893_v36, %s5806_s30 }
 0x44a   :  { %2424 = vrot.lane.b32.xlu1 %v1889_v19, %s5804_s4  ;;  %2392 = vrot.lane.b32.xlu0 %v1893_v36, %s5812_s19 }
 0x44e   :  { %2362 = vrot.lane.b32.xlu1 %v1891_v35, %s5806_s30  ;;  %2408 = vrot.lane.b32.xlu0 %v1893_v36, %s5803_s25 }
 0x452   :  { %2478 = vrot.lane.b32.xlu1 %v1997_v25, %s5808_s15  ;;  %2480 = vrot.lane.b32.xlu0 %v1999_v37, %s5808_s15 }
 0x456   :  { %2544 = vrot.lane.b32.xlu1 %v1999_v37, %s5811_s18  ;;  %2443 = vrot.lane.b32.xlu0 %v2003_v38, %s5803_s25 }
 0x45a   :  { %2428 = vrot.lane.b32.xlu1 %v1893_v36, %s5804_s4  ;;  %2377 = vrot.lane.b32.xlu0 %v1899_v40, %s5805_s29 }
 0x45e   :  { %2335 = vrot.lane.b32.xlu1 %v6815_v7, %s5813_s20  ;;  %2493 = vrot.lane.b32.xlu0 %v2005_v39, %s5807_s1 }
 0x462   :  { %2375 = vrot.lane.b32.xlu1 %v6815_v7, %s5805_s29  ;;  %2337 = vrot.lane.b32.xlu0 %v6819_v41, %s5813_s20  ;;  %s5840_s20 = smov 72  }
 0x466   :  { %2464 = vrot.lane.b32.xlu1 %v2003_v38, %s5804_s4  ;;  %2447 = vrot.lane.b32.xlu0 %v6821_v42, %s5803_s25 }
 0x46a   :  { %2491 = vrot.lane.b32.xlu1 %v2003_v38, %s5807_s1  ;;  %2466 = vrot.lane.b32.xlu0 %v6821_v42, %s5804_s4  ;;  %s5824_s4 = smov 25  }
 0x46e   :  { %2514 = vrot.lane.b32.xlu1 %v2005_v39, %s5808_s15  ;;  %2516 = vrot.lane.b32.xlu0 %v6825_v44, %s5808_s15  ;;  %s5825_s15 = smov 123  }
 0x472   :  { %2530 = vrot.lane.b32.xlu1 %v2005_v39, %s5809_s16  ;;  %2532 = vrot.lane.b32.xlu0 %v6825_v44, %s5809_s16 }
 0x476   :  { %2557 = vrot.lane.b32.xlu1 %v2005_v39, %s5810_s17  ;;  %2381 = vrot.lane.b32.xlu0 %v6823_v43, %s5805_s29 }
 0x479   :  { %v2099_v45 = vpop.f32.mrb[12].mxu1 }
 0x47a   :  { %v6869_v46 = vpop.f32.mrb[16].mxu0  ;;  %v6871_v4 = vpop.f32.mrb[13].mxu1  ;;  %2398 = vrot.lane.b32.xlu1 %v1899_v40, %s5806_s30  ;;  %2400 = vrot.lane.b32.xlu0 %v6823_v43, %s5806_s30  ;;  %s5834_s30 = smov 80  }
 0x47b   :  { %v6876_v17 = vpop.f32.mrb[17].mxu0  ;;  %v6878_v47 = vpop.f32.mrb[14].mxu1 }
 0x47c   :  { %v6880_v48 = vpop.f32.mrb[18].mxu0  ;;  %v6882_v49 = vpop.f32.mrb[15].mxu1 }
 0x47d   :  { %v6884_v50 = vpop.f32.mrb[19].mxu0 }
 0x47e   :  { %2414 = vrot.lane.b32.xlu1 %v1899_v40, %s5812_s19  ;;  %2416 = vrot.lane.b32.xlu0 %v6823_v43, %s5812_s19  ;;  %s5839_s19 = smov 56  }
 0x481   :  { %v6889_v51 = vpop.f32.mrb[16].mxu1 }
 0x482   :  { %v6891_v52 = vpop.f32.mrb[20].mxu0  ;;  %v6893_v53 = vpop.f32.mrb[17].mxu1  ;;  %2441 = vrot.lane.b32.xlu1 %v1899_v40, %s5803_s25  ;;  %2497 = vrot.lane.b32.xlu0 %v6825_v44, %s5807_s1 }
 0x483   :  { %v6898_v54 = vpop.f32.mrb[21].mxu0  ;;  %v6900_v55 = vpop.f32.mrb[18].mxu1 }
 0x484   :  { %v6902_v56 = vpop.f32.mrb[22].mxu0  ;;  %v6904_v9 = vpop.f32.mrb[19].mxu1 }
 0x485   :  { %v6906_v57 = vpop.f32.mrb[23].mxu0 }
 0x486   :  { %2379 = vrot.lane.b32.xlu1 %v6819_v41, %s5805_s29  ;;  %2542 = vrot.lane.b32.xlu0 %v2099_v45, %s5811_s18 }
 0x48a   :  { %2495 = vrot.lane.b32.xlu1 %v6821_v42, %s5807_s1  ;;  %2658 = vrot.lane.b32.xlu0 %v6869_v46, %s5814_s21  ;;  %s5835_s1 = smov 96  }
 0x48e   :  { %2561 = vrot.lane.b32.xlu1 %v6825_v44, %s5810_s17  ;;  %2608 = vrot.lane.b32.xlu0 %v6871_v4, %s5815_s22 }
 0x492   :  { %2445 = vrot.lane.b32.xlu1 %v6823_v43, %s5803_s25  ;;  %2724 = vrot.lane.b32.xlu0 %v6876_v17, %s5816_s23 }
 0x496   :  { %2572 = vrot.lane.b32.xlu1 %v2099_v45, %s5817_s24  ;;  %2546 = vrot.lane.b32.xlu0 %v6878_v47, %s5811_s18 }
 0x498   :  { %v6926_v61 = vpop.permute.xlu0 %2426  ;;  %v2347_v63 = vpop.permute.xlu1 %2346 }
 0x499   :  { %2352 = vst.msk [vmem:[#allocation3 + $0x10] sm:$0xff] %vm2330_vm5, %v2347_v63 }
 0x49a   :  { %2354 = vst.msk [vmem:[#allocation3 + $0x10] sm:$0xff] %vm2341_vm6, %v6815_v7  ;;  %2588 = vrot.lane.b32.xlu1 %v2099_v45, %s5818_s0  ;;  %2574 = vrot.lane.b32.xlu0 %v6878_v47, %s5817_s24 }
 0x49c   :  { %v2359_v0 = vpop.permute.xlu1 %2358  ;;  %v2361_v2 = vpop.permute.xlu0 %2360 }
 0x49d   :  { %v2367_v5 = vsel %vm2366_vm7, %v2359_v0, %v2361_v2 }
 0x49e   :  { %2371 = vst.msk [vmem:[#allocation3 + $0x20] sm:$0xff] %vm2330_vm5, %v2367_v5  ;;  %2606 = vrot.lane.b32.xlu1 %v2099_v45, %s5815_s22  ;;  %2590 = vrot.lane.b32.xlu0 %v6878_v47, %s5818_s0 }
 0x4a0   :  { %v2457_v6 = vpop.permute.xlu1 %2456  ;;  %v2477_v10 = vpop.permute.xlu0 %2476 }
 0x4a1   :  { %2462 = vst.msk [vmem:[#allocation3 + $0x60] sm:$0xff] %vm2330_vm5, %v2457_v6 }
 0x4a2   :  { %2688 = vrot.lane.b32.xlu1 %v6869_v46, %s5819_s3  ;;  %2662 = vrot.lane.b32.xlu0 %v6880_v48, %s5814_s21 }
 0x4a4   :  { %v2475_v11 = vpop.permute.xlu1 %2474  ;;  %v2349_v13 = vpop.permute.xlu0 %2348 }
 0x4a5   :  { %v2483_v14 = vsel %vm2482_vm8, %v2475_v11, %v2477_v10  ;;  %2353 = vst.msk [vmem:[#allocation3 + $0x18] sm:$0xff] %vm2330_vm5, %v2349_v13 }
 0x4a6   :  { %2487 = vst.msk [vmem:[#allocation3 + $0x70] sm:$0xff] %vm2330_vm5, %v2483_v14  ;;  %2704 = vrot.lane.b32.xlu1 %v6869_v46, %s5820_s26  ;;  %2690 = vrot.lane.b32.xlu0 %v6880_v48, %s5819_s3 }
 0x4a7   :  { %2355 = vst.msk [vmem:[#allocation3 + $0x18] sm:$0xff] %vm2341_vm6, %v6819_v41 }
 0x4a8   :  { %v2507_v15 = vpop.permute.xlu1 %2506  ;;  %v2431_v16 = vpop.permute.xlu0 %2430 }
 0x4a9   :  { %2512 = vst.msk [vmem:[#allocation3 + $0x80] sm:$0xff] %vm2330_vm5, %v2507_v15 }
 0x4aa   :  { %2722 = vrot.lane.b32.xlu1 %v6869_v46, %s5816_s23  ;;  %2706 = vrot.lane.b32.xlu0 %v6880_v48, %s5820_s26 }
 0x4ac   :  { %v2523_v18 = vpop.permute.xlu1 %2522  ;;  %v2459_v21 = vpop.permute.xlu0 %2458 }
 0x4ad   :  { %2528 = vst.msk [vmem:[#allocation3 + $0x90] sm:$0xff] %vm2330_vm5, %v2523_v18  ;;  %2463 = vst.msk [vmem:[#allocation3 + $0x68] sm:$0xff] %vm2330_vm5, %v2459_v21  ;;  %v2896_v18 = vld [vmem:[#allocation3 + $0x10] sm:$0xff] }
 0x4ae   :  { %2638 = vrot.lane.b32.xlu1 %v6871_v4, %s5821_s27  ;;  %2612 = vrot.lane.b32.xlu0 %v6882_v49, %s5815_s22  ;;  %v2897_v14 = vld [vmem:[#allocation3 + $0x18] sm:$0xff] }
 0x4af   :  { %v2945_v21 = vpack.c.bf16 %v2897_v14, %v2896_v18 }
 0x4b0   :  { %v6964_v23 = vpop.permute.xlu1 %2540  ;;  %v2509_v58 = vpop.permute.xlu0 %2508 }
 0x4b1   :  { %2513 = vst.msk [vmem:[#allocation3 + $0x88] sm:$0xff] %vm2330_vm5, %v2509_v58 }
 0x4b2   :  { %2656 = vrot.lane.b32.xlu1 %v6871_v4, %s5814_s21  ;;  %2640 = vrot.lane.b32.xlu0 %v6882_v49, %s5821_s27 }
 0x4b4   :  { %v2391_v59 = vpop.permute.xlu1 %2390  ;;  %v2525_v62 = vpop.permute.xlu0 %2524 }
 0x4b5   :  { %2396 = vst.msk [vmem:[#allocation3 + $0x30] sm:$0xff] %vm2330_vm5, %v2391_v59  ;;  %2529 = vst.msk [vmem:[#allocation3 + $0x98] sm:$0xff] %vm2330_vm5, %v2525_v62 }
 0x4b6   :  { %2754 = vrot.lane.b32.xlu1 %v6876_v17, %s5822_s28  ;;  %2728 = vrot.lane.b32.xlu0 %v6884_v50, %s5816_s23 }
 0x4b8   :  { %v2407_v24 = vpop.permute.xlu1 %2406  ;;  %v2365_v60 = vpop.permute.xlu0 %2364 }
 0x4b9   :  { %2412 = vst.msk [vmem:[#allocation3 + $0x40] sm:$0xff] %vm2330_vm5, %v2407_v24 }
 0x4ba   :  { %2772 = vrot.lane.b32.xlu1 %v6876_v17, %s5823_s2  ;;  %2756 = vrot.lane.b32.xlu0 %v6884_v50, %s5822_s28 }
 0x4bc   :  { %v2425_v26 = vpop.permute.xlu1 %2424  ;;  %v2393_v27 = vpop.permute.xlu0 %2392 }
 0x4bd   :  { %v2433_v28 = vsel %vm2432_vm9, %v2425_v26, %v6926_v61  ;;  %2397 = vst.msk [vmem:[#allocation3 + $0x38] sm:$0xff] %vm2330_vm5, %v2393_v27 }
 0x4be   :  { %2437 = vst.msk [vmem:[#allocation3 + $0x50] sm:$0xff] %vm2330_vm5, %v2433_v28  ;;  %2610 = vrot.lane.b32.xlu1 %v6878_v47, %s5815_s22  ;;  %2559 = vrot.lane.b32.xlu0 %v6889_v51, %s5810_s17 }
 0x4c0   :  { %v2363_v29 = vpop.permute.xlu1 %2362  ;;  %v2409_v30 = vpop.permute.xlu0 %2408 }
 0x4c1   :  { %v2368_v34 = vsel %vm2366_vm7, %v2363_v29, %v2365_v60  ;;  %2413 = vst.msk [vmem:[#allocation3 + $0x48] sm:$0xff] %vm2330_vm5, %v2409_v30  ;;  %vm2780_vm7 = vcmask 359424  }
 0x4c2   :  { %2372 = vst.msk [vmem:[#allocation3 + $0x28] sm:$0xff] %vm2330_vm5, %v2368_v34  ;;  %2726 = vrot.lane.b32.xlu1 %v6880_v48, %s5816_s23  ;;  %2675 = vrot.lane.b32.xlu0 %v6891_v52, %s5821_s27 }
 0x4c4   :  { %v2479_v20 = vpop.permute.xlu1 %2478  ;;  %v2481_v3 = vpop.permute.xlu0 %2480 }
 0x4c5   :  { %v2484_v31 = vsel %vm2482_vm8, %v2479_v20, %v2481_v3  ;;  %vm2846_vm8 = vcmask 203776  }
 0x4c6   :  { %2488 = vst.msk [vmem:[#allocation3 + $0x78] sm:$0xff] %vm2330_vm5, %v2484_v31  ;;  %2660 = vrot.lane.b32.xlu1 %v6882_v49, %s5814_s21  ;;  %2625 = vrot.lane.b32.xlu0 %v6893_v53, %s5818_s0 }
 0x4c8   :  { %v7003_v8 = vpop.permute.xlu1 %2544  ;;  %v7005_v32 = vpop.permute.xlu0 %2443 }
 0x4ca   :  { %2776 = vrot.lane.b32.xlu1 %v6884_v50, %s5823_s2  ;;  %2741 = vrot.lane.b32.xlu0 %v6898_v54, %s5820_s26 }
 0x4cc   :  { %v2429_v22 = vpop.permute.xlu1 %2428  ;;  %v2378_v12 = vpop.permute.xlu0 %2377 }
 0x4cd   :  { %v2434_v33 = vsel %vm2432_vm9, %v2429_v22, %v2431_v16  ;;  %v7012_v19 = vpop.f32.mrb[20].mxu1  ;;  %vm2797_vm9 = vcmask 760832  }
 0x4ce   :  { %2438 = vst.msk [vmem:[#allocation3 + $0x58] sm:$0xff] %vm2330_vm5, %v2434_v33  ;;  %v7015_v35 = vpop.f32.mrb[21].mxu1  ;;  %2580 = vrot.lane.b32.xlu1 %v6889_v51, %s5811_s18  ;;  %2563 = vrot.lane.b32.xlu0 %v6900_v55, %s5810_s17  ;;  %s5826_s17 = smov 74  }
 0x4cf   :  { %v7021_v25 = vpop.f32.mrb[22].mxu1 }
 0x4d0   :  { %v7023_v36 = vpop.f32.mrb[23].mxu1  ;;  %v2336_v37 = vpop.permute.xlu1 %2335 }
 0x4d1   :  { %2342 = vst.msk [vmem:[#allocation3] sm:$0xff] %vm2341_vm6, %v2336_v37  ;;  %v2494_v7 = vpop.permute.xlu0 %2493 }
 0x4d2   :  { %2596 = vrot.lane.b32.xlu1 %v6889_v51, %s5817_s24  ;;  %2582 = vrot.lane.b32.xlu0 %v6900_v55, %s5811_s18  ;;  %s5827_s18 = smov 104  }
 0x4d4   :  { %v2376_v38 = vpop.permute.xlu1 %2375 }
 0x4d5   :  { %v2384_v39 = vsel %vm2383_vm10, %v2376_v38, %v2378_v12  ;;  %v2338_v40 = vpop.permute.xlu0 %2337  ;;  %v7031_v41 = vpop.f32.mrb[24].mxu1 }
 0x4d6   :  { %2388 = vst.msk [vmem:[#allocation3 + $0x20] sm:$0xff] %vm2341_vm6, %v2384_v39  ;;  %2343 = vst.msk [vmem:[#allocation3 + $0x8] sm:$0xff] %vm2341_vm6, %v2338_v40  ;;  %v7035_v42 = vpop.f32.mrb[25].mxu1  ;;  %2623 = vrot.lane.b32.xlu1 %v6889_v51, %s5818_s0  ;;  %2598 = vrot.lane.b32.xlu0 %v6900_v55, %s5817_s24  ;;  %s5845_s24 = smov 4  }
 0x4d7   :  { %v7041_v43 = vpop.f32.mrb[26].mxu1 }
 0x4d8   :  { %v7043_v44 = vpop.f32.mrb[27].mxu1  ;;  %v2465_v45 = vpop.permute.xlu1 %2464  ;;  %v2894_v6 = vld [vmem:[#allocation3] sm:$0xff] }
 0x4d9   :  { %2470 = vst.msk [vmem:[#allocation3 + $0x60] sm:$0xff] %vm2341_vm6, %v2465_v45  ;;  %v7046_v46 = vpop.permute.xlu0 %2447 }
 0x4da   :  { %2696 = vrot.lane.b32.xlu1 %v6891_v52, %s5814_s21  ;;  %2679 = vrot.lane.b32.xlu0 %v6902_v56, %s5821_s27 }
 0x4dc   :  { %v2492_v4 = vpop.permute.xlu1 %2491 }
 0x4dd   :  { %v2500_v17 = vsel %vm2499_vm11, %v2492_v4, %v2494_v7  ;;  %v2467_v47 = vpop.permute.xlu0 %2466  ;;  %v2895_v0 = vld [vmem:[#allocation3 + $0x8] sm:$0xff] }
 0x4de   :  { %2504 = vst.msk [vmem:[#allocation3 + $0x70] sm:$0xff] %vm2341_vm6, %v2500_v17  ;;  %2471 = vst.msk [vmem:[#allocation3 + $0x68] sm:$0xff] %vm2341_vm6, %v2467_v47  ;;  %2712 = vrot.lane.b32.xlu1 %v6891_v52, %s5819_s3  ;;  %2698 = vrot.lane.b32.xlu0 %v6902_v56, %s5814_s21  ;;  %v2944_v10 = vpack.c.bf16 %v2895_v0, %v2894_v6  ;;  %s5842_s21 = smov 36  }
 0x4e0   :  { %v2515_v48 = vpop.permute.xlu1 %2514 }
 0x4e1   :  { %2520 = vst.msk [vmem:[#allocation3 + $0x80] sm:$0xff] %vm2341_vm6, %v2515_v48  ;;  %v2517_v49 = vpop.permute.xlu0 %2516 }
 0x4e2   :  { %2521 = vst.msk [vmem:[#allocation3 + $0x88] sm:$0xff] %vm2341_vm6, %v2517_v49  ;;  %2739 = vrot.lane.b32.xlu1 %v6891_v52, %s5820_s26  ;;  %2714 = vrot.lane.b32.xlu0 %v6902_v56, %s5819_s3 }
 0x4e4   :  { %v2531_v50 = vpop.permute.xlu1 %2530 }
 0x4e5   :  { %2536 = vst.msk [vmem:[#allocation3 + $0x90] sm:$0xff] %vm2341_vm6, %v2531_v50  ;;  %v2533_v51 = vpop.permute.xlu0 %2532 }
 0x4e6   :  { %2537 = vst.msk [vmem:[#allocation3 + $0x98] sm:$0xff] %vm2341_vm6, %v2533_v51  ;;  %2646 = vrot.lane.b32.xlu1 %v6893_v53, %s5815_s22  ;;  %2629 = vrot.lane.b32.xlu0 %v6904_v9, %s5818_s0 }
 0x4e8   :  { %v7071_v61 = vpop.permute.xlu1 %2557  ;;  %v2910_v63 = vld [vmem:[#allocation3 + $0x80] sm:$0xff] }
 0x4e9   :  { %v2382_v52 = vpop.permute.xlu0 %2381  ;;  %v2911_v2 = vld [vmem:[#allocation3 + $0x88] sm:$0xff] }
 0x4ea   :  { %2673 = vrot.lane.b32.xlu1 %v6893_v53, %s5821_s27  ;;  %2648 = vrot.lane.b32.xlu0 %v6904_v9, %s5815_s22  ;;  %v2952_v5 = vpack.c.bf16 %v2911_v2, %v2910_v63  ;;  %s5843_s22 = smov 68  }
 0x4ec   :  { %5121 = vmatprep.subr.bf16.mxu0 %v2952_v5  ;;  %v2399_v11 = vpop.permute.xlu1 %2398  ;;  %v2912_v13 = vld [vmem:[#allocation3 + $0x90] sm:$0xff] }
 0x4ed   :  { %2404 = vst.msk [vmem:[#allocation3 + $0x30] sm:$0xff] %vm2341_vm6, %v2399_v11  ;;  %5122 = vmatpush3.bf16.msra.mxu0 %v2944_v10  ;;  %v2401_v15 = vpop.permute.xlu0 %2400  ;;  %v2913_v16 = vld [vmem:[#allocation3 + $0x98] sm:$0xff] }
 0x4ee   :  { %2405 = vst.msk [vmem:[#allocation3 + $0x38] sm:$0xff] %vm2341_vm6, %v2401_v15  ;;  %2762 = vrot.lane.b32.xlu1 %v6898_v54, %s5816_s23  ;;  %2745 = vrot.lane.b32.xlu0 %v6906_v57, %s5820_s26  ;;  %v2953_v53 = vpack.c.bf16 %v2913_v16, %v2912_v13 }
 0x4f0   :  { %5123 = vmatprep.subr.bf16.mxu0 %v2953_v53  ;;  %v2415_v58 = vpop.permute.xlu1 %2414 }
 0x4f1   :  { %2420 = vst.msk [vmem:[#allocation3 + $0x40] sm:$0xff] %vm2341_vm6, %v2415_v58  ;;  %5124 = vmatpush3.bf16.msra.mxu0 %v2945_v21  ;;  %v2417_v59 = vpop.permute.xlu0 %2416 }
 0x4f2   :  { %2421 = vst.msk [vmem:[#allocation3 + $0x48] sm:$0xff] %vm2341_vm6, %v2417_v59  ;;  %2789 = vrot.lane.b32.xlu1 %v6898_v54, %s5822_s28  ;;  %2764 = vrot.lane.b32.xlu0 %v6906_v57, %s5816_s23  ;;  %s5844_s23 = smov 84  }
 0x4f4   :  { %v2442_v62 = vpop.permute.xlu1 %2441 }
 0x4f5   :  { %v2450_v24 = vsel %vm517_vm4, %v2442_v62, %v7005_v32  ;;  %v2498_v60 = vpop.permute.xlu0 %2497 }
 0x4f6   :  { %2454 = vst.msk [vmem:[#allocation3 + $0x50] sm:$0xff] %vm2341_vm6, %v2450_v24  ;;  %2627 = vrot.lane.b32.xlu1 %v6900_v55, %s5818_s0  ;;  %2774 = vrot.lane.b32.xlu0 %v7012_v19, %s5823_s2  ;;  %v2898_v24 = vld [vmem:[#allocation3 + $0x20] sm:$0xff] }
 0x4f8   :  { %v2380_v26 = vpop.permute.xlu1 %2379 }
 0x4f9   :  { %v2385_v54 = vsel %vm2383_vm10, %v2380_v26, %v2382_v52  ;;  %v2543_v27 = vpop.permute.xlu0 %2542  ;;  %vm3007_vm10 = vcmask 130048  }
 0x4fa   :  { %2389 = vst.msk [vmem:[#allocation3 + $0x28] sm:$0xff] %vm2341_vm6, %v2385_v54  ;;  %v2549_v28 = vsel %vm2548_vm12, %v6964_v23, %v2543_v27  ;;  %2743 = vrot.lane.b32.xlu1 %v6902_v56, %s5820_s26  ;;  %2840 = vrot.lane.b32.xlu0 %v7015_v35, %s5824_s4  ;;  %v5749_v56 = vld [vmem:[%s8119_s5 + $0x4] ss:$16 sps:$4 sm:$0xff]   ;;  %s5830_s26 = smov 100  }
 0x4fb   :  { %2553 = vst.msk [vmem:[#allocation3 + $0xa0] sm:$0xff] %vm2330_vm5, %v2549_v28  ;;  %3046 = vmatprep.mubr.bf16.mxu0 %v5749_v56  ;;  %v2900_v54 = vld [vmem:[#allocation3 + $0x30] sm:$0xff] }
 0x4fc   :  { %v2496_v55 = vpop.permute.xlu1 %2495 }
 0x4fd   :  { %v2501_v29 = vsel %vm2499_vm11, %v2496_v55, %v2498_v60  ;;  %v7106_v30 = vpop.permute.xlu0 %2658  ;;  %vm2863_vm11 = vcmask 605184  }
 0x4fe   :  { %2505 = vst.msk [vmem:[#allocation3 + $0x78] sm:$0xff] %vm2341_vm6, %v2501_v29  ;;  %2677 = vrot.lane.b32.xlu1 %v6904_v9, %s5821_s27  ;;  %2778 = vrot.lane.b32.xlu0 %v7021_v25, %s5823_s2  ;;  %v2901_v29 = vld [vmem:[#allocation3 + $0x38] sm:$0xff]  ;;  %s5831_s27 = smov 116  }
 0x500   :  { %v7116_v23 = vpop.permute.xlu1 %2561 }
 0x501   :  { %v2609_v34 = vpop.permute.xlu0 %2608  ;;  %v2899_v21 = vld [vmem:[#allocation3 + $0x28] sm:$0xff] }
 0x502   :  { %2793 = vrot.lane.b32.xlu1 %v6906_v57, %s5822_s28  ;;  %2806 = vrot.lane.b32.xlu0 %v7021_v25, %s5825_s15  ;;  %v2946_v26 = vpack.c.bf16 %v2899_v21, %v2898_v24 }
 0x504   :  { %v2446_v20 = vpop.permute.xlu1 %2445 }
 0x505   :  { %v2451_v9 = vsel %vm517_vm4, %v2446_v20, %v7046_v46  ;;  %v2725_v3 = vpop.permute.xlu0 %2724  ;;  %vm2681_vm4 = vcmask 670720  }
 0x506   :  { %2455 = vst.msk [vmem:[#allocation3 + $0x58] sm:$0xff] %vm2341_vm6, %v2451_v9  ;;  %2804 = vrot.lane.b32.xlu1 %v7012_v19, %s5825_s15  ;;  %2822 = vrot.lane.b32.xlu0 %v7021_v25, %s5826_s17 }
 0x508   :  { %v2573_v31 = vpop.permute.xlu1 %2572 }
 0x509   :  { %2578 = vst.msk [vmem:[#allocation3 + $0xb0] sm:$0xff] %vm2330_vm5, %v2573_v31  ;;  %v2547_v57 = vpop.permute.xlu0 %2546  ;;  %v2903_v31 = vld [vmem:[#allocation3 + $0x48] sm:$0xff] }
 0x50a   :  { %v2550_v32 = vsel %vm2548_vm12, %v7003_v8, %v2547_v57  ;;  %2820 = vrot.lane.b32.xlu1 %v7012_v19, %s5826_s17  ;;  %2844 = vrot.lane.b32.xlu0 %v7023_v36, %s5824_s4  ;;  %vm3283_vm12 = vcmask 1040384  }
 0x50b   :  { %2554 = vst.msk [vmem:[#allocation3 + $0xa8] sm:$0xff] %vm2330_vm5, %v2550_v32 }
 0x50c   :  { %v2589_v22 = vpop.permute.xlu1 %2588 }
 0x50d   :  { %2594 = vst.msk [vmem:[#allocation3 + $0xc0] sm:$0xff] %vm2330_vm5, %v2589_v22  ;;  %v2575_v12 = vpop.permute.xlu0 %2574 }
 0x50e   :  { %2579 = vst.msk [vmem:[#allocation3 + $0xb8] sm:$0xff] %vm2330_vm5, %v2575_v12  ;;  %2838 = vrot.lane.b32.xlu1 %v7012_v19, %s5824_s4  ;;  %2791 = vrot.lane.b32.xlu0 %v7031_v41, %s5822_s28 }
 0x510   :  { %v2607_v8 = vpop.permute.xlu1 %2606 }
 0x511   :  { %v2615_v33 = vsel %vm2614_vm13, %v2607_v8, %v2609_v34  ;;  %v2591_v37 = vpop.permute.xlu0 %2590  ;;  %v2902_v34 = vld [vmem:[#allocation3 + $0x40] sm:$0xff] }
 0x512   :  { %2619 = vst.msk [vmem:[#allocation3 + $0xd0] sm:$0xff] %vm2330_vm5, %v2615_v33  ;;  %2595 = vst.msk [vmem:[#allocation3 + $0xc8] sm:$0xff] %vm2330_vm5, %v2591_v37  ;;  %2842 = vrot.lane.b32.xlu1 %v7021_v25, %s5824_s4  ;;  %2857 = vrot.lane.b32.xlu0 %v7035_v42, %s5826_s17  ;;  %v2948_v22 = vpack.c.bf16 %v2903_v31, %v2902_v34 }
 0x514   :  { %v2689_v7 = vpop.permute.xlu1 %2688 }
 0x515   :  { %2694 = vst.msk [vmem:[#allocation3 + $0x100] sm:$0xff] %vm2330_vm5, %v2689_v7  ;;  %v2663_v19 = vpop.permute.xlu0 %2662 }
 0x516   :  { %2812 = vrot.lane.b32.xlu1 %v7031_v41, %s5823_s2  ;;  %2795 = vrot.lane.b32.xlu0 %v7041_v43, %s5822_s28  ;;  %s5832_s28 = smov 48  }
 0x518   :  { %v2705_v38 = vpop.permute.xlu1 %2704 }
 0x519   :  { %2710 = vst.msk [vmem:[#allocation3 + $0x110] sm:$0xff] %vm2330_vm5, %v2705_v38  ;;  %v2691_v39 = vpop.permute.xlu0 %2690 }
 0x51a   :  { %2695 = vst.msk [vmem:[#allocation3 + $0x108] sm:$0xff] %vm2330_vm5, %v2691_v39  ;;  %2828 = vrot.lane.b32.xlu1 %v7031_v41, %s5825_s15  ;;  %2814 = vrot.lane.b32.xlu0 %v7041_v43, %s5823_s2 }
 0x51c   :  { %v2723_v25 = vpop.permute.xlu1 %2722 }
 0x51d   :  { %v2731_v40 = vsel %vm2730_vm14, %v2723_v25, %v2725_v3  ;;  %v2707_v45 = vpop.permute.xlu0 %2706 }
 0x51e   :  { %2735 = vst.msk [vmem:[#allocation3 + $0x120] sm:$0xff] %vm2330_vm5, %v2731_v40  ;;  %2711 = vst.msk [vmem:[#allocation3 + $0x118] sm:$0xff] %vm2330_vm5, %v2707_v45  ;;  %2855 = vrot.lane.b32.xlu1 %v7031_v41, %s5826_s17  ;;  %2830 = vrot.lane.b32.xlu0 %v7041_v43, %s5825_s15  ;;  %s5836_s15 = smov 76  }
 0x520   :  { %v2639_v46 = vpop.permute.xlu1 %2638 }
 0x521   :  { %2644 = vst.msk [vmem:[#allocation3 + $0xe0] sm:$0xff] %vm2330_vm5, %v2639_v46  ;;  %v2613_v4 = vpop.permute.xlu0 %2612 }
 0x522   :  { %2859 = vrot.lane.b32.xlu1 %v7041_v43, %s5826_s17  ;;  %2861 = vrot.lane.b32.xlu0 %v7043_v44, %s5826_s17  ;;  %s5837_s17 = smov 92  }
 0x524   :  { %v2657_v17 = vpop.permute.xlu1 %2656 }
 0x525   :  { %v2665_v47 = vsel %vm2664_vm15, %v2657_v17, %v7106_v30  ;;  %v2641_v48 = vpop.permute.xlu0 %2640 }
 0x526   :  { %2669 = vst.msk [vmem:[#allocation3 + $0xf0] sm:$0xff] %vm2330_vm5, %v2665_v47  ;;  %2645 = vst.msk [vmem:[#allocation3 + $0xe8] sm:$0xff] %vm2330_vm5, %v2641_v48  ;;  %2870 = vrot.lane.b32.xlu1 %v7015_v35, %s5827_s18  ;;  %2872 = vrot.lane.b32.xlu0 %v7023_v36, %s5827_s18 }
 0x528   :  { %v2755_v41 = vpop.permute.xlu1 %2754 }
 0x529   :  { %2760 = vst.msk [vmem:[#allocation3 + $0x130] sm:$0xff] %vm2330_vm5, %v2755_v41  ;;  %v2729_v43 = vpop.permute.xlu0 %2728 }
 0x52a   :  { %2878 = vrot.lane.b32.xlu1 %v7035_v42, %s5824_s4  ;;  %2880 = vrot.lane.b32.xlu0 %v7043_v44, %s5824_s4  ;;  %s5833_s4 = smov 64  }
 0x52c   :  { %v7186_v49 = vpop.permute.xlu1 %2772 }
 0x52d   :  { %v2757_v50 = vpop.permute.xlu0 %2756 }
 0x52e   :  { %2761 = vst.msk [vmem:[#allocation3 + $0x138] sm:$0xff] %vm2330_vm5, %v2757_v50 }
 0x530   :  { %v2611_v35 = vpop.permute.xlu1 %2610 }
 0x531   :  { %v2616_v51 = vsel %vm2614_vm13, %v2611_v35, %v2613_v4  ;;  %v2560_v36 = vpop.permute.xlu0 %2559  ;;  %v2905_v35 = vld [vmem:[#allocation3 + $0x58] sm:$0xff]  ;;  %vm3354_vm13 = vcmask 31744  }
 0x532   :  { %2620 = vst.msk [vmem:[#allocation3 + $0xd8] sm:$0xff] %vm2330_vm5, %v2616_v51  ;;  %v2566_v63 = vsel %vm2565_vm0, %v7071_v61, %v2560_v36 }
 0x533   :  { %2570 = vst.msk [vmem:[#allocation3 + $0xa0] sm:$0xff] %vm2341_vm6, %v2566_v63 }
 0x534   :  { %v2727_v42 = vpop.permute.xlu1 %2726 }
 0x535   :  { %v2732_v44 = vsel %vm2730_vm14, %v2727_v42, %v2729_v43  ;;  %v7195_v0 = vpop.permute.xlu0 %2675  ;;  %vm4376_vm14 = vcmask 261120  }
 0x536   :  { %2736 = vst.msk [vmem:[#allocation3 + $0x128] sm:$0xff] %vm2330_vm5, %v2732_v44 }
 0x538   :  { %v2661_v52 = vpop.permute.xlu1 %2660 }
 0x539   :  { %v2666_v2 = vsel %vm2664_vm15, %v2661_v52, %v2663_v19  ;;  %v2626_v5 = vpop.permute.xlu0 %2625  ;;  %v2904_v52 = vld [vmem:[#allocation3 + $0x50] sm:$0xff]  ;;  %vm5852_vm15 = vmmov 0  }
 0x53a   :  { %2670 = vst.msk [vmem:[#allocation3 + $0xf8] sm:$0xff] %vm2330_vm5, %v2666_v2  ;;  %v2914_v58 = vld [vmem:[#allocation3 + $0xa0] sm:$0xff]  ;;  %v2949_v2 = vpack.c.bf16 %v2905_v35, %v2904_v52 }
 0x53c   :  { %v7200_v6 = vpop.permute.xlu1 %2776 }
 0x53d   :  { %v2742_v10 = vpop.permute.xlu0 %2741 }
 0x540   :  { %v2581_v11 = vpop.permute.xlu1 %2580 }
 0x541   :  { %2586 = vst.msk [vmem:[#allocation3 + $0xb0] sm:$0xff] %vm2341_vm6, %v2581_v11  ;;  %v2564_v61 = vpop.permute.xlu0 %2563 }
 0x542   :  { %v2567_v13 = vsel %vm2565_vm0, %v7116_v23, %v2564_v61  ;;  %v2947_v23 = vpack.c.bf16 %v2901_v29, %v2900_v54  ;;  %v2907_v61 = vld [vmem:[#allocation3 + $0x68] sm:$0xff]  ;;  %vm4720_vm0 = vcmask 15368  }
 0x543   :  { %2571 = vst.msk [vmem:[#allocation3 + $0xa8] sm:$0xff] %vm2341_vm6, %v2567_v13 }
 0x544   :  { %v2597_v14 = vpop.permute.xlu1 %2596 }
 0x545   :  { %2602 = vst.msk [vmem:[#allocation3 + $0xc0] sm:$0xff] %vm2341_vm6, %v2597_v14  ;;  %v2583_v15 = vpop.permute.xlu0 %2582  ;;  %v2906_v14 = vld [vmem:[#allocation3 + $0x60] sm:$0xff] }
 0x546   :  { %2587 = vst.msk [vmem:[#allocation3 + $0xb8] sm:$0xff] %vm2341_vm6, %v2583_v15  ;;  %v2950_v15 = vpack.c.bf16 %v2907_v61, %v2906_v14 }
 0x548   :  { %v2624_v16 = vpop.permute.xlu1 %2623  ;;  %v2916_v28 = vld [vmem:[#allocation3 + $0xb0] sm:$0xff] }
 0x549   :  { %v2632_v53 = vsel %vm2631_vm2, %v2624_v16, %v2626_v5  ;;  %v2599_v18 = vpop.permute.xlu0 %2598 }
 0x54a   :  { %2636 = vst.msk [vmem:[#allocation3 + $0xd0] sm:$0xff] %vm2341_vm6, %v2632_v53  ;;  %2603 = vst.msk [vmem:[#allocation3 + $0xc8] sm:$0xff] %vm2341_vm6, %v2599_v18  ;;  %v2915_v59 = vld [vmem:[#allocation3 + $0xa8] sm:$0xff] }
 0x54b   :  { %v2954_v62 = vpack.c.bf16 %v2915_v59, %v2914_v58  ;;  %v2908_v59 = vld [vmem:[#allocation3 + $0x70] sm:$0xff] }
 0x54c   :  { %v2697_v60 = vpop.permute.xlu1 %2696  ;;  %v2918_v9 = vld [vmem:[#allocation3 + $0xc0] sm:$0xff] }
 0x54d   :  { %2702 = vst.msk [vmem:[#allocation3 + $0x100] sm:$0xff] %vm2341_vm6, %v2697_v60  ;;  %5125 = vmatprep.subr.bf16.mxu0 %v2954_v62  ;;  %v2680_v27 = vpop.permute.xlu0 %2679  ;;  %v2917_v55 = vld [vmem:[#allocation3 + $0xb8] sm:$0xff]  ;;  %v5747_v60 = vld [vmem:[%s8119_s5] ss:$16 sps:$4 sm:$0xff]  }
 0x54e   :  { %5126 = vmatpush3.bf16.msra.mxu0 %v2946_v26  ;;  %v2955_v30 = vpack.c.bf16 %v2917_v55, %v2916_v28 }
 0x550   :  { %5127 = vmatprep.subr.bf16.mxu0 %v2955_v30  ;;  %v2713_v56 = vpop.permute.xlu1 %2712 }
 0x551   :  { %2718 = vst.msk [vmem:[#allocation3 + $0x110] sm:$0xff] %vm2341_vm6, %v2713_v56  ;;  %v2699_v20 = vpop.permute.xlu0 %2698  ;;  %v2919_v3 = vld [vmem:[#allocation3 + $0xc8] sm:$0xff]  ;;  %v2920_v63 = vld [vmem:[#allocation3 + $0xd0] sm:$0xff] }
 0x552   :  { %2703 = vst.msk [vmem:[#allocation3 + $0x108] sm:$0xff] %vm2341_vm6, %v2699_v20  ;;  %5128 = vmatpush3.bf16.msra.mxu0 %v2947_v23  ;;  %v2956_v57 = vpack.c.bf16 %v2919_v3, %v2918_v9 }
 0x554   :  { %5129 = vmatprep.subr.bf16.mxu0 %v2956_v57  ;;  %v2740_v32 = vpop.permute.xlu1 %2739  ;;  %v2926_v28 = vld [vmem:[#allocation3 + $0x100] sm:$0xff] }
 0x555   :  { %v2748_v12 = vsel %vm2747_vm3, %v2740_v32, %v2742_v10  ;;  %v2715_v8 = vpop.permute.xlu0 %2714  ;;  %v5752_v57 = vld [vmem:[%s8119_s5 + $0x20] ss:$16 sps:$4 sm:$0xff]  }
 0x556   :  { %2752 = vst.msk [vmem:[#allocation3 + $0x120] sm:$0xff] %vm2341_vm6, %v2748_v12  ;;  %2719 = vst.msk [vmem:[#allocation3 + $0x118] sm:$0xff] %vm2341_vm6, %v2715_v8  ;;  %5130 = vmatpush3.bf16.msra.mxu0 %v2948_v22  ;;  %v5755_v12 = vld [vmem:[%s8119_s5 + $0xc] ss:$16 sps:$4 sm:$0xff]  }
 0x558   :  { %v2647_v33 = vpop.permute.xlu1 %2646  ;;  %v2928_v20 = vld [vmem:[#allocation3 + $0x110] sm:$0xff] }
 0x559   :  { %2652 = vst.msk [vmem:[#allocation3 + $0xe0] sm:$0xff] %vm2341_vm6, %v2647_v33  ;;  %v2630_v37 = vpop.permute.xlu0 %2629  ;;  %v2927_v26 = vld [vmem:[#allocation3 + $0x108] sm:$0xff] }
 0x55a   :  { %v2960_v55 = vpack.c.bf16 %v2927_v26, %v2926_v28 }
 0x55c   :  { %v2674_v7 = vpop.permute.xlu1 %2673 }
 0x55d   :  { %v2682_v19 = vsel %vm2681_vm4, %v2674_v7, %v7195_v0  ;;  %v2649_v38 = vpop.permute.xlu0 %2648  ;;  %v2929_v30 = vld [vmem:[#allocation3 + $0x118] sm:$0xff]  ;;  %v2930_v8 = vld [vmem:[#allocation3 + $0x120] sm:$0xff] }
 0x55e   :  { %2686 = vst.msk [vmem:[#allocation3 + $0xf0] sm:$0xff] %vm2341_vm6, %v2682_v19  ;;  %2653 = vst.msk [vmem:[#allocation3 + $0xe8] sm:$0xff] %vm2341_vm6, %v2649_v38  ;;  %v2961_v9 = vpack.c.bf16 %v2929_v30, %v2928_v20 }
 0x560   :  { %v2763_v39 = vpop.permute.xlu1 %2762  ;;  %v2922_v5 = vld [vmem:[#allocation3 + $0xe0] sm:$0xff] }
 0x561   :  { %2768 = vst.msk [vmem:[#allocation3 + $0x130] sm:$0xff] %vm2341_vm6, %v2763_v39  ;;  %v2746_v25 = vpop.permute.xlu0 %2745 }
 0x564   :  { %v7223_v40 = vpop.permute.xlu1 %2789 }
 0x565   :  { %v2765_v45 = vpop.permute.xlu0 %2764  ;;  %v2923_v44 = vld [vmem:[#allocation3 + $0xe8] sm:$0xff]  ;;  %v2924_v18 = vld [vmem:[#allocation3 + $0xf0] sm:$0xff] }
 0x566   :  { %2769 = vst.msk [vmem:[#allocation3 + $0x138] sm:$0xff] %vm2341_vm6, %v2765_v45  ;;  %v2958_v11 = vpack.c.bf16 %v2923_v44, %v2922_v5 }
 0x568   :  { %v2628_v46 = vpop.permute.xlu1 %2627  ;;  %v2932_v39 = vld [vmem:[#allocation3 + $0x130] sm:$0xff] }
 0x569   :  { %v2633_v4 = vsel %vm2631_vm2, %v2628_v46, %v2630_v37  ;;  %v2775_v17 = vpop.permute.xlu0 %2774  ;;  %vm4822_vm2 = vcmask 13312  }
 0x56a   :  { %2637 = vst.msk [vmem:[#allocation3 + $0xd8] sm:$0xff] %vm2341_vm6, %v2633_v4  ;;  %v2781_v47 = vsel %vm2780_vm7, %v7186_v49, %v2775_v17 }
 0x56b   :  { %2785 = vst.msk [vmem:[#allocation3 + $0x140] sm:$0xff] %vm2330_vm5, %v2781_v47 }
 0x56c   :  { %v2744_v48 = vpop.permute.xlu1 %2743 }
 0x56d   :  { %v2749_v41 = vsel %vm2747_vm3, %v2744_v48, %v2746_v25  ;;  %v2841_v43 = vpop.permute.xlu0 %2840  ;;  %v2933_v7 = vld [vmem:[#allocation3 + $0x138] sm:$0xff] }
 0x56e   :  { %2753 = vst.msk [vmem:[#allocation3 + $0x128] sm:$0xff] %vm2341_vm6, %v2749_v41  ;;  %v2963_v25 = vpack.c.bf16 %v2933_v7, %v2932_v39 }
 0x570   :  { %v2678_v50 = vpop.permute.xlu1 %2677 }
 0x571   :  { %v2683_v51 = vsel %vm2681_vm4, %v2678_v50, %v2680_v27  ;;  %v2779_v36 = vpop.permute.xlu0 %2778  ;;  %v2921_v42 = vld [vmem:[#allocation3 + $0xd8] sm:$0xff]  ;;  %v5750_v27 = vld [vmem:[%s8119_s5 + $0x24] ss:$16 sps:$4 sm:$0xff]  }
 0x572   :  { %2687 = vst.msk [vmem:[#allocation3 + $0xf8] sm:$0xff] %vm2341_vm6, %v2683_v51  ;;  %v2782_v49 = vsel %vm2780_vm7, %v7200_v6, %v2779_v36  ;;  %v2957_v0 = vpack.c.bf16 %v2921_v42, %v2920_v63  ;;  %v2909_v6 = vld [vmem:[#allocation3 + $0x78] sm:$0xff] }
 0x573   :  { %2786 = vst.msk [vmem:[#allocation3 + $0x148] sm:$0xff] %vm2330_vm5, %v2782_v49  ;;  %v2951_v62 = vpack.c.bf16 %v2909_v6, %v2908_v59  ;;  %v5756_v6 = vld [vmem:[%s8119_s5 + $0x2c] ss:$16 sps:$4 sm:$0xff]  }
 0x574   :  { %v7238_v10 = vpop.permute.xlu1 %2793  ;;  %5131 = vmatprep.subr.bf16.mxu0 %v2957_v0 }
 0x575   :  { %v2807_v13 = vpop.permute.xlu0 %2806  ;;  %5132 = vmatpush3.bf16.msra.mxu0 %v2949_v2  ;;  %v2931_v31 = vld [vmem:[#allocation3 + $0x128] sm:$0xff] }
 0x576   :  { %2811 = vst.msk [vmem:[#allocation3 + $0x158] sm:$0xff] %vm2330_vm5, %v2807_v13  ;;  %5133 = vmatprep.subr.bf16.mxu0 %v2958_v11  ;;  %v2962_v33 = vpack.c.bf16 %v2931_v31, %v2930_v8 }
 0x578   :  { %v2805_v16 = vpop.permute.xlu1 %2804 }
 0x579   :  { %2810 = vst.msk [vmem:[#allocation3 + $0x150] sm:$0xff] %vm2330_vm5, %v2805_v16  ;;  %v2823_v53 = vpop.permute.xlu0 %2822  ;;  %5134 = vmatpush3.bf16.msra.mxu0 %v2950_v15  ;;  %v2925_v21 = vld [vmem:[#allocation3 + $0xf8] sm:$0xff] }
 0x57a   :  { %2827 = vst.msk [vmem:[#allocation3 + $0x168] sm:$0xff] %vm2330_vm5, %v2823_v53  ;;  %v2959_v58 = vpack.c.bf16 %v2925_v21, %v2924_v18  ;;  %v5753_v16 = vld [vmem:[%s8119_s5 + $0x8] ss:$16 sps:$4 sm:$0xff]  }
 0x57b   :  { %v5758_v53 = vld [vmem:[%s8119_s5 + $0x28] ss:$16 sps:$4 sm:$0xff]   ;;  %s5838_s5 = smov 40  }
 0x57c   :  { %5135 = vmatprep.subr.bf16.mxu0 %v2959_v58  ;;  %v2821_v24 = vpop.permute.xlu1 %2820 }
 0x57d   :  { %2826 = vst.msk [vmem:[#allocation3 + $0x160] sm:$0xff] %vm2330_vm5, %v2821_v24  ;;  %v2845_v54 = vpop.permute.xlu0 %2844  ;;  %5136 = vmatpush3.bf16.msra.mxu0 %v2951_v62 }
 0x57e   :  { %3063 = vmatprep.subr.bf16.mxu0 %v5802_v1 }
 0x580   :  { %v2839_v29 = vpop.permute.xlu1 %2838  ;;  %3047 = vmatmul.mubr.bf16.vlgmr.msra.gmra.mrb[24].mxu0 %v5747_v60 }
 0x581   :  { %v2847_v56 = vsel %vm2846_vm8, %v2839_v29, %v2841_v43  ;;  %v2792_v23 = vpop.permute.xlu0 %2791  ;;  %3064 = vmatpush1.bf16.msra.mxu0 %v2960_v55  ;;  %3054 = vmatprep.mubr.bf16.mxu0 %v5750_v27 }
 0x582   :  { %2851 = vst.msk [vmem:[#allocation3 + $0x170] sm:$0xff] %vm2330_vm5, %v2847_v56  ;;  %v2798_v34 = vsel %vm2797_vm9, %v7223_v40, %v2792_v23  ;;  %3065 = vmatprep.subr.bf16.mxu0 %v5802_v1 }
 0x583   :  { %2802 = vst.msk [vmem:[#allocation3 + $0x140] sm:$0xff] %vm2341_vm6, %v2798_v34 }
 0x584   :  { %v2843_v3 = vpop.permute.xlu1 %2842 }
 0x585   :  { %v2848_v32 = vsel %vm2846_vm8, %v2843_v3, %v2845_v54  ;;  %v2858_v22 = vpop.permute.xlu0 %2857  ;;  %3066 = vmatpush1.bf16.msra.mxu0 %v2961_v9 }
 0x586   :  { %2852 = vst.msk [vmem:[#allocation3 + $0x178] sm:$0xff] %vm2330_vm5, %v2848_v32  ;;  %3067 = vmatprep.subr.bf16.mxu0 %v5802_v1 }
 0x588   :  { %v2813_v37 = vpop.permute.xlu1 %2812  ;;  %3055 = vmatmul.mubr.bf16.gmra.mrb[28].mxu0 %v5752_v57 }
 0x589   :  { %2818 = vst.msk [vmem:[#allocation3 + $0x150] sm:$0xff] %vm2341_vm6, %v2813_v37  ;;  %v2796_v19 = vpop.permute.xlu0 %2795  ;;  %3068 = vmatpush1.bf16.msra.mxu0 %v2962_v33  ;;  %5095 = vmatprep.mubr.msk.bf16.mxu0 %vm3007_vm10, %v5755_v12 }
 0x58a   :  { %v2799_v38 = vsel %vm2797_vm9, %v7238_v10, %v2796_v19  ;;  %3069 = vmatprep.subr.bf16.mxu0 %v5802_v1  ;;  %v2934_v47 = vld [vmem:[#allocation3 + $0x140] sm:$0xff] }
 0x58b   :  { %2803 = vst.msk [vmem:[#allocation3 + $0x148] sm:$0xff] %vm2341_vm6, %v2799_v38 }
 0x58c   :  { %v2829_v40 = vpop.permute.xlu1 %2828 }
 0x58d   :  { %2834 = vst.msk [vmem:[#allocation3 + $0x160] sm:$0xff] %vm2341_vm6, %v2829_v40  ;;  %v2815_v45 = vpop.permute.xlu0 %2814  ;;  %3070 = vmatpush1.bf16.msra.mxu0 %v2963_v25 }
 0x58e   :  { %2819 = vst.msk [vmem:[#allocation3 + $0x158] sm:$0xff] %vm2341_vm6, %v2815_v45  ;;  %3071 = vmatprep.subr.bf16.mxu0 %v5802_v1 }
 0x590   :  { %v2856_v46 = vpop.permute.xlu1 %2855  ;;  %v2936_v35 = vld [vmem:[#allocation3 + $0x150] sm:$0xff] }
 0x591   :  { %v2864_v4 = vsel %vm2863_vm11, %v2856_v46, %v2858_v22  ;;  %v2831_v17 = vpop.permute.xlu0 %2830 }
 0x592   :  { %2868 = vst.msk [vmem:[#allocation3 + $0x170] sm:$0xff] %vm2341_vm6, %v2864_v4  ;;  %2835 = vst.msk [vmem:[#allocation3 + $0x168] sm:$0xff] %vm2341_vm6, %v2831_v17  ;;  %v2935_v48 = vld [vmem:[#allocation3 + $0x148] sm:$0xff] }
 0x593   :  { %v2964_v41 = vpack.c.bf16 %v2935_v48, %v2934_v47 }
 0x594   :  { %v2860_v43 = vpop.permute.xlu1 %2859  ;;  %v2938_v49 = vld [vmem:[#allocation3 + $0x160] sm:$0xff] }
 0x595   :  { %3072 = vmatpush1.bf16.msra.mxu0 %v2964_v41  ;;  %v2862_v50 = vpop.permute.xlu0 %2861  ;;  %v2937_v51 = vld [vmem:[#allocation3 + $0x158] sm:$0xff] }
 0x596   :  { %v2865_v36 = vsel %vm2863_vm11, %v2860_v43, %v2862_v50  ;;  %3073 = vmatprep.subr.bf16.mxu0 %v5802_v1  ;;  %v2965_v63 = vpack.c.bf16 %v2937_v51, %v2936_v35 }
 0x597   :  { %2869 = vst.msk [vmem:[#allocation3 + $0x178] sm:$0xff] %vm2341_vm6, %v2865_v36 }
 0x598   :  { %v2871_v42 = vpop.permute.xlu1 %2870 }
 0x599   :  { %2876 = vst.msk [vmem:[#allocation3 + $0x180] sm:$0xff] %vm2330_vm5, %v2871_v42  ;;  %3074 = vmatpush1.bf16.msra.mxu0 %v2965_v63  ;;  %v2873_v44 = vpop.permute.xlu0 %2872  ;;  %v2939_v0 = vld [vmem:[#allocation3 + $0x168] sm:$0xff]  ;;  %v2940_v10 = vld [vmem:[#allocation3 + $0x170] sm:$0xff] }
 0x59a   :  { %2877 = vst.msk [vmem:[#allocation3 + $0x188] sm:$0xff] %vm2330_vm5, %v2873_v44  ;;  %3075 = vmatprep.subr.bf16.mxu0 %v5802_v1  ;;  %v2966_v52 = vpack.c.bf16 %v2939_v0, %v2938_v49  ;;  %v3116_v44 = vld [vmem:[%s8120_s7] sm:$0xff]  ;;  %v3117_v49 = vld [vmem:[%s8120_s7 + $0x8] sm:$0xff] }
 0x59c   :  { %v2879_v2 = vpop.permute.xlu1 %2878 }
 0x59d   :  { %2884 = vst.msk [vmem:[#allocation3 + $0x180] sm:$0xff] %vm2341_vm6, %v2879_v2  ;;  %3076 = vmatpush1.bf16.msra.mxu0 %v2966_v52  ;;  %v2881_v5 = vpop.permute.xlu0 %2880 }
 0x59e   :  { %2885 = vst.msk [vmem:[#allocation3 + $0x188] sm:$0xff] %vm2341_vm6, %v2881_v5  ;;  %3077 = vmatprep.subr.bf16.mxu0 %v5802_v1  ;;  %v2941_v11 = vld [vmem:[#allocation3 + $0x178] sm:$0xff]  ;;  %vm3120_vm6 = vcmask 801792  }
 0x59f   :  { %v2967_v61 = vpack.c.bf16 %v2941_v11, %v2940_v10 }
 0x5a1   :  { %3078 = vmatpush1.bf16.msra.mxu0 %v2967_v61 }
 0x5a2   :  { %3079 = vmatprep.subr.bf16.mxu0 %v5802_v1 }
 0x5a4   :  { %v2942_v13 = vld [vmem:[#allocation3 + $0x180] sm:$0xff] }
 0x5a5   :  { %v2943_v14 = vld [vmem:[#allocation3 + $0x188] sm:$0xff] }
 0x5a6   :  { %v2968_v15 = vpack.c.bf16 %v2943_v14, %v2942_v13 }
 0x5a8   :  { %3080 = vmatpush1.bf16.msra.mxu0 %v2968_v15 }
 0x5ab   :  { %3096 = vmatmul.mubr.bf16.vlgmr.msra.gmra.mrb[32].mxu0 %v5753_v16 }
 0x5ac   :  { %5096 = vmatprep.mubr.msk.bf16.mxu0 %vm3007_vm10, %v5756_v6 }
 0x5b3   :  { %3104 = vmatmul.mubr.bf16.gmra.mrb[36].mxu0 %v5758_v53  ;;  %v3112_v53 = vld [vmem:[%s8121_s6] sm:$0xff] }
 0x653   :  { %v5137_v18 = vpop.f32.mrb[24].mxu0 }
 0x654   :  { %v5138_v21 = vpop.f32.mrb[25].mxu0 }
 0x655   :  { %v5139_v58 = vadd.f32 %v5138_v21, %v5137_v18  ;;  %v5140_v59 = vpop.f32.mrb[26].mxu0  ;;  %v3113_v21 = vld [vmem:[%s8121_s6 + $0x8] sm:$0xff] }
 0x656   :  { %v5141_v62 = vpop.f32.mrb[27].mxu0 }
 0x657   :  { %v5142_v24 = vadd.f32 %v5141_v62, %v5140_v59 }
 0x65b   :  { %v5143_v60 = vpop.f32.mrb[28].mxu0 }
 0x65c   :  { %v5144_v26 = vpop.f32.mrb[29].mxu0 }
 0x65d   :  { %v5145_v54 = vadd.f32 %v5144_v26, %v5143_v60  ;;  %v5146_v27 = vpop.f32.mrb[30].mxu0  ;;  %v3115_v26 = vld [vmem:[%s8121_s6 + $0x18] sm:$0xff] }
 0x65e   :  { %v5147_v28 = vpop.f32.mrb[31].mxu0 }
 0x65f   :  { %v5148_v55 = vadd.f32 %v5147_v28, %v5146_v27 }
 0x67e   :  { %v3097_v29 = vpop.f32.mrb[32].mxu0 }
 0x67f   :  { %v3098_v30 = vadd.f32 %v5139_v58, %v3097_v29  ;;  %v3099_v56 = vpop.f32.mrb[33].mxu0  ;;  %v3119_v29 = vld [vmem:[%s8120_s7 + $0x18] sm:$0xff] }
 0x680   :  { %v3100_v23 = vpop.f32.mrb[34].mxu0  ;;  %v5760_v56 = vld [vmem:[%s8122_s8 + $0x8] sm:$0xff]  }
 0x681   :  { %v3101_v34 = vadd.f32 %v5142_v24, %v3100_v23  ;;  %v3102_v20 = vpop.f32.mrb[35].mxu0  ;;  %v3121_v9 = vsel %vm3120_vm6, %v3098_v30, 0.0  ;;  %v3114_v24 = vld [vmem:[%s8121_s6 + $0x10] sm:$0xff]  ;;  %s5841_s6 = smov 88  }
 0x682   :  { %3122 = vadd.xlane.f32.xlu1 %v3121_v9  ;;  %v5761_v23 = vld [vmem:[%s8122_s8 + $0x10] sm:$0xff]   ;;  %v3285_v20 = vsel %vm3283_vm12, 65535, %v5802_v1 }
 0x683   :  { %v3124_v3 = vsel %vm3120_vm6, %v3101_v34, 0.0 }
 0x684   :  { %3125 = vadd.xlane.f32.xlu0 %v3124_v3 }
 0x686   :  { %v3105_v31 = vpop.f32.mrb[36].mxu0 }
 0x687   :  { %v3106_v57 = vadd.f32 %v5145_v54, %v3105_v31  ;;  %v3107_v32 = vpop.f32.mrb[37].mxu0 }
 0x688   :  { %v3108_v22 = vpop.f32.mrb[38].mxu0 }
 0x689   :  { %v3109_v12 = vadd.f32 %v5148_v55, %v3108_v22  ;;  %v3110_v8 = vpop.f32.mrb[39].mxu0  ;;  %v3127_v33 = vsel %vm3120_vm6, %v3106_v57, 0.0  ;;  %v3118_v55 = vld [vmem:[%s8120_s7 + $0x10] sm:$0xff] }
 0x68a   :  { %3128 = vadd.xlane.f32.xlu0 %v3127_v33 }
 0x68b   :  { %v3130_v37 = vsel %vm3120_vm6, %v3109_v12, 0.0 }
 0x68c   :  { %3131 = vadd.xlane.f32.xlu1 %v3130_v37 }
 0x70f   :  { %v3123_v7 = vpop.xlane.xlu1 %3122 }
 0x710   :  { %v3133_v19 = vmul.f32 0.010204081, %v3123_v7 }
 0x711   :  { %v3126_v38 = vpop.xlane.xlu0 %3125 }
 0x712   :  { %v7300_v39 = vsub.f32 %v3098_v30, %v3133_v19  ;;  %v3134_v25 = vmul.f32 0.010204081, %v3126_v38  ;;  %v5759_v30 = vld [vmem:[%s8122_s8] sm:$0xff]  }
 0x713   :  { %5254 = vmatprep.subr.bf16.mxu1 %v5759_v30 }
 0x714   :  { %v7302_v40 = vsub.f32 %v3101_v34, %v3134_v25  ;;  %v3141_v45 = vmul.f32 %v7300_v39, %v7300_v39  ;;  %5255 = vmatpush3.bf16.msra.mxu1 %v5759_v30  ;;  %v5762_v34 = vld [vmem:[%s8122_s8 + $0x18] ss:$0 sps:$4 sm:$0x11]   ;;  %s5828_s8 = smov 108  }
 0x715   :  { %5256 = vmatprep.subr.bf16.mxu1 %v5760_v56  ;;  %v3287_v9 = vand.u32 %v5762_v34, %v3285_v20 }
 0x716   :  { %v3145_v46 = vsel %vm3120_vm6, %v3141_v45, 0.0  ;;  %v3142_v4 = vmul.f32 %v7302_v40, %v7302_v40 }
 0x717   :  { %v3129_v17 = vpop.xlane.xlu0 %3128  ;;  %3146 = vadd.xlane.f32.xlu0 %v3145_v46 }
 0x718   :  { %v3135_v47 = vmul.f32 0.010204081, %v3129_v17  ;;  %v3148_v48 = vsel %vm3120_vm6, %v3142_v4, 0.0  ;;  %5257 = vmatpush3.bf16.msra.mxu1 %v5760_v56 }
 0x719   :  { %3149 = vadd.xlane.f32.xlu1 %v3148_v48  ;;  %v3132_v41 = vpop.xlane.xlu1 %3131  ;;  %5258 = vmatprep.subr.bf16.mxu1 %v5761_v23 }
 0x71a   :  { %v7310_v43 = vsub.f32 %v3106_v57, %v3135_v47  ;;  %v3136_v50 = vmul.f32 0.010204081, %v3132_v41 }
 0x71c   :  { %v7312_v35 = vsub.f32 %v3109_v12, %v3136_v50  ;;  %v3143_v51 = vmul.f32 %v7310_v43, %v7310_v43  ;;  %5259 = vmatpush3.bf16.msra.mxu1 %v5761_v23 }
 0x71d   :  { %5260 = vmatprep.subr.bf16.mxu1 %v3287_v9 }
 0x71e   :  { %v3151_v36 = vsel %vm3120_vm6, %v3143_v51, 0.0  ;;  %v3144_v63 = vmul.f32 %v7312_v35, %v7312_v35 }
 0x71f   :  { %3152 = vadd.xlane.f32.xlu0 %v3151_v36 }
 0x720   :  { %v3154_v42 = vsel %vm3120_vm6, %v3144_v63, 0.0  ;;  %5261 = vmatpush3.bf16.msra.mxu1 %v3287_v9 }
 0x721   :  { %3155 = vadd.xlane.f32.xlu1 %v3154_v42 }
 0x732   :  { %3199 = vperm.xlu1 %5390, %v3116_v44  }
 0x735   :  { %3204 = vperm.xlu0 %5389, %v3117_v49  }
 0x7a4   :  { %v3147_v0 = vpop.xlane.xlu0 %3146 }
 0x7a5   :  { %v3157_v52 = vmul.f32 0.010204081, %v3147_v0 }
 0x7a6   :  { %v3150_v2 = vpop.xlane.xlu1 %3149 }
 0x7a7   :  { %v3161_v5 = vadd.f32 1e-05, %v3157_v52  ;;  %v3158_v10 = vmul.f32 0.010204081, %v3150_v2 }
 0x7a9   :  { %5786 = vrsqrt.f32 %v3161_v5  ;;  %v3162_v11 = vadd.f32 1e-05, %v3158_v10 }
 0x7ab   :  { %5788 = vrsqrt.f32 %v3162_v11 }
 0x7ac   :  { %v3153_v61 = vpop.xlane.xlu0 %3152 }
 0x7ad   :  { %v3159_v13 = vmul.f32 0.010204081, %v3153_v61 }
 0x7ae   :  { %v3156_v14 = vpop.xlane.xlu1 %3155 }
 0x7af   :  { %v3163_v15 = vadd.f32 1e-05, %v3159_v13  ;;  %v3160_v16 = vmul.f32 0.010204081, %v3156_v14 }
 0x7b1   :  { %5790 = vrsqrt.f32 %v3163_v15  ;;  %v3164_v6 = vadd.f32 1e-05, %v3160_v16 }
 0x7b2   :  { %v3200_v31 = vpop.permute.xlu1 %3199 }
 0x7b3   :  { %v5787_v18 = vpop.eup %5786  ;;  %5792 = vrsqrt.f32 %v3164_v6 }
 0x7b4   :  { %v3169_v58 = vmul.f32 %v5787_v18, %v3112_v53  ;;  %v3205_v3 = vpop.permute.xlu0 %3204 }
 0x7b5   :  { %v5789_v59 = vpop.eup %5788 }
 0x7b6   :  { %3175 = vperm.xlu0 %5389, %v3169_v58   ;;  %v3170_v62 = vmul.f32 %v5789_v59, %v3113_v21 }
 0x7b8   :  { %3180 = vperm.xlu1 %5390, %v3170_v62  }
 0x7bb   :  { %v5791_v60 = vpop.eup %5790 }
 0x7bc   :  { %v3171_v54 = vmul.f32 %v5791_v60, %v3114_v24 }
 0x7bd   :  { %v5793_v27 = vpop.eup %5792 }
 0x7be   :  { %3185 = vperm.xlu1 %5390, %v3171_v54   ;;  %v3172_v28 = vmul.f32 %v5793_v27, %v3115_v26 }
 0x7c0   :  { %3190 = vperm.xlu0 %5389, %v3172_v28  }
 0x7c2   :  { %3209 = vperm.xlu1 %5390, %v3118_v55  }
 0x7c4   :  { %3214 = vperm.xlu0 %5389, %v3119_v29  }
 0x835   :  { %v3176_v57 = vpop.permute.xlu0 %3175 }
 0x836   :  { %v3193_v32 = vmul.f32 %v3176_v57, %v7300_v39 }
 0x837   :  { %v3181_v22 = vpop.permute.xlu1 %3180 }
 0x838   :  { %v3217_v12 = vadd.f32 %v3200_v31, %v3193_v32  ;;  %v3194_v8 = vmul.f32 %v3181_v22, %v7302_v40 }
 0x83a   :  { %v3218_v33 = vadd.f32 %v3205_v3, %v3194_v8  ;;  %v3221_v37 = vmax.f32 %v3217_v12, 0.0 }
 0x83c   :  { %v3222_v7 = vmax.f32 %v3218_v33, 0.0 }
 0x83d   :  { %v3186_v19 = vpop.permute.xlu1 %3185 }
 0x83e   :  { %v3225_v38 = vpack.c.bf16 %v3222_v7, %v3221_v37  ;;  %v3195_v1 = vmul.f32 %v3186_v19, %v7310_v43 }
 0x83f   :  { %v3191_v25 = vpop.permute.xlu0 %3190 }
 0x840   :  { %3227 = vst.msk [vmem:[#allocation4] sm:$0xff] %vm2330_vm5, %v3225_v38  ;;  %3231 = vrot.lane.b32.xlu1 %v3225_v38, %s5805_s29  ;;  %v3196_v46 = vmul.f32 %v3191_v25, %v7312_v35 }
 0x841   :  { %v3210_v45 = vpop.permute.xlu1 %3209 }
 0x842   :  { %v3219_v39 = vadd.f32 %v3210_v45, %v3195_v1 }
 0x843   :  { %v3215_v4 = vpop.permute.xlu0 %3214 }
 0x844   :  { %v3220_v17 = vadd.f32 %v3215_v4, %v3196_v46  ;;  %v3223_v47 = vmax.f32 %v3219_v39, 0.0 }
 0x846   :  { %v3224_v40 = vmax.f32 %v3220_v17, 0.0 }
 0x847   :  { %v3239_v48 = vld [vmem:[#allocation4] sm:$0xff] }
 0x848   :  { %v3226_v41 = vpack.c.bf16 %v3224_v40, %v3223_v47  ;;  %5262 = vmatprep.mubr.msk.bf16.mxu1 %vm2330_vm5, %v3239_v48 }
 0x84a   :  { %3228 = vst.msk [vmem:[#allocation4 + $0x8] sm:$0xff] %vm2330_vm5, %v3226_v41  ;;  %3233 = vrot.lane.b32.xlu0 %v3226_v41, %s5805_s29  ;;  %s5829_s29 = smov 124  }
 0x851   :  { %v3240_v50 = vld [vmem:[#allocation4 + $0x8] sm:$0xff] }
 0x852   :  { %5263 = vmatmul.mubr.msk.bf16.vlgmr.msra.gmra.mrb[28].mxu1 %vm2330_vm5, %v3240_v50 }
 0x8b2   :  { %v3232_v43 = vpop.permute.xlu1 %3231 }
 0x8b3   :  { %3237 = vst.msk [vmem:[#allocation4 + $0x10] sm:$0xff] %vm2330_vm5, %v3232_v43 }
 0x8ba   :  { %v3241_v35 = vld [vmem:[#allocation4 + $0x10] sm:$0xff] }
 0x8bb   :  { %5266 = vmatprep.mubr.msk.bf16.mxu1 %vm2330_vm5, %v3241_v35 }
 0x8bc   :  { %v3234_v51 = vpop.permute.xlu0 %3233 }
 0x8bd   :  { %3238 = vst.msk [vmem:[#allocation4 + $0x18] sm:$0xff] %vm2330_vm5, %v3234_v51 }
 0x8c4   :  { %v3242_v36 = vld [vmem:[#allocation4 + $0x18] sm:$0xff] }
 0x8c5   :  { %5267 = vmatmul.mubr.msk.bf16.gmra.mrb[32].mxu1 %vm2330_vm5, %v3242_v36  ;;  %vm3375_vm5 = vcmask 64544  }
 0x925   :  { %v7371_v63 = vpop.f32.mrb[28].mxu1 }
 0x926   :  { %3472 = vrot.lane.b32.xlu1 %v7371_v63, %s5819_s3  ;;  %v7375_v42 = vpop.f32.mrb[29].mxu1  ;;  %3357 = vst.msk [vmem:[#allocation5 + $0x10] sm:$0xff] %vm3354_vm13, %v7371_v63 }
 0x927   :  { %v7379_v44 = vpop.f32.mrb[30].mxu1  ;;  %3355 = vst.msk [vmem:[#allocation5] sm:$0xff] %vm3354_vm13, %v7375_v42 }
 0x928   :  { %3474 = vrot.lane.b32.xlu0 %v7379_v44, %s5819_s3  ;;  %v7385_v49 = vpop.f32.mrb[31].mxu1  ;;  %3358 = vst.msk [vmem:[#allocation5 + $0x18] sm:$0xff] %vm3354_vm13, %v7379_v44 }
 0x929   :  { %3356 = vst.msk [vmem:[#allocation5 + $0x8] sm:$0xff] %vm3354_vm13, %v7385_v49 }
 0x92a   :  { %3504 = vrot.lane.b32.xlu1 %v7371_v63, %s5828_s8 }
 0x92c   :  { %3506 = vrot.lane.b32.xlu0 %v7379_v44, %s5828_s8 }
 0x92e   :  { %3388 = vrot.lane.b32.xlu1 %v7371_v63, %s5829_s29 }
 0x930   :  { %3390 = vrot.lane.b32.xlu0 %v7379_v44, %s5829_s29 }
 0x932   :  { %3536 = vrot.lane.b32.xlu1 %v7371_v63, %s5827_s18 }
 0x934   :  { %3538 = vrot.lane.b32.xlu0 %v7379_v44, %s5827_s18 }
 0x936   :  { %3408 = vrot.lane.b32.xlu1 %v7371_v63, %s5809_s16 }
 0x938   :  { %3410 = vrot.lane.b32.xlu0 %v7379_v44, %s5809_s16 }
 0x93a   :  { %3568 = vrot.lane.b32.xlu1 %v7371_v63, %s5830_s26 }
 0x93c   :  { %3570 = vrot.lane.b32.xlu0 %v7379_v44, %s5830_s26 }
 0x93e   :  { %3440 = vrot.lane.b32.xlu1 %v7371_v63, %s5831_s27 }
 0x940   :  { %3442 = vrot.lane.b32.xlu0 %v7379_v44, %s5831_s27 }
 0x942   :  { %3984 = vrot.lane.b32.xlu1 %v7371_v63, %s5832_s28 }
 0x944   :  { %3986 = vrot.lane.b32.xlu0 %v7379_v44, %s5832_s28 }
 0x946   :  { %3856 = vrot.lane.b32.xlu1 %v7371_v63, %s5833_s4 }
 0x948   :  { %3858 = vrot.lane.b32.xlu0 %v7379_v44, %s5833_s4 }
 0x94a   :  { %3728 = vrot.lane.b32.xlu1 %v7371_v63, %s5834_s30 }
 0x94c   :  { %3730 = vrot.lane.b32.xlu0 %v7379_v44, %s5834_s30 }
 0x94e   :  { %3600 = vrot.lane.b32.xlu1 %v7371_v63, %s5835_s1 }
 0x950   :  { %3602 = vrot.lane.b32.xlu0 %v7379_v44, %s5835_s1 }
 0x952   :  { %4016 = vrot.lane.b32.xlu1 %v7371_v63, %s5823_s2 }
 0x954   :  { %4018 = vrot.lane.b32.xlu0 %v7379_v44, %s5823_s2 }
 0x956   :  { %3888 = vrot.lane.b32.xlu1 %v7371_v63, %s5803_s25 }
 0x958   :  { %3890 = vrot.lane.b32.xlu0 %v7379_v44, %s5803_s25 }
 0x95a   :  { %3760 = vrot.lane.b32.xlu1 %v7371_v63, %s5836_s15 }
 0x95c   :  { %3762 = vrot.lane.b32.xlu0 %v7379_v44, %s5836_s15 }
 0x95e   :  { %3632 = vrot.lane.b32.xlu1 %v7371_v63, %s5837_s17 }
 0x960   :  { %3634 = vrot.lane.b32.xlu0 %v7379_v44, %s5837_s17 }
 0x962   :  { %4048 = vrot.lane.b32.xlu1 %v7371_v63, %s5838_s5 }
 0x964   :  { %4050 = vrot.lane.b32.xlu0 %v7379_v44, %s5838_s5 }
 0x966   :  { %3920 = vrot.lane.b32.xlu1 %v7371_v63, %s5839_s19 }
 0x968   :  { %3922 = vrot.lane.b32.xlu0 %v7379_v44, %s5839_s19 }
 0x96a   :  { %3792 = vrot.lane.b32.xlu1 %v7371_v63, %s5840_s20 }
 0x96c   :  { %3794 = vrot.lane.b32.xlu0 %v7379_v44, %s5840_s20 }
 0x96e   :  { %3664 = vrot.lane.b32.xlu1 %v7371_v63, %s5841_s6 }
 0x970   :  { %3666 = vrot.lane.b32.xlu0 %v7379_v44, %s5841_s6 }
 0x972   :  { %4080 = vrot.lane.b32.xlu1 %v7371_v63, %s5842_s21 }
 0x974   :  { %4082 = vrot.lane.b32.xlu0 %v7379_v44, %s5842_s21 }
 0x976   :  { %3952 = vrot.lane.b32.xlu1 %v7371_v63, %s5818_s0 }
 0x978   :  { %3954 = vrot.lane.b32.xlu0 %v7379_v44, %s5818_s0 }
 0x97a   :  { %3824 = vrot.lane.b32.xlu1 %v7371_v63, %s5843_s22 }
 0x97c   :  { %3826 = vrot.lane.b32.xlu0 %v7379_v44, %s5843_s22 }
 0x97e   :  { %3696 = vrot.lane.b32.xlu1 %v7371_v63, %s5844_s23 }
 0x980   :  { %3698 = vrot.lane.b32.xlu0 %v7379_v44, %s5844_s23 }
 0x982   :  { %3468 = vrot.lane.b32.xlu1 %v7375_v42, %s5819_s3 }
 0x984   :  { %3470 = vrot.lane.b32.xlu0 %v7385_v49, %s5819_s3 }
 0x986   :  { %3500 = vrot.lane.b32.xlu1 %v7375_v42, %s5828_s8 }
 0x988   :  { %3502 = vrot.lane.b32.xlu0 %v7385_v49, %s5828_s8 }
 0x98a   :  { %3384 = vrot.lane.b32.xlu1 %v7375_v42, %s5829_s29 }
 0x98c   :  { %3386 = vrot.lane.b32.xlu0 %v7385_v49, %s5829_s29 }
 0x98e   :  { %3532 = vrot.lane.b32.xlu1 %v7375_v42, %s5827_s18 }
 0x990   :  { %3534 = vrot.lane.b32.xlu0 %v7385_v49, %s5827_s18 }
 0x992   :  { %3404 = vrot.lane.b32.xlu1 %v7375_v42, %s5809_s16 }
 0x994   :  { %3406 = vrot.lane.b32.xlu0 %v7385_v49, %s5809_s16 }
 0x996   :  { %3564 = vrot.lane.b32.xlu1 %v7375_v42, %s5830_s26 }
 0x998   :  { %3566 = vrot.lane.b32.xlu0 %v7385_v49, %s5830_s26  ;;  %v7503_v0 = vpop.f32.mrb[32].mxu1  ;;  %v3473_v52 = vpop.permute.xlu1 %3472 }
 0x999   :  { %3482 = vst.msk [vmem:[#allocation5 + $0x90] sm:$0xff] %vm3354_vm13, %v3473_v52  ;;  %v7506_v2 = vpop.f32.mrb[33].mxu1 }
 0x99a   :  { %3436 = vrot.lane.b32.xlu1 %v7375_v42, %s5831_s27  ;;  %v3475_v5 = vpop.permute.xlu0 %3474  ;;  %v7510_v10 = vpop.f32.mrb[34].mxu1 }
 0x99b   :  { %3483 = vst.msk [vmem:[#allocation5 + $0x98] sm:$0xff] %vm3354_vm13, %v3475_v5  ;;  %v7513_v11 = vpop.f32.mrb[35].mxu1 }
 0x99c   :  { %3438 = vrot.lane.b32.xlu0 %v7385_v49, %s5831_s27  ;;  %v3505_v61 = vpop.permute.xlu1 %3504 }
 0x99d   :  { %3514 = vst.msk [vmem:[#allocation5 + $0xb0] sm:$0xff] %vm3354_vm13, %v3505_v61 }
 0x99e   :  { %3980 = vrot.lane.b32.xlu1 %v7375_v42, %s5832_s28  ;;  %v3507_v13 = vpop.permute.xlu0 %3506 }
 0x99f   :  { %3515 = vst.msk [vmem:[#allocation5 + $0xb8] sm:$0xff] %vm3354_vm13, %v3507_v13 }
 0x9a0   :  { %3982 = vrot.lane.b32.xlu0 %v7385_v49, %s5832_s28  ;;  %v3389_v14 = vpop.permute.xlu1 %3388 }
 0x9a1   :  { %3398 = vst.msk [vmem:[#allocation5 + $0x30] sm:$0xff] %vm3354_vm13, %v3389_v14 }
 0x9a2   :  { %3402 = vst.msk [vmem:[#allocation5 + $0x30] sm:$0xff] %vm3375_vm5, %v7503_v0  ;;  %3852 = vrot.lane.b32.xlu1 %v7375_v42, %s5833_s4  ;;  %v3391_v15 = vpop.permute.xlu0 %3390 }
 0x9a3   :  { %3399 = vst.msk [vmem:[#allocation5 + $0x38] sm:$0xff] %vm3354_vm13, %v3391_v15 }
 0x9a4   :  { %3403 = vst.msk [vmem:[#allocation5 + $0x38] sm:$0xff] %vm3375_vm5, %v7510_v10  ;;  %3854 = vrot.lane.b32.xlu0 %v7385_v49, %s5833_s4  ;;  %v3537_v16 = vpop.permute.xlu1 %3536 }
 0x9a5   :  { %3546 = vst.msk [vmem:[#allocation5 + $0xd0] sm:$0xff] %vm3354_vm13, %v3537_v16 }
 0x9a6   :  { %3724 = vrot.lane.b32.xlu1 %v7375_v42, %s5834_s30  ;;  %v3539_v6 = vpop.permute.xlu0 %3538 }
 0x9a7   :  { %3547 = vst.msk [vmem:[#allocation5 + $0xd8] sm:$0xff] %vm3354_vm13, %v3539_v6 }
 0x9a8   :  { %3726 = vrot.lane.b32.xlu0 %v7385_v49, %s5834_s30  ;;  %v3409_v53 = vpop.permute.xlu1 %3408 }
 0x9a9   :  { %3418 = vst.msk [vmem:[#allocation5 + $0x50] sm:$0xff] %vm3354_vm13, %v3409_v53 }
 0x9aa   :  { %3596 = vrot.lane.b32.xlu1 %v7375_v42, %s5835_s1  ;;  %v3411_v18 = vpop.permute.xlu0 %3410 }
 0x9ab   :  { %3419 = vst.msk [vmem:[#allocation5 + $0x58] sm:$0xff] %vm3354_vm13, %v3411_v18 }
 0x9ac   :  { %3598 = vrot.lane.b32.xlu0 %v7385_v49, %s5835_s1  ;;  %v3569_v21 = vpop.permute.xlu1 %3568 }
 0x9ad   :  { %3578 = vst.msk [vmem:[#allocation5 + $0xf0] sm:$0xff] %vm3354_vm13, %v3569_v21 }
 0x9ae   :  { %4012 = vrot.lane.b32.xlu1 %v7375_v42, %s5823_s2  ;;  %v3571_v58 = vpop.permute.xlu0 %3570 }
 0x9af   :  { %3579 = vst.msk [vmem:[#allocation5 + $0xf8] sm:$0xff] %vm3354_vm13, %v3571_v58 }
 0x9b0   :  { %4014 = vrot.lane.b32.xlu0 %v7385_v49, %s5823_s2  ;;  %v3441_v59 = vpop.permute.xlu1 %3440 }
 0x9b1   :  { %3450 = vst.msk [vmem:[#allocation5 + $0x70] sm:$0xff] %vm3354_vm13, %v3441_v59 }
 0x9b2   :  { %3884 = vrot.lane.b32.xlu1 %v7375_v42, %s5803_s25  ;;  %v3443_v62 = vpop.permute.xlu0 %3442 }
 0x9b3   :  { %3451 = vst.msk [vmem:[#allocation5 + $0x78] sm:$0xff] %vm3354_vm13, %v3443_v62 }
 0x9b4   :  { %3886 = vrot.lane.b32.xlu0 %v7385_v49, %s5803_s25  ;;  %v3985_v24 = vpop.permute.xlu1 %3984 }
 0x9b5   :  { %3994 = vst.msk [vmem:[#allocation5 + $0x290] sm:$0xff] %vm3354_vm13, %v3985_v24 }
 0x9b6   :  { %3756 = vrot.lane.b32.xlu1 %v7375_v42, %s5836_s15  ;;  %v3987_v60 = vpop.permute.xlu0 %3986 }
 0x9b7   :  { %3995 = vst.msk [vmem:[#allocation5 + $0x298] sm:$0xff] %vm3354_vm13, %v3987_v60 }
 0x9b8   :  { %3758 = vrot.lane.b32.xlu0 %v7385_v49, %s5836_s15  ;;  %v3857_v26 = vpop.permute.xlu1 %3856 }
 0x9b9   :  { %3866 = vst.msk [vmem:[#allocation5 + $0x210] sm:$0xff] %vm3354_vm13, %v3857_v26 }
 0x9ba   :  { %3628 = vrot.lane.b32.xlu1 %v7375_v42, %s5837_s17  ;;  %v3859_v54 = vpop.permute.xlu0 %3858 }
 0x9bb   :  { %3867 = vst.msk [vmem:[#allocation5 + $0x218] sm:$0xff] %vm3354_vm13, %v3859_v54 }
 0x9bc   :  { %3630 = vrot.lane.b32.xlu0 %v7385_v49, %s5837_s17  ;;  %v3729_v27 = vpop.permute.xlu1 %3728 }
 0x9bd   :  { %3738 = vst.msk [vmem:[#allocation5 + $0x190] sm:$0xff] %vm3354_vm13, %v3729_v27 }
 0x9be   :  { %4044 = vrot.lane.b32.xlu1 %v7375_v42, %s5838_s5  ;;  %v3731_v28 = vpop.permute.xlu0 %3730 }
 0x9bf   :  { %3739 = vst.msk [vmem:[#allocation5 + $0x198] sm:$0xff] %vm3354_vm13, %v3731_v28 }
 0x9c0   :  { %4046 = vrot.lane.b32.xlu0 %v7385_v49, %s5838_s5  ;;  %v3601_v55 = vpop.permute.xlu1 %3600 }
 0x9c1   :  { %3610 = vst.msk [vmem:[#allocation5 + $0x110] sm:$0xff] %vm3354_vm13, %v3601_v55 }
 0x9c2   :  { %3916 = vrot.lane.b32.xlu1 %v7375_v42, %s5839_s19  ;;  %v3603_v29 = vpop.permute.xlu0 %3602 }
 0x9c3   :  { %3611 = vst.msk [vmem:[#allocation5 + $0x118] sm:$0xff] %vm3354_vm13, %v3603_v29 }
 0x9c4   :  { %3918 = vrot.lane.b32.xlu0 %v7385_v49, %s5839_s19  ;;  %v4017_v30 = vpop.permute.xlu1 %4016 }
 0x9c5   :  { %4026 = vst.msk [vmem:[#allocation5 + $0x2b0] sm:$0xff] %vm3354_vm13, %v4017_v30 }
 0x9c6   :  { %3788 = vrot.lane.b32.xlu1 %v7375_v42, %s5840_s20  ;;  %v4019_v56 = vpop.permute.xlu0 %4018 }
 0x9c7   :  { %4027 = vst.msk [vmem:[#allocation5 + $0x2b8] sm:$0xff] %vm3354_vm13, %v4019_v56 }
 0x9c8   :  { %3790 = vrot.lane.b32.xlu0 %v7385_v49, %s5840_s20  ;;  %v3889_v23 = vpop.permute.xlu1 %3888 }
 0x9c9   :  { %3898 = vst.msk [vmem:[#allocation5 + $0x230] sm:$0xff] %vm3354_vm13, %v3889_v23 }
 0x9ca   :  { %3660 = vrot.lane.b32.xlu1 %v7375_v42, %s5841_s6  ;;  %v3891_v34 = vpop.permute.xlu0 %3890 }
 0x9cb   :  { %3899 = vst.msk [vmem:[#allocation5 + $0x238] sm:$0xff] %vm3354_vm13, %v3891_v34 }
 0x9cc   :  { %3662 = vrot.lane.b32.xlu0 %v7385_v49, %s5841_s6  ;;  %v3761_v20 = vpop.permute.xlu1 %3760 }
 0x9cd   :  { %3770 = vst.msk [vmem:[#allocation5 + $0x1b0] sm:$0xff] %vm3354_vm13, %v3761_v20 }
 0x9ce   :  { %4076 = vrot.lane.b32.xlu1 %v7375_v42, %s5842_s21  ;;  %v3763_v9 = vpop.permute.xlu0 %3762 }
 0x9cf   :  { %3771 = vst.msk [vmem:[#allocation5 + $0x1b8] sm:$0xff] %vm3354_vm13, %v3763_v9 }
 0x9d0   :  { %4078 = vrot.lane.b32.xlu0 %v7385_v49, %s5842_s21  ;;  %v3633_v3 = vpop.permute.xlu1 %3632 }
 0x9d1   :  { %3642 = vst.msk [vmem:[#allocation5 + $0x130] sm:$0xff] %vm3354_vm13, %v3633_v3 }
 0x9d2   :  { %3948 = vrot.lane.b32.xlu1 %v7375_v42, %s5818_s0  ;;  %v3635_v31 = vpop.permute.xlu0 %3634 }
 0x9d3   :  { %3643 = vst.msk [vmem:[#allocation5 + $0x138] sm:$0xff] %vm3354_vm13, %v3635_v31 }
 0x9d4   :  { %3950 = vrot.lane.b32.xlu0 %v7385_v49, %s5818_s0  ;;  %v4049_v57 = vpop.permute.xlu1 %4048 }
 0x9d5   :  { %4058 = vst.msk [vmem:[#allocation5 + $0x2d0] sm:$0xff] %vm3354_vm13, %v4049_v57 }
 0x9d6   :  { %3820 = vrot.lane.b32.xlu1 %v7375_v42, %s5843_s22  ;;  %v4051_v32 = vpop.permute.xlu0 %4050 }
 0x9d7   :  { %4059 = vst.msk [vmem:[#allocation5 + $0x2d8] sm:$0xff] %vm3354_vm13, %v4051_v32 }
 0x9d8   :  { %3822 = vrot.lane.b32.xlu0 %v7385_v49, %s5843_s22  ;;  %v3921_v22 = vpop.permute.xlu1 %3920 }
 0x9d9   :  { %3930 = vst.msk [vmem:[#allocation5 + $0x250] sm:$0xff] %vm3354_vm13, %v3921_v22 }
 0x9da   :  { %3692 = vrot.lane.b32.xlu1 %v7375_v42, %s5844_s23  ;;  %v3923_v12 = vpop.permute.xlu0 %3922 }
 0x9db   :  { %3931 = vst.msk [vmem:[#allocation5 + $0x258] sm:$0xff] %vm3354_vm13, %v3923_v12 }
 0x9dc   :  { %3694 = vrot.lane.b32.xlu0 %v7385_v49, %s5844_s23  ;;  %v3793_v8 = vpop.permute.xlu1 %3792 }
 0x9dd   :  { %3802 = vst.msk [vmem:[#allocation5 + $0x1d0] sm:$0xff] %vm3354_vm13, %v3793_v8 }
 0x9de   :  { %v3795_v33 = vpop.permute.xlu0 %3794  ;;  %3488 = vrot.lane.b32.xlu1 %v7503_v0, %s5831_s27 }
 0x9df   :  { %3803 = vst.msk [vmem:[#allocation5 + $0x1d8] sm:$0xff] %vm3354_vm13, %v3795_v33 }
 0x9e0   :  { %3490 = vrot.lane.b32.xlu0 %v7510_v10, %s5831_s27  ;;  %v3665_v37 = vpop.permute.xlu1 %3664 }
 0x9e1   :  { %3674 = vst.msk [vmem:[#allocation5 + $0x150] sm:$0xff] %vm3354_vm13, %v3665_v37 }
 0x9e2   :  { %v3667_v7 = vpop.permute.xlu0 %3666  ;;  %3367 = vrot.lane.b32.xlu1 %v7503_v0, %s5845_s24 }
 0x9e3   :  { %3675 = vst.msk [vmem:[#allocation5 + $0x158] sm:$0xff] %vm3354_vm13, %v3667_v7 }
 0x9e4   :  { %3369 = vrot.lane.b32.xlu0 %v7510_v10, %s5845_s24  ;;  %v4081_v19 = vpop.permute.xlu1 %4080 }
 0x9e5   :  { %4090 = vst.msk [vmem:[#allocation5 + $0x2f0] sm:$0xff] %vm3354_vm13, %v4081_v19 }
 0x9e6   :  { %v4083_v38 = vpop.permute.xlu0 %4082  ;;  %3520 = vrot.lane.b32.xlu1 %v7503_v0, %s5819_s3 }
 0x9e7   :  { %4091 = vst.msk [vmem:[#allocation5 + $0x2f8] sm:$0xff] %vm3354_vm13, %v4083_v38 }
 0x9e8   :  { %3522 = vrot.lane.b32.xlu0 %v7510_v10, %s5819_s3  ;;  %v3953_v25 = vpop.permute.xlu1 %3952 }
 0x9e9   :  { %3962 = vst.msk [vmem:[#allocation5 + $0x270] sm:$0xff] %vm3354_vm13, %v3953_v25 }
 0x9ea   :  { %v3955_v1 = vpop.permute.xlu0 %3954  ;;  %3552 = vrot.lane.b32.xlu1 %v7503_v0, %s5828_s8 }
 0x9eb   :  { %3963 = vst.msk [vmem:[#allocation5 + $0x278] sm:$0xff] %vm3354_vm13, %v3955_v1 }
 0x9ec   :  { %3554 = vrot.lane.b32.xlu0 %v7510_v10, %s5828_s8  ;;  %v3825_v45 = vpop.permute.xlu1 %3824 }
 0x9ed   :  { %3834 = vst.msk [vmem:[#allocation5 + $0x1f0] sm:$0xff] %vm3354_vm13, %v3825_v45 }
 0x9ee   :  { %v3827_v46 = vpop.permute.xlu0 %3826  ;;  %3424 = vrot.lane.b32.xlu1 %v7503_v0, %s5829_s29 }
 0x9ef   :  { %3835 = vst.msk [vmem:[#allocation5 + $0x1f8] sm:$0xff] %vm3354_vm13, %v3827_v46  ;;  %v5765_v46 = vld [vmem:[%s8123_s9 + $0x4] ss:$28 sps:$4 sm:$0xff]  }
 0x9f0   :  { %3426 = vrot.lane.b32.xlu0 %v7510_v10, %s5829_s29  ;;  %v3697_v39 = vpop.permute.xlu1 %3696  ;;  %4415 = vmatprep.mubr.bf16.mxu0 %v5765_v46 }
 0x9f1   :  { %3706 = vst.msk [vmem:[#allocation5 + $0x170] sm:$0xff] %vm3354_vm13, %v3697_v39 }
 0x9f2   :  { %v3699_v4 = vpop.permute.xlu0 %3698  ;;  %3584 = vrot.lane.b32.xlu1 %v7503_v0, %s5827_s18 }
 0x9f3   :  { %3707 = vst.msk [vmem:[#allocation5 + $0x178] sm:$0xff] %vm3354_vm13, %v3699_v4 }
 0x9f4   :  { %3586 = vrot.lane.b32.xlu0 %v7510_v10, %s5827_s18  ;;  %v3469_v17 = vpop.permute.xlu1 %3468 }
 0x9f5   :  { %3480 = vst.msk [vmem:[#allocation5 + $0x80] sm:$0xff] %vm3354_vm13, %v3469_v17 }
 0x9f6   :  { %v3471_v47 = vpop.permute.xlu0 %3470  ;;  %3456 = vrot.lane.b32.xlu1 %v7503_v0, %s5809_s16 }
 0x9f7   :  { %3481 = vst.msk [vmem:[#allocation5 + $0x88] sm:$0xff] %vm3354_vm13, %v3471_v47 }
 0x9f8   :  { %3458 = vrot.lane.b32.xlu0 %v7510_v10, %s5809_s16  ;;  %v3501_v40 = vpop.permute.xlu1 %3500 }
 0x9f9   :  { %3512 = vst.msk [vmem:[#allocation5 + $0xa0] sm:$0xff] %vm3354_vm13, %v3501_v40 }
 0x9fa   :  { %v3503_v48 = vpop.permute.xlu0 %3502  ;;  %4000 = vrot.lane.b32.xlu1 %v7503_v0, %s5818_s0 }
 0x9fb   :  { %3513 = vst.msk [vmem:[#allocation5 + $0xa8] sm:$0xff] %vm3354_vm13, %v3503_v48 }
 0x9fc   :  { %4002 = vrot.lane.b32.xlu0 %v7510_v10, %s5818_s0  ;;  %v3385_v41 = vpop.permute.xlu1 %3384 }
 0x9fd   :  { %3396 = vst.msk [vmem:[#allocation5 + $0x20] sm:$0xff] %vm3354_vm13, %v3385_v41 }
 0x9fe   :  { %3400 = vst.msk [vmem:[#allocation5 + $0x20] sm:$0xff] %vm3375_vm5, %v7506_v2  ;;  %v3387_v50 = vpop.permute.xlu0 %3386  ;;  %3872 = vrot.lane.b32.xlu1 %v7503_v0, %s5843_s22 }
 0x9ff   :  { %3397 = vst.msk [vmem:[#allocation5 + $0x28] sm:$0xff] %vm3354_vm13, %v3387_v50 }
 0xa00   :  { %3401 = vst.msk [vmem:[#allocation5 + $0x28] sm:$0xff] %vm3375_vm5, %v7513_v11  ;;  %3874 = vrot.lane.b32.xlu0 %v7510_v10, %s5843_s22  ;;  %v3533_v43 = vpop.permute.xlu1 %3532 }
 0xa01   :  { %3544 = vst.msk [vmem:[#allocation5 + $0xc0] sm:$0xff] %vm3354_vm13, %v3533_v43 }
 0xa02   :  { %v3535_v35 = vpop.permute.xlu0 %3534  ;;  %3744 = vrot.lane.b32.xlu1 %v7503_v0, %s5844_s23 }
 0xa03   :  { %3545 = vst.msk [vmem:[#allocation5 + $0xc8] sm:$0xff] %vm3354_vm13, %v3535_v35 }
 0xa04   :  { %3746 = vrot.lane.b32.xlu0 %v7510_v10, %s5844_s23  ;;  %v3405_v51 = vpop.permute.xlu1 %3404 }
 0xa05   :  { %3416 = vst.msk [vmem:[#allocation5 + $0x40] sm:$0xff] %vm3354_vm13, %v3405_v51 }
 0xa06   :  { %v3407_v36 = vpop.permute.xlu0 %3406  ;;  %3616 = vrot.lane.b32.xlu1 %v7503_v0, %s5830_s26 }
 0xa07   :  { %3417 = vst.msk [vmem:[#allocation5 + $0x48] sm:$0xff] %vm3354_vm13, %v3407_v36 }
 0xa08   :  { %3618 = vrot.lane.b32.xlu0 %v7510_v10, %s5830_s26  ;;  %v3565_v52 = vpop.permute.xlu1 %3564 }
 0xa09   :  { %3576 = vst.msk [vmem:[#allocation5 + $0xe0] sm:$0xff] %vm3354_vm13, %v3565_v52 }
 0xa0a   :  { %v3567_v5 = vpop.permute.xlu0 %3566  ;;  %4032 = vrot.lane.b32.xlu1 %v7503_v0, %s5832_s28 }
 0xa0b   :  { %3577 = vst.msk [vmem:[#allocation5 + $0xe8] sm:$0xff] %vm3354_vm13, %v3567_v5 }
 0xa0c   :  { %4034 = vrot.lane.b32.xlu0 %v7510_v10, %s5832_s28  ;;  %v3437_v61 = vpop.permute.xlu1 %3436 }
 0xa0d   :  { %3448 = vst.msk [vmem:[#allocation5 + $0x60] sm:$0xff] %vm3354_vm13, %v3437_v61 }
 0xa0e   :  { %v3439_v13 = vpop.permute.xlu0 %3438  ;;  %3904 = vrot.lane.b32.xlu1 %v7503_v0, %s5833_s4 }
 0xa0f   :  { %3449 = vst.msk [vmem:[#allocation5 + $0x68] sm:$0xff] %vm3354_vm13, %v3439_v13 }
 0xa10   :  { %3906 = vrot.lane.b32.xlu0 %v7510_v10, %s5833_s4  ;;  %v3981_v14 = vpop.permute.xlu1 %3980 }
 0xa11   :  { %3992 = vst.msk [vmem:[#allocation5 + $0x280] sm:$0xff] %vm3354_vm13, %v3981_v14 }
 0xa12   :  { %v3983_v15 = vpop.permute.xlu0 %3982  ;;  %3776 = vrot.lane.b32.xlu1 %v7503_v0, %s5834_s30 }
 0xa13   :  { %3993 = vst.msk [vmem:[#allocation5 + $0x288] sm:$0xff] %vm3354_vm13, %v3983_v15 }
 0xa14   :  { %3778 = vrot.lane.b32.xlu0 %v7510_v10, %s5834_s30  ;;  %v3853_v16 = vpop.permute.xlu1 %3852 }
 0xa15   :  { %3864 = vst.msk [vmem:[#allocation5 + $0x200] sm:$0xff] %vm3354_vm13, %v3853_v16 }
 0xa16   :  { %v3855_v6 = vpop.permute.xlu0 %3854  ;;  %3648 = vrot.lane.b32.xlu1 %v7503_v0, %s5835_s1 }
 0xa17   :  { %3865 = vst.msk [vmem:[#allocation5 + $0x208] sm:$0xff] %vm3354_vm13, %v3855_v6 }
 0xa18   :  { %3650 = vrot.lane.b32.xlu0 %v7510_v10, %s5835_s1  ;;  %v3725_v53 = vpop.permute.xlu1 %3724 }
 0xa19   :  { %3736 = vst.msk [vmem:[#allocation5 + $0x180] sm:$0xff] %vm3354_vm13, %v3725_v53 }
 0xa1a   :  { %v3727_v18 = vpop.permute.xlu0 %3726  ;;  %4064 = vrot.lane.b32.xlu1 %v7503_v0, %s5823_s2 }
 0xa1b   :  { %3737 = vst.msk [vmem:[#allocation5 + $0x188] sm:$0xff] %vm3354_vm13, %v3727_v18 }
 0xa1c   :  { %4066 = vrot.lane.b32.xlu0 %v7510_v10, %s5823_s2  ;;  %v3597_v21 = vpop.permute.xlu1 %3596 }
 0xa1d   :  { %3608 = vst.msk [vmem:[#allocation5 + $0x100] sm:$0xff] %vm3354_vm13, %v3597_v21 }
 0xa1e   :  { %v3599_v58 = vpop.permute.xlu0 %3598  ;;  %3936 = vrot.lane.b32.xlu1 %v7503_v0, %s5803_s25 }
 0xa1f   :  { %3609 = vst.msk [vmem:[#allocation5 + $0x108] sm:$0xff] %vm3354_vm13, %v3599_v58 }
 0xa20   :  { %3938 = vrot.lane.b32.xlu0 %v7510_v10, %s5803_s25  ;;  %v4013_v59 = vpop.permute.xlu1 %4012 }
 0xa21   :  { %4024 = vst.msk [vmem:[#allocation5 + $0x2a0] sm:$0xff] %vm3354_vm13, %v4013_v59 }
 0xa22   :  { %v4015_v62 = vpop.permute.xlu0 %4014  ;;  %3808 = vrot.lane.b32.xlu1 %v7503_v0, %s5836_s15 }
 0xa23   :  { %4025 = vst.msk [vmem:[#allocation5 + $0x2a8] sm:$0xff] %vm3354_vm13, %v4015_v62 }
 0xa24   :  { %3810 = vrot.lane.b32.xlu0 %v7510_v10, %s5836_s15  ;;  %v3885_v24 = vpop.permute.xlu1 %3884 }
 0xa25   :  { %3896 = vst.msk [vmem:[#allocation5 + $0x220] sm:$0xff] %vm3354_vm13, %v3885_v24 }
 0xa26   :  { %v3887_v60 = vpop.permute.xlu0 %3886  ;;  %3680 = vrot.lane.b32.xlu1 %v7503_v0, %s5837_s17 }
 0xa27   :  { %3897 = vst.msk [vmem:[#allocation5 + $0x228] sm:$0xff] %vm3354_vm13, %v3887_v60 }
 0xa28   :  { %3682 = vrot.lane.b32.xlu0 %v7510_v10, %s5837_s17  ;;  %v3757_v26 = vpop.permute.xlu1 %3756 }
 0xa29   :  { %3768 = vst.msk [vmem:[#allocation5 + $0x1a0] sm:$0xff] %vm3354_vm13, %v3757_v26 }
 0xa2a   :  { %v3759_v54 = vpop.permute.xlu0 %3758  ;;  %4096 = vrot.lane.b32.xlu1 %v7503_v0, %s5838_s5 }
 0xa2b   :  { %3769 = vst.msk [vmem:[#allocation5 + $0x1a8] sm:$0xff] %vm3354_vm13, %v3759_v54  ;;  %v5773_v54 = vld [vmem:[%s8123_s9 + $0xc] ss:$28 sps:$4 sm:$0xff]  }
 0xa2c   :  { %4098 = vrot.lane.b32.xlu0 %v7510_v10, %s5838_s5  ;;  %v3629_v27 = vpop.permute.xlu1 %3628  ;;  %4464 = vmatprep.mubr.bf16.mxu1 %v5773_v54 }
 0xa2d   :  { %3640 = vst.msk [vmem:[#allocation5 + $0x120] sm:$0xff] %vm3354_vm13, %v3629_v27 }
 0xa2e   :  { %v3631_v28 = vpop.permute.xlu0 %3630  ;;  %3968 = vrot.lane.b32.xlu1 %v7503_v0, %s5839_s19 }
 0xa2f   :  { %3641 = vst.msk [vmem:[#allocation5 + $0x128] sm:$0xff] %vm3354_vm13, %v3631_v28 }
 0xa30   :  { %3970 = vrot.lane.b32.xlu0 %v7510_v10, %s5839_s19  ;;  %v4045_v55 = vpop.permute.xlu1 %4044 }
 0xa31   :  { %4056 = vst.msk [vmem:[#allocation5 + $0x2c0] sm:$0xff] %vm3354_vm13, %v4045_v55 }
 0xa32   :  { %v4047_v29 = vpop.permute.xlu0 %4046  ;;  %3840 = vrot.lane.b32.xlu1 %v7503_v0, %s5840_s20 }
 0xa33   :  { %4057 = vst.msk [vmem:[#allocation5 + $0x2c8] sm:$0xff] %vm3354_vm13, %v4047_v29 }
 0xa34   :  { %3842 = vrot.lane.b32.xlu0 %v7510_v10, %s5840_s20  ;;  %v3917_v30 = vpop.permute.xlu1 %3916 }
 0xa35   :  { %3928 = vst.msk [vmem:[#allocation5 + $0x240] sm:$0xff] %vm3354_vm13, %v3917_v30 }
 0xa36   :  { %v3919_v56 = vpop.permute.xlu0 %3918  ;;  %3712 = vrot.lane.b32.xlu1 %v7503_v0, %s5841_s6 }
 0xa37   :  { %3929 = vst.msk [vmem:[#allocation5 + $0x248] sm:$0xff] %vm3354_vm13, %v3919_v56 }
 0xa38   :  { %3714 = vrot.lane.b32.xlu0 %v7510_v10, %s5841_s6  ;;  %v3789_v23 = vpop.permute.xlu1 %3788 }
 0xa39   :  { %3800 = vst.msk [vmem:[#allocation5 + $0x1c0] sm:$0xff] %vm3354_vm13, %v3789_v23 }
 0xa3a   :  { %v3791_v34 = vpop.permute.xlu0 %3790  ;;  %3484 = vrot.lane.b32.xlu1 %v7506_v2, %s5831_s27 }
 0xa3b   :  { %3801 = vst.msk [vmem:[#allocation5 + $0x1c8] sm:$0xff] %vm3354_vm13, %v3791_v34 }
 0xa3c   :  { %3486 = vrot.lane.b32.xlu0 %v7513_v11, %s5831_s27  ;;  %v3661_v20 = vpop.permute.xlu1 %3660 }
 0xa3d   :  { %3672 = vst.msk [vmem:[#allocation5 + $0x140] sm:$0xff] %vm3354_vm13, %v3661_v20 }
 0xa3e   :  { %v3663_v9 = vpop.permute.xlu0 %3662  ;;  %3363 = vrot.lane.b32.xlu1 %v7506_v2, %s5845_s24 }
 0xa3f   :  { %3673 = vst.msk [vmem:[#allocation5 + $0x148] sm:$0xff] %vm3354_vm13, %v3663_v9 }
 0xa40   :  { %3365 = vrot.lane.b32.xlu0 %v7513_v11, %s5845_s24  ;;  %v4077_v3 = vpop.permute.xlu1 %4076 }
 0xa41   :  { %4088 = vst.msk [vmem:[#allocation5 + $0x2e0] sm:$0xff] %vm3354_vm13, %v4077_v3 }
 0xa42   :  { %v4079_v31 = vpop.permute.xlu0 %4078  ;;  %3516 = vrot.lane.b32.xlu1 %v7506_v2, %s5819_s3 }
 0xa43   :  { %4089 = vst.msk [vmem:[#allocation5 + $0x2e8] sm:$0xff] %vm3354_vm13, %v4079_v31 }
 0xa44   :  { %3518 = vrot.lane.b32.xlu0 %v7513_v11, %s5819_s3  ;;  %v3949_v57 = vpop.permute.xlu1 %3948 }
 0xa45   :  { %3960 = vst.msk [vmem:[#allocation5 + $0x260] sm:$0xff] %vm3354_vm13, %v3949_v57 }
 0xa46   :  { %v3951_v32 = vpop.permute.xlu0 %3950  ;;  %3548 = vrot.lane.b32.xlu1 %v7506_v2, %s5828_s8 }
 0xa47   :  { %3961 = vst.msk [vmem:[#allocation5 + $0x268] sm:$0xff] %vm3354_vm13, %v3951_v32 }
 0xa48   :  { %3550 = vrot.lane.b32.xlu0 %v7513_v11, %s5828_s8  ;;  %v3821_v22 = vpop.permute.xlu1 %3820 }
 0xa49   :  { %3832 = vst.msk [vmem:[#allocation5 + $0x1e0] sm:$0xff] %vm3354_vm13, %v3821_v22 }
 0xa4a   :  { %v3823_v12 = vpop.permute.xlu0 %3822  ;;  %3420 = vrot.lane.b32.xlu1 %v7506_v2, %s5829_s29 }
 0xa4b   :  { %3833 = vst.msk [vmem:[#allocation5 + $0x1e8] sm:$0xff] %vm3354_vm13, %v3823_v12 }
 0xa4c   :  { %3422 = vrot.lane.b32.xlu0 %v7513_v11, %s5829_s29  ;;  %v3693_v8 = vpop.permute.xlu1 %3692 }
 0xa4d   :  { %3704 = vst.msk [vmem:[#allocation5 + $0x160] sm:$0xff] %vm3354_vm13, %v3693_v8 }
 0xa4e   :  { %v3695_v33 = vpop.permute.xlu0 %3694  ;;  %3580 = vrot.lane.b32.xlu1 %v7506_v2, %s5827_s18 }
 0xa4f   :  { %3705 = vst.msk [vmem:[#allocation5 + $0x168] sm:$0xff] %vm3354_vm13, %v3695_v33 }
 0xa50   :  { %3582 = vrot.lane.b32.xlu0 %v7513_v11, %s5827_s18  ;;  %v3489_v37 = vpop.permute.xlu1 %3488 }
 0xa51   :  { %3498 = vst.msk [vmem:[#allocation5 + $0x90] sm:$0xff] %vm3375_vm5, %v3489_v37 }
 0xa52   :  { %v3491_v7 = vpop.permute.xlu0 %3490  ;;  %3452 = vrot.lane.b32.xlu1 %v7506_v2, %s5809_s16 }
 0xa53   :  { %3499 = vst.msk [vmem:[#allocation5 + $0x98] sm:$0xff] %vm3375_vm5, %v3491_v7 }
 0xa54   :  { %3454 = vrot.lane.b32.xlu0 %v7513_v11, %s5809_s16  ;;  %v3368_v19 = vpop.permute.xlu1 %3367 }
 0xa55   :  { %3378 = vst.msk [vmem:[#allocation5 + $0x10] sm:$0xff] %vm3375_vm5, %v3368_v19 }
 0xa56   :  { %v3370_v38 = vpop.permute.xlu0 %3369  ;;  %3996 = vrot.lane.b32.xlu1 %v7506_v2, %s5818_s0 }
 0xa57   :  { %3379 = vst.msk [vmem:[#allocation5 + $0x18] sm:$0xff] %vm3375_vm5, %v3370_v38 }
 0xa58   :  { %3998 = vrot.lane.b32.xlu0 %v7513_v11, %s5818_s0  ;;  %v3521_v25 = vpop.permute.xlu1 %3520  ;;  %v4174_v33 = vld [vmem:[#allocation5 + $0x90] sm:$0xff] }
 0xa59   :  { %3530 = vst.msk [vmem:[#allocation5 + $0xb0] sm:$0xff] %vm3375_vm5, %v3521_v25 }
 0xa5a   :  { %v3523_v1 = vpop.permute.xlu0 %3522  ;;  %3868 = vrot.lane.b32.xlu1 %v7506_v2, %s5843_s22  ;;  %v4175_v57 = vld [vmem:[#allocation5 + $0x98] sm:$0xff] }
 0xa5b   :  { %3531 = vst.msk [vmem:[#allocation5 + $0xb8] sm:$0xff] %vm3375_vm5, %v3523_v1  ;;  %v4265_v7 = vpack.c.bf16 %v4175_v57, %v4174_v33  ;;  %v5763_v57 = vld [vmem:[%s8123_s9] ss:$28 sps:$4 sm:$0xff]  }
 0xa5c   :  { %3870 = vrot.lane.b32.xlu0 %v7513_v11, %s5843_s22  ;;  %v3553_v45 = vpop.permute.xlu1 %3552  ;;  %v4158_v25 = vld [vmem:[#allocation5 + $0x10] sm:$0xff] }
 0xa5d   :  { %3562 = vst.msk [vmem:[#allocation5 + $0xd0] sm:$0xff] %vm3375_vm5, %v3553_v45 }
 0xa5e   :  { %v3555_v39 = vpop.permute.xlu0 %3554  ;;  %3740 = vrot.lane.b32.xlu1 %v7506_v2, %s5844_s23  ;;  %v4159_v19 = vld [vmem:[#allocation5 + $0x18] sm:$0xff] }
 0xa5f   :  { %3563 = vst.msk [vmem:[#allocation5 + $0xd8] sm:$0xff] %vm3375_vm5, %v3555_v39  ;;  %v4257_v46 = vpack.c.bf16 %v4159_v19, %v4158_v25 }
 0xa60   :  { %3742 = vrot.lane.b32.xlu0 %v7513_v11, %s5844_s23  ;;  %v3425_v4 = vpop.permute.xlu1 %3424  ;;  %s5851_s23 = smov 125  }
 0xa61   :  { %3434 = vst.msk [vmem:[#allocation5 + $0x50] sm:$0xff] %vm3375_vm5, %v3425_v4 }
 0xa62   :  { %v3427_v17 = vpop.permute.xlu0 %3426  ;;  %3612 = vrot.lane.b32.xlu1 %v7506_v2, %s5830_s26 }
 0xa63   :  { %3435 = vst.msk [vmem:[#allocation5 + $0x58] sm:$0xff] %vm3375_vm5, %v3427_v17  ;;  %v4161_v17 = vld [vmem:[#allocation5 + $0x28] sm:$0xff] }
 0xa64   :  { %3614 = vrot.lane.b32.xlu0 %v7513_v11, %s5830_s26  ;;  %v3585_v47 = vpop.permute.xlu1 %3584 }
 0xa65   :  { %3594 = vst.msk [vmem:[#allocation5 + $0xf0] sm:$0xff] %vm3375_vm5, %v3585_v47  ;;  %v4179_v47 = vld [vmem:[#allocation5 + $0xb8] sm:$0xff] }
 0xa66   :  { %v3587_v40 = vpop.permute.xlu0 %3586  ;;  %4028 = vrot.lane.b32.xlu1 %v7506_v2, %s5832_s28 }
 0xa67   :  { %3595 = vst.msk [vmem:[#allocation5 + $0xf8] sm:$0xff] %vm3375_vm5, %v3587_v40 }
 0xa68   :  { %4030 = vrot.lane.b32.xlu0 %v7513_v11, %s5832_s28  ;;  %v3457_v48 = vpop.permute.xlu1 %3456  ;;  %v4166_v54 = vld [vmem:[#allocation5 + $0x50] sm:$0xff] }
 0xa69   :  { %3466 = vst.msk [vmem:[#allocation5 + $0x70] sm:$0xff] %vm3375_vm5, %v3457_v48  ;;  %v4160_v48 = vld [vmem:[#allocation5 + $0x20] sm:$0xff] }
 0xa6a   :  { %v3459_v41 = vpop.permute.xlu0 %3458  ;;  %3900 = vrot.lane.b32.xlu1 %v7506_v2, %s5833_s4 }
 0xa6b   :  { %3467 = vst.msk [vmem:[#allocation5 + $0x78] sm:$0xff] %vm3375_vm5, %v3459_v41  ;;  %v4258_v41 = vpack.c.bf16 %v4161_v17, %v4160_v48  ;;  %v4152_v17 = vld [vmem:[%s8123_s9 + $0x54] sm:$0xff] }
 0xa6c   :  { %3902 = vrot.lane.b32.xlu0 %v7513_v11, %s5833_s4  ;;  %v4001_v50 = vpop.permute.xlu1 %4000 }
 0xa6d   :  { %4010 = vst.msk [vmem:[#allocation5 + $0x290] sm:$0xff] %vm3375_vm5, %v4001_v50  ;;  %v4178_v50 = vld [vmem:[#allocation5 + $0xb0] sm:$0xff] }
 0xa6e   :  { %v4003_v43 = vpop.permute.xlu0 %4002  ;;  %3772 = vrot.lane.b32.xlu1 %v7506_v2, %s5834_s30 }
 0xa6f   :  { %4011 = vst.msk [vmem:[#allocation5 + $0x298] sm:$0xff] %vm3375_vm5, %v4003_v43 }
 0xa70   :  { %3774 = vrot.lane.b32.xlu0 %v7513_v11, %s5834_s30  ;;  %v3873_v35 = vpop.permute.xlu1 %3872 }
 0xa71   :  { %3882 = vst.msk [vmem:[#allocation5 + $0x210] sm:$0xff] %vm3375_vm5, %v3873_v35  ;;  %v4267_v35 = vpack.c.bf16 %v4179_v47, %v4178_v50 }
 0xa72   :  { %v3875_v51 = vpop.permute.xlu0 %3874  ;;  %3644 = vrot.lane.b32.xlu1 %v7506_v2, %s5835_s1 }
 0xa73   :  { %3883 = vst.msk [vmem:[#allocation5 + $0x218] sm:$0xff] %vm3375_vm5, %v3875_v51  ;;  %v4163_v51 = vld [vmem:[#allocation5 + $0x38] sm:$0xff] }
 0xa74   :  { %3646 = vrot.lane.b32.xlu0 %v7513_v11, %s5835_s1  ;;  %v3745_v36 = vpop.permute.xlu1 %3744  ;;  %v4238_v25 = vld [vmem:[#allocation5 + $0x290] sm:$0xff] }
 0xa75   :  { %3754 = vst.msk [vmem:[#allocation5 + $0x190] sm:$0xff] %vm3375_vm5, %v3745_v36 }
 0xa76   :  { %v3747_v52 = vpop.permute.xlu0 %3746  ;;  %4060 = vrot.lane.b32.xlu1 %v7506_v2, %s5823_s2 }
 0xa77   :  { %3755 = vst.msk [vmem:[#allocation5 + $0x198] sm:$0xff] %vm3375_vm5, %v3747_v52 }
 0xa78   :  { %4062 = vrot.lane.b32.xlu0 %v7513_v11, %s5823_s2  ;;  %v3617_v5 = vpop.permute.xlu1 %3616 }
 0xa79   :  { %3626 = vst.msk [vmem:[#allocation5 + $0x110] sm:$0xff] %vm3375_vm5, %v3617_v5  ;;  %v4162_v5 = vld [vmem:[#allocation5 + $0x30] sm:$0xff] }
 0xa7a   :  { %v3619_v61 = vpop.permute.xlu0 %3618  ;;  %3932 = vrot.lane.b32.xlu1 %v7506_v2, %s5803_s25 }
 0xa7b   :  { %3627 = vst.msk [vmem:[#allocation5 + $0x118] sm:$0xff] %vm3375_vm5, %v3619_v61  ;;  %v4259_v61 = vpack.c.bf16 %v4163_v51, %v4162_v5 }
 0xa7c   :  { %3934 = vrot.lane.b32.xlu0 %v7513_v11, %s5803_s25  ;;  %v4033_v13 = vpop.permute.xlu1 %4032  ;;  %s5846_s25 = smov 32  }
 0xa7d   :  { %4042 = vst.msk [vmem:[#allocation5 + $0x2b0] sm:$0xff] %vm3375_vm5, %v4033_v13 }
 0xa7e   :  { %v4035_v14 = vpop.permute.xlu0 %4034  ;;  %3804 = vrot.lane.b32.xlu1 %v7506_v2, %s5836_s15 }
 0xa7f   :  { %4043 = vst.msk [vmem:[#allocation5 + $0x2b8] sm:$0xff] %vm3375_vm5, %v4035_v14 }
 0xa80   :  { %3806 = vrot.lane.b32.xlu0 %v7513_v11, %s5836_s15  ;;  %v3905_v15 = vpop.permute.xlu1 %3904 }
 0xa81   :  { %3914 = vst.msk [vmem:[#allocation5 + $0x230] sm:$0xff] %vm3375_vm5, %v3905_v15 }
 0xa82   :  { %v3907_v16 = vpop.permute.xlu0 %3906  ;;  %3676 = vrot.lane.b32.xlu1 %v7506_v2, %s5837_s17 }
 0xa83   :  { %3915 = vst.msk [vmem:[#allocation5 + $0x238] sm:$0xff] %vm3375_vm5, %v3907_v16 }
 0xa84   :  { %3678 = vrot.lane.b32.xlu0 %v7513_v11, %s5837_s17  ;;  %v3777_v6 = vpop.permute.xlu1 %3776 }
 0xa85   :  { %3786 = vst.msk [vmem:[#allocation5 + $0x1b0] sm:$0xff] %vm3375_vm5, %v3777_v6  ;;  %v4183_v6 = vld [vmem:[#allocation5 + $0xd8] sm:$0xff] }
 0xa86   :  { %v3779_v53 = vpop.permute.xlu0 %3778  ;;  %4092 = vrot.lane.b32.xlu1 %v7506_v2, %s5838_s5 }
 0xa87   :  { %3787 = vst.msk [vmem:[#allocation5 + $0x1b8] sm:$0xff] %vm3375_vm5, %v3779_v53 }
 0xa88   :  { %4094 = vrot.lane.b32.xlu0 %v7513_v11, %s5838_s5  ;;  %v3649_v18 = vpop.permute.xlu1 %3648 }
 0xa89   :  { %3658 = vst.msk [vmem:[#allocation5 + $0x130] sm:$0xff] %vm3375_vm5, %v3649_v18 }
 0xa8a   :  { %v3651_v21 = vpop.permute.xlu0 %3650  ;;  %3964 = vrot.lane.b32.xlu1 %v7506_v2, %s5839_s19 }
 0xa8b   :  { %3659 = vst.msk [vmem:[#allocation5 + $0x138] sm:$0xff] %vm3375_vm5, %v3651_v21 }
 0xa8c   :  { %3966 = vrot.lane.b32.xlu0 %v7513_v11, %s5839_s19  ;;  %v4065_v58 = vpop.permute.xlu1 %4064 }
 0xa8d   :  { %4074 = vst.msk [vmem:[#allocation5 + $0x2d0] sm:$0xff] %vm3375_vm5, %v4065_v58  ;;  %v4182_v58 = vld [vmem:[#allocation5 + $0xd0] sm:$0xff] }
 0xa8e   :  { %v4067_v59 = vpop.permute.xlu0 %4066  ;;  %3836 = vrot.lane.b32.xlu1 %v7506_v2, %s5840_s20 }
 0xa8f   :  { %4075 = vst.msk [vmem:[#allocation5 + $0x2d8] sm:$0xff] %vm3375_vm5, %v4067_v59 }
 0xa90   :  { %3838 = vrot.lane.b32.xlu0 %v7513_v11, %s5840_s20  ;;  %v3937_v62 = vpop.permute.xlu1 %3936 }
 0xa91   :  { %3946 = vst.msk [vmem:[#allocation5 + $0x250] sm:$0xff] %vm3375_vm5, %v3937_v62  ;;  %v4269_v62 = vpack.c.bf16 %v4183_v6, %v4182_v58 }
 0xa92   :  { %v3939_v24 = vpop.permute.xlu0 %3938  ;;  %3708 = vrot.lane.b32.xlu1 %v7506_v2, %s5841_s6 }
 0xa93   :  { %3947 = vst.msk [vmem:[#allocation5 + $0x258] sm:$0xff] %vm3375_vm5, %v3939_v24  ;;  %v4167_v24 = vld [vmem:[#allocation5 + $0x58] sm:$0xff] }
 0xa94   :  { %3710 = vrot.lane.b32.xlu0 %v7513_v11, %s5841_s6  ;;  %v3809_v60 = vpop.permute.xlu1 %3808 }
 0xa95   :  { %3818 = vst.msk [vmem:[#allocation5 + $0x1d0] sm:$0xff] %vm3375_vm5, %v3809_v60 }
 0xa96   :  { %v3811_v26 = vpop.permute.xlu0 %3810  ;;  %4108 = vrot.lane.b32.xlu1 %v7375_v42, %s5846_s25 }
 0xa97   :  { %3819 = vst.msk [vmem:[#allocation5 + $0x1d8] sm:$0xff] %vm3375_vm5, %v3811_v26 }
 0xa98   :  { %4110 = vrot.lane.b32.xlu0 %v7385_v49, %s5846_s25  ;;  %v3681_v27 = vpop.permute.xlu1 %3680 }
 0xa99   :  { %3690 = vst.msk [vmem:[#allocation5 + $0x150] sm:$0xff] %vm3375_vm5, %v3681_v27  ;;  %v4261_v27 = vpack.c.bf16 %v4167_v24, %v4166_v54 }
 0xa9a   :  { %v3683_v28 = vpop.permute.xlu0 %3682  ;;  %4124 = vrot.lane.b32.xlu1 %v7506_v2, %s5842_s21 }
 0xa9b   :  { %3691 = vst.msk [vmem:[#allocation5 + $0x158] sm:$0xff] %vm3375_vm5, %v3683_v28 }
 0xa9c   :  { %4114 = vrot.lane.b32.xlu0 %v7379_v44, %s5846_s25  ;;  %v4097_v42 = vpop.permute.xlu1 %4096 }
 0xa9d   :  { %4106 = vst.msk [vmem:[#allocation5 + $0x2f0] sm:$0xff] %vm3375_vm5, %v4097_v42 }
 0xa9e   :  { %v4099_v55 = vpop.permute.xlu0 %4098  ;;  %4112 = vrot.lane.b32.xlu1 %v7371_v63, %s5846_s25 }
 0xa9f   :  { %4107 = vst.msk [vmem:[#allocation5 + $0x2f8] sm:$0xff] %vm3375_vm5, %v4099_v55 }
 0xaa0   :  { %4126 = vrot.lane.b32.xlu0 %v7513_v11, %s5842_s21  ;;  %v3969_v49 = vpop.permute.xlu1 %3968 }
 0xaa1   :  { %3978 = vst.msk [vmem:[#allocation5 + $0x270] sm:$0xff] %vm3375_vm5, %v3969_v49 }
 0xaa2   :  { %v3971_v29 = vpop.permute.xlu0 %3970  ;;  %4128 = vrot.lane.b32.xlu1 %v7503_v0, %s5842_s21 }
 0xaa3   :  { %3979 = vst.msk [vmem:[#allocation5 + $0x278] sm:$0xff] %vm3375_vm5, %v3971_v29  ;;  %v4187_v29 = vld [vmem:[#allocation5 + $0xf8] sm:$0xff] }
 0xaa4   :  { %4130 = vrot.lane.b32.xlu0 %v7510_v10, %s5842_s21  ;;  %v3841_v44 = vpop.permute.xlu1 %3840 }
 0xaa5   :  { %3850 = vst.msk [vmem:[#allocation5 + $0x1f0] sm:$0xff] %vm3375_vm5, %v3841_v44 }
 0xaa6   :  { %v3843_v63 = vpop.permute.xlu0 %3842 }
 0xaa7   :  { %3851 = vst.msk [vmem:[#allocation5 + $0x1f8] sm:$0xff] %vm3375_vm5, %v3843_v63 }
 0xaa8   :  { %v3713_v2 = vpop.permute.xlu1 %3712 }
 0xaa9   :  { %3722 = vst.msk [vmem:[#allocation5 + $0x170] sm:$0xff] %vm3375_vm5, %v3713_v2 }
 0xaaa   :  { %v3715_v11 = vpop.permute.xlu0 %3714 }
 0xaab   :  { %3723 = vst.msk [vmem:[#allocation5 + $0x178] sm:$0xff] %vm3375_vm5, %v3715_v11  ;;  %v4186_v11 = vld [vmem:[#allocation5 + $0xf0] sm:$0xff] }
 0xaac   :  { %v3485_v30 = vpop.permute.xlu1 %3484 }
 0xaad   :  { %3496 = vst.msk [vmem:[#allocation5 + $0x80] sm:$0xff] %vm3375_vm5, %v3485_v30 }
 0xaae   :  { %v3487_v0 = vpop.permute.xlu0 %3486 }
 0xaaf   :  { %3497 = vst.msk [vmem:[#allocation5 + $0x88] sm:$0xff] %vm3375_vm5, %v3487_v0  ;;  %v4271_v0 = vpack.c.bf16 %v4187_v29, %v4186_v11 }
 0xab0   :  { %v3364_v56 = vpop.permute.xlu1 %3363 }
 0xab1   :  { %3376 = vst.msk [vmem:[#allocation5] sm:$0xff] %vm3375_vm5, %v3364_v56  ;;  %v4171_v56 = vld [vmem:[#allocation5 + $0x78] sm:$0xff] }
 0xab2   :  { %v3366_v10 = vpop.permute.xlu0 %3365 }
 0xab3   :  { %3377 = vst.msk [vmem:[#allocation5 + $0x8] sm:$0xff] %vm3375_vm5, %v3366_v10 }
 0xab4   :  { %v3517_v23 = vpop.permute.xlu1 %3516  ;;  %v4172_v20 = vld [vmem:[#allocation5 + $0x80] sm:$0xff] }
 0xab5   :  { %3528 = vst.msk [vmem:[#allocation5 + $0xa0] sm:$0xff] %vm3375_vm5, %v3517_v23 }
 0xab6   :  { %v3519_v34 = vpop.permute.xlu0 %3518  ;;  %v4173_v9 = vld [vmem:[#allocation5 + $0x88] sm:$0xff] }
 0xab7   :  { %3529 = vst.msk [vmem:[#allocation5 + $0xa8] sm:$0xff] %vm3375_vm5, %v3519_v34  ;;  %v4264_v3 = vpack.c.bf16 %v4173_v9, %v4172_v20  ;;  %v4170_v34 = vld [vmem:[#allocation5 + $0x70] sm:$0xff] }
 0xab8   :  { %v3549_v31 = vpop.permute.xlu1 %3548  ;;  %v4156_v22 = vld [vmem:[#allocation5] sm:$0xff]  ;;  %v4263_v20 = vpack.c.bf16 %v4171_v56, %v4170_v34 }
 0xab9   :  { %3560 = vst.msk [vmem:[#allocation5 + $0xc0] sm:$0xff] %vm3375_vm5, %v3549_v31  ;;  %5157 = vmatprep.subr.bf16.mxu0 %v4264_v3 }
 0xaba   :  { %v3551_v32 = vpop.permute.xlu0 %3550  ;;  %v4157_v12 = vld [vmem:[#allocation5 + $0x8] sm:$0xff] }
 0xabb   :  { %3561 = vst.msk [vmem:[#allocation5 + $0xc8] sm:$0xff] %vm3375_vm5, %v3551_v32  ;;  %v4256_v8 = vpack.c.bf16 %v4157_v12, %v4156_v22  ;;  %v4239_v22 = vld [vmem:[#allocation5 + $0x298] sm:$0xff] }
 0xabc   :  { %v3421_v37 = vpop.permute.xlu1 %3420  ;;  %v4176_v1 = vld [vmem:[#allocation5 + $0xa0] sm:$0xff]  ;;  %v5766_v12 = vld [vmem:[%s8123_s9 + $0x3c] ss:$28 sps:$4 sm:$0xff]  }
 0xabd   :  { %3432 = vst.msk [vmem:[#allocation5 + $0x40] sm:$0xff] %vm3375_vm5, %v3421_v37  ;;  %5158 = vmatpush3.bf16.msra.mxu0 %v4256_v8 }
 0xabe   :  { %v3423_v38 = vpop.permute.xlu0 %3422  ;;  %5159 = vmatprep.subr.bf16.mxu0 %v4265_v7  ;;  %v4177_v45 = vld [vmem:[#allocation5 + $0xa8] sm:$0xff] }
 0xabf   :  { %3433 = vst.msk [vmem:[#allocation5 + $0x48] sm:$0xff] %vm3375_vm5, %v3423_v38  ;;  %v4266_v39 = vpack.c.bf16 %v4177_v45, %v4176_v1  ;;  %v4297_v45 = vpack.c.bf16 %v4239_v22, %v4238_v25 }
 0xac0   :  { %v3581_v4 = vpop.permute.xlu1 %3580  ;;  %v4180_v13 = vld [vmem:[#allocation5 + $0xc0] sm:$0xff] }
 0xac1   :  { %3592 = vst.msk [vmem:[#allocation5 + $0xe0] sm:$0xff] %vm3375_vm5, %v3581_v4  ;;  %5160 = vmatpush3.bf16.msra.mxu0 %v4257_v46  ;;  %v4223_v46 = vld [vmem:[#allocation5 + $0x218] sm:$0xff] }
 0xac2   :  { %v3583_v40 = vpop.permute.xlu0 %3582  ;;  %5161 = vmatprep.subr.bf16.mxu0 %v4266_v39  ;;  %v4181_v36 = vld [vmem:[#allocation5 + $0xc8] sm:$0xff]  ;;  %v4207_v39 = vld [vmem:[#allocation5 + $0x198] sm:$0xff] }
 0xac3   :  { %3593 = vst.msk [vmem:[#allocation5 + $0xe8] sm:$0xff] %vm3375_vm5, %v3583_v40  ;;  %v4268_v15 = vpack.c.bf16 %v4181_v36, %v4180_v13  ;;  %v4148_v4 = vld [vmem:[%s8123_s9 + $0x38] sm:$0xff] }
 0xac4   :  { %v3453_v43 = vpop.permute.xlu1 %3452  ;;  %v4164_v18 = vld [vmem:[#allocation5 + $0x40] sm:$0xff]  ;;  %v5112_v5 = vcombine.low %v4148_v4, %v4152_v17  ;;  %v4230_v17 = vld [vmem:[#allocation5 + $0x250] sm:$0xff] }
 0xac5   :  { %3464 = vst.msk [vmem:[#allocation5 + $0x60] sm:$0xff] %vm3375_vm5, %v3453_v43  ;;  %5162 = vmatpush3.bf16.msra.mxu0 %v4258_v41  ;;  %v4222_v41 = vld [vmem:[#allocation5 + $0x210] sm:$0xff] }
 0xac6   :  { %v3455_v52 = vpop.permute.xlu0 %3454  ;;  %5163 = vmatprep.subr.bf16.mxu0 %v4267_v35  ;;  %v4165_v16 = vld [vmem:[#allocation5 + $0x48] sm:$0xff]  ;;  %v4289_v43 = vpack.c.bf16 %v4223_v46, %v4222_v41  ;;  %v4206_v35 = vld [vmem:[#allocation5 + $0x190] sm:$0xff]  ;;  %v4215_v41 = vld [vmem:[#allocation5 + $0x1d8] sm:$0xff] }
 0xac7   :  { %3465 = vst.msk [vmem:[#allocation5 + $0x68] sm:$0xff] %vm3375_vm5, %v3455_v52  ;;  %v4260_v21 = vpack.c.bf16 %v4165_v16, %v4164_v18  ;;  %v4281_v36 = vpack.c.bf16 %v4207_v39, %v4206_v35  ;;  %v4191_v52 = vld [vmem:[#allocation5 + $0x118] sm:$0xff]  ;;  %v5770_v16 = vld [vmem:[%s8123_s9 + $0x14] ss:$28 sps:$4 sm:$0xff]  }
 0xac8   :  { %v3997_v14 = vpop.permute.xlu1 %3996  ;;  %v4184_v28 = vld [vmem:[#allocation5 + $0xe0] sm:$0xff] }
 0xac9   :  { %4008 = vst.msk [vmem:[#allocation5 + $0x280] sm:$0xff] %vm3375_vm5, %v3997_v14  ;;  %5164 = vmatpush3.bf16.msra.mxu0 %v4259_v61  ;;  %v4190_v61 = vld [vmem:[#allocation5 + $0x110] sm:$0xff] }
 0xaca   :  { %v3999_v53 = vpop.permute.xlu0 %3998  ;;  %5165 = vmatprep.subr.bf16.mxu0 %v4268_v15  ;;  %v4185_v60 = vld [vmem:[#allocation5 + $0xe8] sm:$0xff]  ;;  %v4273_v6 = vpack.c.bf16 %v4191_v52, %v4190_v61  ;;  %v4199_v61 = vld [vmem:[#allocation5 + $0x158] sm:$0xff] }
 0xacb   :  { %4009 = vst.msk [vmem:[#allocation5 + $0x288] sm:$0xff] %vm3375_vm5, %v3999_v53  ;;  %v4270_v55 = vpack.c.bf16 %v4185_v60, %v4184_v28  ;;  %v4242_v60 = vld [vmem:[#allocation5 + $0x2b0] sm:$0xff] }
 0xacc   :  { %v3869_v59 = vpop.permute.xlu1 %3868  ;;  %v4168_v63 = vld [vmem:[#allocation5 + $0x60] sm:$0xff] }
 0xacd   :  { %3880 = vst.msk [vmem:[#allocation5 + $0x200] sm:$0xff] %vm3375_vm5, %v3869_v59  ;;  %5166 = vmatpush3.bf16.msra.mxu0 %v4260_v21  ;;  %v4243_v21 = vld [vmem:[#allocation5 + $0x2b8] sm:$0xff] }
 0xace   :  { %v3871_v26 = vpop.permute.xlu0 %3870  ;;  %5167 = vmatprep.subr.bf16.mxu0 %v4269_v62  ;;  %v4169_v49 = vld [vmem:[#allocation5 + $0x68] sm:$0xff]  ;;  %v4299_v54 = vpack.c.bf16 %v4243_v21, %v4242_v60  ;;  %v4251_v21 = vld [vmem:[#allocation5 + $0x2f8] sm:$0xff]  ;;  %v4250_v60 = vld [vmem:[#allocation5 + $0x2f0] sm:$0xff] }
 0xacf   :  { %3881 = vst.msk [vmem:[#allocation5 + $0x208] sm:$0xff] %vm3375_vm5, %v3871_v26  ;;  %v4262_v2 = vpack.c.bf16 %v4169_v49, %v4168_v63  ;;  %v4226_v49 = vld [vmem:[#allocation5 + $0x230] sm:$0xff] }
 0xad0   :  { %v3741_v42 = vpop.permute.xlu1 %3740  ;;  %v4236_v9 = vld [vmem:[#allocation5 + $0x280] sm:$0xff] }
 0xad1   :  { %3752 = vst.msk [vmem:[#allocation5 + $0x180] sm:$0xff] %vm3375_vm5, %v3741_v42  ;;  %5168 = vmatpush3.bf16.msra.mxu0 %v4261_v27  ;;  %v4227_v27 = vld [vmem:[#allocation5 + $0x238] sm:$0xff] }
 0xad2   :  { %v3743_v44 = vpop.permute.xlu0 %3742  ;;  %5169 = vmatprep.subr.bf16.mxu0 %v4270_v55  ;;  %v4237_v10 = vld [vmem:[#allocation5 + $0x288] sm:$0xff] }
 0xad3   :  { %3753 = vst.msk [vmem:[#allocation5 + $0x188] sm:$0xff] %vm3375_vm5, %v3743_v44  ;;  %v4296_v31 = vpack.c.bf16 %v4237_v10, %v4236_v9  ;;  %v4291_v44 = vpack.c.bf16 %v4227_v27, %v4226_v49  ;;  %v4210_v10 = vld [vmem:[#allocation5 + $0x1b0] sm:$0xff]  ;;  %v4235_v27 = vld [vmem:[#allocation5 + $0x278] sm:$0xff] }
 0xad4   :  { %v3613_v30 = vpop.permute.xlu1 %3612  ;;  %v4220_v7 = vld [vmem:[#allocation5 + $0x200] sm:$0xff]  ;;  %v4234_v49 = vld [vmem:[#allocation5 + $0x270] sm:$0xff] }
 0xad5   :  { %3624 = vst.msk [vmem:[#allocation5 + $0x100] sm:$0xff] %vm3375_vm5, %v3613_v30  ;;  %5170 = vmatpush3.bf16.msra.mxu0 %v4262_v2  ;;  %v4211_v2 = vld [vmem:[#allocation5 + $0x1b8] sm:$0xff] }
 0xad6   :  { %v3615_v23 = vpop.permute.xlu0 %3614  ;;  %5171 = vmatprep.subr.bf16.mxu0 %v4271_v0  ;;  %v4221_v32 = vld [vmem:[#allocation5 + $0x208] sm:$0xff]  ;;  %v4283_v34 = vpack.c.bf16 %v4211_v2, %v4210_v10 }
 0xad7   :  { %3625 = vst.msk [vmem:[#allocation5 + $0x108] sm:$0xff] %vm3375_vm5, %v3615_v23  ;;  %v4288_v38 = vpack.c.bf16 %v4221_v32, %v4220_v7  ;;  %v5768_v2 = vld [vmem:[%s8123_s9 + $0x10] ss:$28 sps:$4 sm:$0xff]  }
 0xad8   :  { %v4029_v3 = vpop.permute.xlu1 %4028  ;;  %v4204_v33 = vld [vmem:[#allocation5 + $0x180] sm:$0xff] }
 0xad9   :  { %4040 = vst.msk [vmem:[#allocation5 + $0x2a0] sm:$0xff] %vm3375_vm5, %v4029_v3  ;;  %5172 = vmatpush3.bf16.msra.mxu0 %v4263_v20  ;;  %v4195_v20 = vld [vmem:[#allocation5 + $0x138] sm:$0xff]  ;;  %v4194_v3 = vld [vmem:[#allocation5 + $0x130] sm:$0xff] }
 0xada   :  { %v4031_v8 = vpop.permute.xlu0 %4030  ;;  %5213 = vmatprep.subr.bf16.mxu0 %v4296_v31  ;;  %v4205_v37 = vld [vmem:[#allocation5 + $0x188] sm:$0xff]  ;;  %v4275_v32 = vpack.c.bf16 %v4195_v20, %v4194_v3  ;;  %v4203_v3 = vld [vmem:[#allocation5 + $0x178] sm:$0xff] }
 0xadb   :  { %4041 = vst.msk [vmem:[#allocation5 + $0x2a8] sm:$0xff] %vm3375_vm5, %v4031_v8  ;;  %v4280_v19 = vpack.c.bf16 %v4205_v37, %v4204_v33  ;;  %v4247_v8 = vld [vmem:[#allocation5 + $0x2d8] sm:$0xff] }
 0xadc   :  { %v3901_v1 = vpop.permute.xlu1 %3900  ;;  %4416 = vmatmul.mubr.bf16.vlgmr.msra.gmra.mrb[40].mxu0 %v5763_v57  ;;  %v4188_v40 = vld [vmem:[#allocation5 + $0x100] sm:$0xff] }
 0xadd   :  { %3912 = vst.msk [vmem:[#allocation5 + $0x220] sm:$0xff] %vm3375_vm5, %v3901_v1  ;;  %5185 = vmatprep.subr.bf16.mxu1 %v4280_v19  ;;  %5214 = vmatpush3.bf16.msra.mxu0 %v4288_v38  ;;  %v4246_v38 = vld [vmem:[#allocation5 + $0x2d0] sm:$0xff] }
 0xade   :  { %v3903_v47 = vpop.permute.xlu0 %3902  ;;  %5215 = vmatprep.subr.bf16.mxu0 %v4297_v45  ;;  %v4189_v48 = vld [vmem:[#allocation5 + $0x108] sm:$0xff]  ;;  %4423 = vmatprep.mubr.bf16.mxu0 %v5766_v12  ;;  %v4301_v1 = vpack.c.bf16 %v4247_v8, %v4246_v38  ;;  %v4231_v45 = vld [vmem:[#allocation5 + $0x258] sm:$0xff] }
 0xadf   :  { %3913 = vst.msk [vmem:[#allocation5 + $0x228] sm:$0xff] %vm3375_vm5, %v3903_v47  ;;  %v4272_v50 = vpack.c.bf16 %v4189_v48, %v4188_v40  ;;  %v4293_v40 = vpack.c.bf16 %v4231_v45, %v4230_v17  ;;  %v5776_v8 = vld [vmem:[%s8123_s9 + $0x48] ss:$28 sps:$4 sm:$0xff]  }
 0xae0   :  { %v3773_v51 = vpop.permute.xlu1 %3772  ;;  %v4240_v14 = vld [vmem:[#allocation5 + $0x2a0] sm:$0xff] }
 0xae1   :  { %3784 = vst.msk [vmem:[#allocation5 + $0x1a0] sm:$0xff] %vm3375_vm5, %v3773_v51  ;;  %5186 = vmatpush3.bf16.msra.mxu1 %v4272_v50  ;;  %5216 = vmatpush3.bf16.msra.mxu0 %v4289_v43 }
 0xae2   :  { %v3775_v13 = vpop.permute.xlu0 %3774  ;;  %5187 = vmatprep.subr.bf16.mxu1 %v4281_v36  ;;  %v4241_v15 = vld [vmem:[#allocation5 + $0x2a8] sm:$0xff]  ;;  %v4214_v36 = vld [vmem:[#allocation5 + $0x1d0] sm:$0xff] }
 0xae3   :  { %3785 = vst.msk [vmem:[#allocation5 + $0x1a8] sm:$0xff] %vm3375_vm5, %v3775_v13  ;;  %v4298_v53 = vpack.c.bf16 %v4241_v15, %v4240_v14  ;;  %v4198_v14 = vld [vmem:[#allocation5 + $0x150] sm:$0xff] }
 0xae4   :  { %v3645_v18 = vpop.permute.xlu1 %3644  ;;  %4424 = vmatmul.mubr.bf16.gmra.mrb[44].mxu0 %v5112_v5  ;;  %v4224_v59 = vld [vmem:[#allocation5 + $0x220] sm:$0xff]  ;;  %v4285_v5 = vpack.c.bf16 %v4215_v41, %v4214_v36 }
 0xae5   :  { %3656 = vst.msk [vmem:[#allocation5 + $0x120] sm:$0xff] %vm3375_vm5, %v3645_v18  ;;  %5188 = vmatpush3.bf16.msra.mxu1 %v4273_v6  ;;  %5217 = vmatprep.subr.bf16.mxu0 %v4298_v53  ;;  %v4277_v6 = vpack.c.bf16 %v4199_v61, %v4198_v14 }
 0xae6   :  { %v3647_v58 = vpop.permute.xlu0 %3646  ;;  %v4225_v62 = vld [vmem:[#allocation5 + $0x228] sm:$0xff]  ;;  %4513 = vmatprep.mubr.bf16.mxu0 %v5770_v16 }
 0xae7   :  { %3657 = vst.msk [vmem:[#allocation5 + $0x128] sm:$0xff] %vm3375_vm5, %v3647_v58  ;;  %v4290_v24 = vpack.c.bf16 %v4225_v62, %v4224_v59 }
 0xae8   :  { %v4061_v26 = vpop.permute.xlu1 %4060  ;;  %v4208_v42 = vld [vmem:[#allocation5 + $0x1a0] sm:$0xff] }
 0xae9   :  { %4072 = vst.msk [vmem:[#allocation5 + $0x2c0] sm:$0xff] %vm3375_vm5, %v4061_v26  ;;  %5218 = vmatpush3.bf16.msra.mxu0 %v4290_v24 }
 0xaea   :  { %v4063_v28 = vpop.permute.xlu0 %4062  ;;  %5219 = vmatprep.subr.bf16.mxu0 %v4299_v54  ;;  %v4209_v55 = vld [vmem:[#allocation5 + $0x1a8] sm:$0xff]  ;;  %v4303_v54 = vpack.c.bf16 %v4251_v21, %v4250_v60 }
 0xaeb   :  { %4073 = vst.msk [vmem:[#allocation5 + $0x2c8] sm:$0xff] %vm3375_vm5, %v4063_v28  ;;  %v4282_v29 = vpack.c.bf16 %v4209_v55, %v4208_v42 }
 0xaec   :  { %v3933_v63 = vpop.permute.xlu1 %3932  ;;  %v4192_v30 = vld [vmem:[#allocation5 + $0x120] sm:$0xff] }
 0xaed   :  { %3944 = vst.msk [vmem:[#allocation5 + $0x240] sm:$0xff] %vm3375_vm5, %v3933_v63  ;;  %5189 = vmatprep.subr.bf16.mxu1 %v4282_v29  ;;  %5220 = vmatpush3.bf16.msra.mxu0 %v4291_v44  ;;  %v4295_v44 = vpack.c.bf16 %v4235_v27, %v4234_v49 }
 0xaee   :  { %v3935_v11 = vpop.permute.xlu0 %3934  ;;  %v4193_v0 = vld [vmem:[#allocation5 + $0x128] sm:$0xff] }
 0xaef   :  { %3945 = vst.msk [vmem:[#allocation5 + $0x248] sm:$0xff] %vm3375_vm5, %v3935_v11  ;;  %v4274_v56 = vpack.c.bf16 %v4193_v0, %v4192_v30  ;;  %v4219_v11 = vld [vmem:[#allocation5 + $0x1f8] sm:$0xff]  ;;  %v5774_v30 = vld [vmem:[%s8123_s9 + $0x4c] ss:$28 sps:$4 sm:$0xff]  }
 0xaf0   :  { %v3805_v23 = vpop.permute.xlu1 %3804  ;;  %v4244_v31 = vld [vmem:[#allocation5 + $0x2c0] sm:$0xff] }
 0xaf1   :  { %3816 = vst.msk [vmem:[#allocation5 + $0x1c0] sm:$0xff] %vm3375_vm5, %v3805_v23  ;;  %5190 = vmatpush3.bf16.msra.mxu1 %v4274_v56 }
 0xaf2   :  { %v3807_v9 = vpop.permute.xlu0 %3806  ;;  %5191 = vmatprep.subr.bf16.mxu1 %v4283_v34  ;;  %v4245_v57 = vld [vmem:[#allocation5 + $0x2c8] sm:$0xff]  ;;  %v4218_v34 = vld [vmem:[#allocation5 + $0x1f0] sm:$0xff] }
 0xaf3   :  { %3817 = vst.msk [vmem:[#allocation5 + $0x1c8] sm:$0xff] %vm3375_vm5, %v3807_v9  ;;  %v4300_v22 = vpack.c.bf16 %v4245_v57, %v4244_v31  ;;  %v4287_v9 = vpack.c.bf16 %v4219_v11, %v4218_v34  ;;  %v4202_v57 = vld [vmem:[#allocation5 + $0x170] sm:$0xff] }
 0xaf4   :  { %v3677_v12 = vpop.permute.xlu1 %3676  ;;  %v4228_v37 = vld [vmem:[#allocation5 + $0x240] sm:$0xff] }
 0xaf5   :  { %3688 = vst.msk [vmem:[#allocation5 + $0x140] sm:$0xff] %vm3375_vm5, %v3677_v12  ;;  %5192 = vmatpush3.bf16.msra.mxu1 %v4275_v32  ;;  %5221 = vmatprep.subr.bf16.mxu0 %v4300_v22  ;;  %v4279_v32 = vpack.c.bf16 %v4203_v3, %v4202_v57  ;;  %v5771_v12 = vld [vmem:[%s8123_s9 + $0x8] ss:$28 sps:$4 sm:$0xff]  }
 0xaf6   :  { %v3679_v33 = vpop.permute.xlu0 %3678  ;;  %v4229_v7 = vld [vmem:[#allocation5 + $0x248] sm:$0xff] }
 0xaf7   :  { %3689 = vst.msk [vmem:[#allocation5 + $0x148] sm:$0xff] %vm3375_vm5, %v3679_v33  ;;  %v4292_v19 = vpack.c.bf16 %v4229_v7, %v4228_v37  ;;  %v5777_v33 = vld [vmem:[%s8123_s9 + $0x44] ss:$28 sps:$4 sm:$0xff]   ;;  %v5780_v37 = vld [vmem:[%s8123_s9 + $0x18] ss:$28 sps:$4 sm:$0xff]  }
 0xaf8   :  { %v4093_v25 = vpop.permute.xlu1 %4092  ;;  %v4212_v39 = vld [vmem:[#allocation5 + $0x1c0] sm:$0xff] }
 0xaf9   :  { %4104 = vst.msk [vmem:[#allocation5 + $0x2e0] sm:$0xff] %vm3375_vm5, %v4093_v25  ;;  %5222 = vmatpush3.bf16.msra.mxu0 %v4292_v19 }
 0xafa   :  { %v4095_v46 = vpop.permute.xlu0 %4094  ;;  %5223 = vmatprep.subr.bf16.mxu0 %v4301_v1  ;;  %v4213_v4 = vld [vmem:[#allocation5 + $0x1c8] sm:$0xff]  ;;  %v5779_v1 = vld [vmem:[%s8123_s9 + $0x40] ss:$28 sps:$4 sm:$0xff]  }
 0xafb   :  { %4105 = vst.msk [vmem:[#allocation5 + $0x2e8] sm:$0xff] %vm3375_vm5, %v4095_v46  ;;  %v4284_v47 = vpack.c.bf16 %v4213_v4, %v4212_v39  ;;  %v5781_v4 = vld [vmem:[%s8123_s9 + $0x50] ss:$28 sps:$4 sm:$0xff]  }
 0xafc   :  { %v3965_v48 = vpop.permute.xlu1 %3964  ;;  %v4196_v43 = vld [vmem:[#allocation5 + $0x140] sm:$0xff] }
 0xafd   :  { %3976 = vst.msk [vmem:[#allocation5 + $0x260] sm:$0xff] %vm3375_vm5, %v3965_v48  ;;  %5193 = vmatprep.subr.bf16.mxu1 %v4284_v47  ;;  %5224 = vmatpush3.bf16.msra.mxu0 %v4293_v40 }
 0xafe   :  { %v3967_v50 = vpop.permute.xlu0 %3966  ;;  %v4197_v35 = vld [vmem:[#allocation5 + $0x148] sm:$0xff] }
 0xaff   :  { %3977 = vst.msk [vmem:[#allocation5 + $0x268] sm:$0xff] %vm3375_vm5, %v3967_v50  ;;  %v4276_v51 = vpack.c.bf16 %v4197_v35, %v4196_v43 }
 0xb00   :  { %v3837_v52 = vpop.permute.xlu1 %3836  ;;  %v4248_v15 = vld [vmem:[#allocation5 + $0x2e0] sm:$0xff] }
 0xb01   :  { %3848 = vst.msk [vmem:[#allocation5 + $0x1e0] sm:$0xff] %vm3375_vm5, %v3837_v52  ;;  %5194 = vmatpush3.bf16.msra.mxu1 %v4276_v51 }
 0xb02   :  { %v3839_v13 = vpop.permute.xlu0 %3838  ;;  %5195 = vmatprep.subr.bf16.mxu1 %v4285_v5  ;;  %v4249_v16 = vld [vmem:[#allocation5 + $0x2e8] sm:$0xff] }
 0xb03   :  { %3849 = vst.msk [vmem:[#allocation5 + $0x1e8] sm:$0xff] %vm3375_vm5, %v3839_v13  ;;  %v4302_v53 = vpack.c.bf16 %v4249_v16, %v4248_v15 }
 0xb04   :  { %v3709_v18 = vpop.permute.xlu1 %3708  ;;  %v4232_v59 = vld [vmem:[#allocation5 + $0x260] sm:$0xff] }
 0xb05   :  { %3720 = vst.msk [vmem:[#allocation5 + $0x160] sm:$0xff] %vm3375_vm5, %v3709_v18  ;;  %5196 = vmatpush3.bf16.msra.mxu1 %v4277_v6  ;;  %5225 = vmatprep.subr.bf16.mxu0 %v4302_v53 }
 0xb06   :  { %v3711_v58 = vpop.permute.xlu0 %3710  ;;  %v4233_v62 = vld [vmem:[#allocation5 + $0x268] sm:$0xff] }
 0xb07   :  { %3721 = vst.msk [vmem:[#allocation5 + $0x168] sm:$0xff] %vm3375_vm5, %v3711_v58  ;;  %v4294_v24 = vpack.c.bf16 %v4233_v62, %v4232_v59 }
 0xb08   :  { %v4109_v26 = vpop.permute.xlu1 %4108  ;;  %v4216_v42 = vld [vmem:[#allocation5 + $0x1e0] sm:$0xff] }
 0xb09   :  { %4120 = vst.msk [vmem:[#allocation5 + $0x300] sm:$0xff] %vm3354_vm13, %v4109_v26  ;;  %5226 = vmatpush3.bf16.msra.mxu0 %v4294_v24 }
 0xb0a   :  { %v4111_v28 = vpop.permute.xlu0 %4110  ;;  %5227 = vmatprep.subr.bf16.mxu0 %v4303_v54  ;;  %v4217_v55 = vld [vmem:[#allocation5 + $0x1e8] sm:$0xff] }
 0xb0b   :  { %4121 = vst.msk [vmem:[#allocation5 + $0x308] sm:$0xff] %vm3354_vm13, %v4111_v28  ;;  %v4286_v29 = vpack.c.bf16 %v4217_v55, %v4216_v42 }
 0xb0c   :  { %v4125_v63 = vpop.permute.xlu1 %4124  ;;  %v4200_v56 = vld [vmem:[#allocation5 + $0x160] sm:$0xff] }
 0xb0d   :  { %4136 = vst.msk [vmem:[#allocation5 + $0x300] sm:$0xff] %vm3375_vm5, %v4125_v63  ;;  %5197 = vmatprep.subr.bf16.mxu1 %v4286_v29  ;;  %5228 = vmatpush3.bf16.msra.mxu0 %v4295_v44 }
 0xb0e   :  { %v4115_v0 = vpop.permute.xlu0 %4114  ;;  %v4201_v10 = vld [vmem:[#allocation5 + $0x168] sm:$0xff] }
 0xb0f   :  { %4123 = vst.msk [vmem:[#allocation5 + $0x318] sm:$0xff] %vm3354_vm13, %v4115_v0  ;;  %v4278_v23 = vpack.c.bf16 %v4201_v10, %v4200_v56 }
 0xb10   :  { %v4113_v20 = vpop.permute.xlu1 %4112  ;;  %4514 = vmatmul.mubr.bf16.vlgmr.msra.gmra.mrb[48].mxu0 %v5768_v2 }
 0xb11   :  { %4122 = vst.msk [vmem:[#allocation5 + $0x310] sm:$0xff] %vm3354_vm13, %v4113_v20  ;;  %5198 = vmatpush3.bf16.msra.mxu1 %v4278_v23  ;;  %4521 = vmatprep.mubr.bf16.mxu0 %v5774_v30 }
 0xb12   :  { %v4127_v31 = vpop.permute.xlu0 %4126  ;;  %5199 = vmatprep.subr.bf16.mxu1 %v4287_v9 }
 0xb13   :  { %4137 = vst.msk [vmem:[#allocation5 + $0x308] sm:$0xff] %vm3375_vm5, %v4127_v31 }
 0xb14   :  { %v4129_v22 = vpop.permute.xlu1 %4128  ;;  %v4252_v19 = vld [vmem:[#allocation5 + $0x300] sm:$0xff] }
 0xb15   :  { %4138 = vst.msk [vmem:[#allocation5 + $0x310] sm:$0xff] %vm3375_vm5, %v4129_v22  ;;  %5200 = vmatpush3.bf16.msra.mxu1 %v4279_v32 }
 0xb16   :  { %v4131_v7 = vpop.permute.xlu0 %4130 }
 0xb17   :  { %4139 = vst.msk [vmem:[#allocation5 + $0x318] sm:$0xff] %vm3375_vm5, %v4131_v7 }
 0xb18   :  { %4465 = vmatmul.mubr.bf16.vlgmr.msra.gmra.mrb[36].mxu1 %v5771_v12  ;;  %4522 = vmatmul.mubr.bf16.gmra.mrb[52].mxu0 %v5776_v8 }
 0xb19   :  { %4472 = vmatprep.mubr.bf16.mxu1 %v5777_v33  ;;  %5274 = vmatprep.mubr.msk.bf16.mxu0 %vm4376_vm14, %v5780_v37 }
 0xb1a   :  { %v4253_v38 = vld [vmem:[#allocation5 + $0x308] sm:$0xff] }
 0xb1b   :  { %v4304_v25 = vpack.c.bf16 %v4253_v38, %v4252_v19 }
 0xb1c   :  { %v4254_v45 = vld [vmem:[#allocation5 + $0x310] sm:$0xff] }
 0xb1d   :  { %5270 = vmatprep.subr.bf16.mxu0 %v4304_v25 }
 0xb1e   :  { %5271 = vmatpush3.bf16.msra.mxu0 %v4304_v25  ;;  %v4255_v46 = vld [vmem:[#allocation5 + $0x318] sm:$0xff] }
 0xb1f   :  { %v4305_v39 = vpack.c.bf16 %v4255_v46, %v4254_v45 }
 0xb20   :  { %4473 = vmatmul.mubr.bf16.gmra.mrb[40].mxu1 %v5779_v1 }
 0xb21   :  { %5272 = vmatprep.subr.bf16.mxu0 %v4305_v39 }
 0xb22   :  { %5273 = vmatpush3.bf16.msra.mxu0 %v4305_v39 }
 0xb25   :  { %5275 = vmatmul.mubr.msk.bf16.vlgmr.msra.gmra.mrb[56].mxu0 %vm4376_vm14, %v5781_v4 }
 0xbaf   :  { %v5173_v17 = vpop.f32.mrb[40].mxu0 }
 0xbb0   :  { %v5174_v47 = vpop.f32.mrb[41].mxu0 }
 0xbb1   :  { %v5175_v40 = vadd.f32 %v5174_v47, %v5173_v17  ;;  %v5176_v48 = vpop.f32.mrb[42].mxu0 }
 0xbb2   :  { %v5177_v41 = vpop.f32.mrb[43].mxu0 }
 0xbb3   :  { %v5178_v50 = vadd.f32 %v5177_v41, %v5176_v48 }
 0xbb7   :  { %v5179_v43 = vpop.f32.mrb[44].mxu0 }
 0xbb8   :  { %v5180_v35 = vpop.f32.mrb[45].mxu0 }
 0xbb9   :  { %v5181_v51 = vadd.f32 %v5180_v35, %v5179_v43  ;;  %v5182_v36 = vpop.f32.mrb[46].mxu0 }
 0xbba   :  { %v5183_v52 = vpop.f32.mrb[47].mxu0 }
 0xbbb   :  { %v5184_v5 = vadd.f32 %v5183_v52, %v5182_v36 }
 0xbe3   :  { %v5229_v61 = vpop.f32.mrb[48].mxu0 }
 0xbe4   :  { %v5230_v13 = vpop.f32.mrb[49].mxu0 }
 0xbe5   :  { %v5231_v14 = vadd.f32 %v5230_v13, %v5229_v61  ;;  %v5232_v15 = vpop.f32.mrb[50].mxu0  ;;  %v4583_v61 = vld [vmem:[%s8124_s11] sm:$0xff]  ;;  %v4584_v13 = vld [vmem:[%s8124_s11 + $0x8] sm:$0xff] }
 0xbe6   :  { %v5233_v16 = vpop.f32.mrb[51].mxu0 }
 0xbe7   :  { %v5234_v6 = vadd.f32 %v5233_v16, %v5232_v15 }
 0xbeb   :  { %v5201_v53 = vpop.f32.mrb[36].mxu1  ;;  %v5235_v18 = vpop.f32.mrb[52].mxu0 }
 0xbec   :  { %v5202_v21 = vpop.f32.mrb[37].mxu1  ;;  %v5236_v58 = vpop.f32.mrb[53].mxu0 }
 0xbed   :  { %v5203_v59 = vadd.f32 %v5202_v21, %v5201_v53  ;;  %v5204_v62 = vpop.f32.mrb[38].mxu1  ;;  %v5237_v24 = vadd.f32 %v5236_v58, %v5235_v18  ;;  %v5238_v60 = vpop.f32.mrb[54].mxu0 }
 0xbee   :  { %v5205_v26 = vpop.f32.mrb[39].mxu1  ;;  %v5239_v54 = vpop.f32.mrb[55].mxu0 }
 0xbef   :  { %v4467_v27 = vadd.f32 %v5203_v59, %v5175_v40  ;;  %v5206_v28 = vadd.f32 %v5205_v26, %v5204_v62  ;;  %v5240_v42 = vadd.f32 %v5239_v54, %v5238_v60  ;;  %v4579_v26 = vld [vmem:[%s8125_s10] sm:$0xff] }
 0xbf1   :  { %v4470_v55 = vadd.f32 %v5206_v28, %v5178_v50  ;;  %v4516_v49 = vadd.f32 %v5231_v14, %v4467_v27  ;;  %v4580_v27 = vld [vmem:[%s8125_s10 + $0x8] sm:$0xff] }
 0xbf3   :  { %v5207_v29 = vpop.f32.mrb[40].mxu1  ;;  %v4519_v44 = vadd.f32 %v5234_v6, %v4470_v55 }
 0xbf4   :  { %v5208_v63 = vpop.f32.mrb[41].mxu1 }
 0xbf5   :  { %v5209_v2 = vadd.f32 %v5208_v63, %v5207_v29  ;;  %v5210_v11 = vpop.f32.mrb[42].mxu1  ;;  %v4582_v29 = vld [vmem:[%s8125_s10 + $0x18] sm:$0xff] }
 0xbf6   :  { %v5211_v30 = vpop.f32.mrb[43].mxu1 }
 0xbf7   :  { %v4475_v0 = vadd.f32 %v5209_v2, %v5181_v51  ;;  %v5212_v56 = vadd.f32 %v5211_v30, %v5210_v11  ;;  %v4585_v30 = vld [vmem:[%s8124_s11 + $0x10] sm:$0xff] }
 0xbf8   :  { %v5276_v10 = vpop.f32.mrb[56].mxu0 }
 0xbf9   :  { %v4478_v23 = vadd.f32 %v5212_v56, %v5184_v5  ;;  %v4524_v34 = vadd.f32 %v5237_v24, %v4475_v0  ;;  %v4564_v20 = vpop.f32.mrb[57].mxu0  ;;  %v4586_v0 = vld [vmem:[%s8124_s11 + $0x18] sm:$0xff]  ;;  %s5849_s11 = smov 127  }
 0xbfa   :  { %v4565_v9 = vadd.f32 %v4564_v20, %v4516_v49  ;;  %v5277_v3 = vpop.f32.mrb[58].mxu0  ;;  %v4581_v49 = vld [vmem:[%s8125_s10 + $0x10] sm:$0xff]  ;;  %s5848_s10 = smov 1  }
 0xbfb   :  { %v4573_v31 = vadd.f32 %v5276_v10, %v4524_v34  ;;  %v4527_v57 = vadd.f32 %v5240_v42, %v4478_v23  ;;  %v4567_v32 = vpop.f32.mrb[59].mxu0 }
 0xbfc   :  { %v4568_v22 = vadd.f32 %v4567_v32, %v4519_v44  ;;  %v4587_v12 = vsel %vm376_vm1, %v4565_v9, 0.0 }
 0xbfd   :  { %v4576_v8 = vadd.f32 %v5277_v3, %v4527_v57  ;;  %4588 = vadd.xlane.f32.xlu1 %v4587_v12  ;;  %v4593_v7 = vsel %vm376_vm1, %v4573_v31, 0.0 }
 0xbfe   :  { %v4590_v33 = vsel %vm376_vm1, %v4568_v22, 0.0 }
 0xbff   :  { %4591 = vadd.xlane.f32.xlu0 %v4590_v33  ;;  %v4596_v37 = vsel %vm376_vm1, %v4576_v8, 0.0 }
 0xc01   :  { %4597 = vadd.xlane.f32.xlu1 %v4596_v37 }
 0xc03   :  { %4594 = vadd.xlane.f32.xlu0 %v4593_v7 }
 0xc8a   :  { %v4589_v19 = vpop.xlane.xlu1 %4588 }
 0xc8b   :  { %v4599_v38 = vmul.f32 0.125, %v4589_v19 }
 0xc8c   :  { %v4592_v25 = vpop.xlane.xlu0 %4591 }
 0xc8d   :  { %v8026_v1 = vsub.f32 %v4565_v9, %v4599_v38  ;;  %v4600_v45 = vmul.f32 0.125, %v4592_v25 }
 0xc8e   :  { %v4598_v46 = vpop.xlane.xlu1 %4597 }
 0xc8f   :  { %v8028_v39 = vsub.f32 %v4568_v22, %v4600_v45  ;;  %v4602_v4 = vmul.f32 0.125, %v4598_v46  ;;  %v4607_v17 = vmul.f32 %v8026_v1, %v8026_v1 }
 0xc90   :  { %v4595_v47 = vpop.xlane.xlu0 %4594 }
 0xc91   :  { %v8032_v40 = vsub.f32 %v4576_v8, %v4602_v4  ;;  %v4601_v48 = vmul.f32 0.125, %v4595_v47  ;;  %v4611_v41 = vsel %vm376_vm1, %v4607_v17, 0.0  ;;  %v4608_v50 = vmul.f32 %v8028_v39, %v8028_v39 }
 0xc92   :  { %4612 = vadd.xlane.f32.xlu0 %v4611_v41  ;;  %v5847_v47 = vmov 0.0  }
 0xc93   :  { %v8037_v43 = vsub.f32 %v4573_v31, %v4601_v48  ;;  %v4614_v35 = vsel %vm376_vm1, %v4608_v50, 0.0  ;;  %v4610_v51 = vmul.f32 %v8032_v40, %v8032_v40  ;;  %5278 = vmatprep.subr.bf16.mxu1 %v5847_v47  ;;  %v4776_v50 = vld [vmem:[%s8126_s13] sm:$0x3f]  ;;  %5294 = vmatprep.mubr.msk.bf16.mxu1 %vm5852_vm15, %v5847_v47 }
 0xc94   :  { %4615 = vadd.xlane.f32.xlu1 %v4614_v35 }
 0xc95   :  { %v4609_v36 = vmul.f32 %v8037_v43, %v8037_v43  ;;  %v4620_v5 = vsel %vm376_vm1, %v4610_v51, 0.0 }
 0xc97   :  { %v4617_v52 = vsel %vm376_vm1, %v4609_v36, 0.0  ;;  %vm4709_vm1 = vcmask 7168  }
 0xc98   :  { %4618 = vadd.xlane.f32.xlu0 %v4617_v52  ;;  %4621 = vadd.xlane.f32.xlu1 %v4620_v5 }
 0xca9   :  { %4665 = vperm.xlu1 %5390, %v4583_v61  }
 0xcae   :  { %4670 = vperm.xlu0 %5389, %v4584_v13  }
 0xd1f   :  { %v4613_v14 = vpop.xlane.xlu0 %4612 }
 0xd20   :  { %v4623_v15 = vmul.f32 0.125, %v4613_v14 }
 0xd21   :  { %v4616_v16 = vpop.xlane.xlu1 %4615 }
 0xd22   :  { %v4627_v6 = vadd.f32 1e-05, %v4623_v15  ;;  %v4624_v53 = vmul.f32 0.125, %v4616_v16 }
 0xd24   :  { %5794 = vrsqrt.f32 %v4627_v6  ;;  %v4628_v18 = vadd.f32 1e-05, %v4624_v53 }
 0xd25   :  { %v4619_v21 = vpop.xlane.xlu0 %4618  ;;  %v4622_v58 = vpop.xlane.xlu1 %4621 }
 0xd26   :  { %5796 = vrsqrt.f32 %v4628_v18  ;;  %v4625_v59 = vmul.f32 0.125, %v4619_v21  ;;  %v4626_v62 = vmul.f32 0.125, %v4622_v58 }
 0xd28   :  { %v4629_v24 = vadd.f32 1e-05, %v4625_v59  ;;  %v4630_v60 = vadd.f32 1e-05, %v4626_v62 }
 0xd29   :  { %v4666_v10 = vpop.permute.xlu1 %4665 }
 0xd2a   :  { %5798 = vrsqrt.f32 %v4629_v24 }
 0xd2b   :  { %5800 = vrsqrt.f32 %v4630_v60 }
 0xd2d   :  { %v4671_v56 = vpop.permute.xlu0 %4670 }
 0xd2e   :  { %v5795_v54 = vpop.eup %5794 }
 0xd2f   :  { %v4635_v28 = vmul.f32 %v5795_v54, %v4579_v26  ;;  %v4767_v26 = vld [vmem:[%s8127_s12] sm:$0x7] }
 0xd30   :  { %v5797_v42 = vpop.eup %5796 }
 0xd31   :  { %4641 = vperm.xlu0 %5389, %v4635_v28   ;;  %v4636_v55 = vmul.f32 %v5797_v42, %v4580_v27 }
 0xd33   :  { %4646 = vperm.xlu1 %5390, %v4636_v55  }
 0xd34   :  { %v5799_v44 = vpop.eup %5798 }
 0xd35   :  { %v5801_v63 = vpop.eup %5800  ;;  %v4637_v2 = vmul.f32 %v5799_v44, %v4581_v49 }
 0xd36   :  { %v4638_v11 = vmul.f32 %v5801_v63, %v4582_v29 }
 0xd37   :  { %4651 = vperm.xlu1 %5390, %v4637_v2  }
 0xd38   :  { %4656 = vperm.xlu0 %5389, %v4638_v11  }
 0xd3b   :  { %4675 = vperm.xlu1 %5390, %v4585_v30  }
 0xd3c   :  { %4680 = vperm.xlu0 %5389, %v4586_v0  }
 0xdb0   :  { %v4642_v23 = vpop.permute.xlu0 %4641 }
 0xdb1   :  { %v4659_v34 = vmul.f32 %v4642_v23, %v8026_v1 }
 0xdb2   :  { %v4647_v20 = vpop.permute.xlu1 %4646 }
 0xdb3   :  { %v4683_v9 = vadd.f32 %v4666_v10, %v4659_v34  ;;  %v4660_v3 = vmul.f32 %v4647_v20, %v8028_v39 }
 0xdb5   :  { %v4684_v31 = vadd.f32 %v4671_v56, %v4660_v3  ;;  %v4687_v32 = vmax.f32 %v4683_v9, 0.0 }
 0xdb6   :  { %v4652_v57 = vpop.permute.xlu1 %4651 }
 0xdb7   :  { %v4688_v22 = vmax.f32 %v4684_v31, 0.0  ;;  %v4657_v12 = vpop.permute.xlu0 %4656  ;;  %v4661_v33 = vmul.f32 %v4652_v57, %v8037_v43 }
 0xdb8   :  { %v4662_v37 = vmul.f32 %v4657_v12, %v8032_v40 }
 0xdb9   :  { %v4691_v8 = vpack.c.bf16 %v4688_v22, %v4687_v32 }
 0xdba   :  { %v4676_v7 = vpop.permute.xlu1 %4675 }
 0xdbb   :  { %4693 = vst.msk [vmem:[#allocation6] sm:$0xff] %vm3354_vm13, %v4691_v8  ;;  %v4681_v19 = vpop.permute.xlu0 %4680  ;;  %v4685_v38 = vadd.f32 %v4676_v7, %v4661_v33  ;;  %4697 = vrot.lane.b32.xlu1 %v4691_v8, %s5829_s29 }
 0xdbc   :  { %v4686_v25 = vadd.f32 %v4681_v19, %v4662_v37 }
 0xdbd   :  { %v4689_v1 = vmax.f32 %v4685_v38, 0.0 }
 0xdbe   :  { %v4690_v45 = vmax.f32 %v4686_v25, 0.0 }
 0xdc0   :  { %v4692_v46 = vpack.c.bf16 %v4690_v45, %v4689_v1 }
 0xdc2   :  { %4694 = vst.msk [vmem:[#allocation6 + $0x8] sm:$0xff] %vm3354_vm13, %v4692_v46  ;;  %4699 = vrot.lane.b32.xlu0 %v4692_v46, %s5829_s29  ;;  %v4705_v39 = vld [vmem:[#allocation6] sm:$0xff]  ;;  %s5850_s29 = smov 126  }
 0xdc3   :  { %4710 = vst.msk [vmem:[#allocation7] sm:$0xff] %vm4709_vm1, %v4705_v39 }
 0xdc9   :  { %v4706_v4 = vld [vmem:[#allocation6 + $0x8] sm:$0xff] }
 0xdca   :  { %4711 = vst.msk [vmem:[#allocation7 + $0x8] sm:$0xff] %vm4709_vm1, %v4706_v4 }
 0xe2d   :  { %v4698_v17 = vpop.permute.xlu1 %4697 }
 0xe2e   :  { %4703 = vst.msk [vmem:[#allocation6 + $0x10] sm:$0xff] %vm3354_vm13, %v4698_v17 }
 0xe34   :  { %v4700_v40 = vpop.permute.xlu0 %4699 }
 0xe35   :  { %4704 = vst.msk [vmem:[#allocation6 + $0x18] sm:$0xff] %vm3354_vm13, %v4700_v40  ;;  %v4707_v48 = vld [vmem:[#allocation6 + $0x10] sm:$0xff] }
 0xe36   :  { %4714 = vrot.lane.b32.xlu1 %v4707_v48, %s5848_s10 }
 0xe3a   :  { %4725 = vrot.lane.b32.xlu1 %v4705_v39, %s5849_s11 }
 0xe3c   :  { %v4708_v41 = vld [vmem:[#allocation6 + $0x18] sm:$0xff] }
 0xe3d   :  { %4716 = vrot.lane.b32.xlu0 %v4708_v41, %s5848_s10 }
 0xe3e   :  { %4735 = vrot.lane.b32.xlu1 %v4705_v39, %s5850_s29 }
 0xe41   :  { %4727 = vrot.lane.b32.xlu0 %v4706_v4, %s5849_s11 }
 0xe42   :  { %4737 = vrot.lane.b32.xlu1 %v4706_v4, %s5850_s29 }
 0xe45   :  { %4743 = vrot.lane.b32.xlu0 %v4707_v48, %s5849_s11 }
 0xe46   :  { %4751 = vrot.lane.b32.xlu1 %v4705_v39, %s5851_s23 }
 0xe49   :  { %4745 = vrot.lane.b32.xlu0 %v4708_v41, %s5849_s11 }
 0xe4a   :  { %4753 = vrot.lane.b32.xlu1 %v4706_v4, %s5851_s23 }
 0xe4d   :  { %4759 = vrot.lane.b32.xlu0 %v4707_v48, %s5850_s29 }
 0xe4e   :  { %4779 = vperm.xlu1 %5390, %v4776_v50  }
 0xe51   :  { %4761 = vrot.lane.b32.xlu0 %v4708_v41, %s5850_s29 }
 0xea8   :  { %v4715_v43 = vpop.permute.xlu1 %4714 }
 0xea9   :  { %4721 = vst.msk [vmem:[#allocation7] sm:$0xff] %vm4720_vm0, %v4715_v43 }
 0xeac   :  { %v4726_v35 = vpop.permute.xlu1 %4725 }
 0xead   :  { %4731 = vst.msk [vmem:[#allocation7 + $0x10] sm:$0xff] %vm4709_vm1, %v4726_v35 }
 0xeae   :  { %4733 = vst.msk [vmem:[#allocation7 + $0x10] sm:$0xff] %vm4720_vm0, %v4707_v48 }
 0xeaf   :  { %v4717_v51 = vpop.permute.xlu0 %4716 }
 0xeb0   :  { %4722 = vst.msk [vmem:[#allocation7 + $0x8] sm:$0xff] %vm4720_vm0, %v4717_v51  ;;  %v4736_v36 = vpop.permute.xlu1 %4735  ;;  %v4768_v52 = vld [vmem:[#allocation7] sm:$0xff] }
 0xeb1   :  { %4741 = vst.msk [vmem:[#allocation7 + $0x20] sm:$0xff] %vm4709_vm1, %v4736_v36  ;;  %5279 = vmatpush3.bf16.msra.mxu1 %v4768_v52 }
 0xeb2   :  { %5280 = vmatprep.subr.bf16.mxu1 %v5847_v47 }
 0xeb3   :  { %v4728_v5 = vpop.permute.xlu0 %4727 }
 0xeb4   :  { %4732 = vst.msk [vmem:[#allocation7 + $0x18] sm:$0xff] %vm4709_vm1, %v4728_v5  ;;  %v4738_v61 = vpop.permute.xlu1 %4737 }
 0xeb5   :  { %4734 = vst.msk [vmem:[#allocation7 + $0x18] sm:$0xff] %vm4720_vm0, %v4708_v41  ;;  %v4770_v6 = vld [vmem:[#allocation7 + $0x10] sm:$0xff] }
 0xeb6   :  { %4742 = vst.msk [vmem:[#allocation7 + $0x28] sm:$0xff] %vm4709_vm1, %v4738_v61 }
 0xeb7   :  { %v4744_v13 = vpop.permute.xlu0 %4743  ;;  %v4769_v14 = vld [vmem:[#allocation7 + $0x8] sm:$0xff] }
 0xeb8   :  { %4749 = vst.msk [vmem:[#allocation7 + $0x20] sm:$0xff] %vm4720_vm0, %v4744_v13  ;;  %5281 = vmatpush3.bf16.msra.mxu1 %v4769_v14  ;;  %v4752_v15 = vpop.permute.xlu1 %4751 }
 0xeb9   :  { %4757 = vst.msk [vmem:[#allocation7 + $0x30] sm:$0xff] %vm4709_vm1, %v4752_v15  ;;  %5282 = vmatprep.subr.bf16.mxu1 %v5847_v47 }
 0xebb   :  { %v4746_v16 = vpop.permute.xlu0 %4745 }
 0xebc   :  { %4750 = vst.msk [vmem:[#allocation7 + $0x28] sm:$0xff] %vm4720_vm0, %v4746_v16  ;;  %5283 = vmatpush3.bf16.msra.mxu1 %v4770_v6  ;;  %v4754_v53 = vpop.permute.xlu1 %4753  ;;  %v4771_v21 = vld [vmem:[#allocation7 + $0x18] sm:$0xff] }
 0xebd   :  { %4758 = vst.msk [vmem:[#allocation7 + $0x38] sm:$0xff] %vm4709_vm1, %v4754_v53  ;;  %5284 = vmatprep.subr.bf16.mxu1 %v5847_v47 }
 0xebf   :  { %v4760_v18 = vpop.permute.xlu0 %4759  ;;  %v4772_v59 = vld [vmem:[#allocation7 + $0x20] sm:$0xff] }
 0xec0   :  { %4765 = vst.msk [vmem:[#allocation7 + $0x30] sm:$0xff] %vm4720_vm0, %v4760_v18  ;;  %5285 = vmatpush3.bf16.msra.mxu1 %v4771_v21 }
 0xec1   :  { %5286 = vmatprep.subr.bf16.mxu1 %v5847_v47 }
 0xec3   :  { %v4762_v58 = vpop.permute.xlu0 %4761  ;;  %v4773_v62 = vld [vmem:[#allocation7 + $0x28] sm:$0xff] }
 0xec4   :  { %4766 = vst.msk [vmem:[#allocation7 + $0x38] sm:$0xff] %vm4720_vm0, %v4762_v58  ;;  %5287 = vmatpush3.bf16.msra.mxu1 %v4772_v59 }
 0xec5   :  { %5288 = vmatprep.subr.bf16.mxu1 %v5847_v47 }
 0xec7   :  { %v4774_v24 = vld [vmem:[#allocation7 + $0x30] sm:$0xff] }
 0xec8   :  { %5289 = vmatpush3.bf16.msra.mxu1 %v4773_v62 }
 0xec9   :  { %5290 = vmatprep.subr.bf16.mxu1 %v5847_v47 }
 0xecb   :  { %v4775_v60 = vld [vmem:[#allocation7 + $0x38] sm:$0xff] }
 0xecc   :  { %5291 = vmatpush3.bf16.msra.mxu1 %v4774_v24 }
 0xecd   :  { %5292 = vmatprep.subr.bf16.mxu1 %v5847_v47  ;;  %v4780_v54 = vpop.permute.xlu1 %4779 }
 0xed0   :  { %5293 = vmatpush3.bf16.msra.mxu1 %v4775_v60 }
 0xed3   :  { %5295 = vmatmul.mubr.bf16.vlgmr.msra.gmra.mrb[44].mxu1 %v4767_v26 }
 0xfa6   :  { %v4816_v27 = vpop.f32.mrb[44].mxu1 }
 0xfa7   :  { %v4817_v28 = vadd.f32 %v4816_v27, %v4780_v54  ;;  %v5296_v42 = vpop.f32.mrb[45].mxu1 }
 0xfa8   :  { %v4819_v55 = vpop.f32.mrb[46].mxu1 }
 0xfa9   :  { %4823 = vst.msk [vmem:[%s8128_s14] sm:$0x3f] %vm4822_vm2, %v4817_v28  ;;  %v5297_v49 = vpop.f32.mrb[47].mxu1 }

</bundles_post_ra>
